<compile_context>
chip_gen: v7x
topology: tpu7x:2x2x1
jax: 0.10.0
libtpu: 0.0.40
codegen_flags: <defaults>
</compile_context>

<pallas_src>
import functools
import math

import numpy as np
import jax
import jax.numpy as jnp
from jax.experimental import pallas as pl
from jax.experimental.pallas import tpu as pltpu


# ------------------------------ Pallas kernel ------------------------------ #

def _make_nocs_kernel(b_tile, hin, win, ho, wo, feat, d1, d2):
    """Builds the fused kernel for one batch block of `b_tile` images.

    Inputs (VMEM blocks):
      xp_ref : (B, Hin+2, Win+2, F) bf16   zero-padded NHWC activations
      w1_ref : (9, F, D1)           bf16   conv1, heads concatenated on Cout
      b1_ref : (1, D1)              f32
      awt_ref: (Win, Wo)            bf16   Aw^T  (align_corners=True, W axis)
      aht_ref: (Hin, Ho)            bf16   Ah^T  (align_corners=True, H axis)
      w2_ref : (9, D1, D2)          bf16   conv2, block-diagonal over heads
      b2_ref : (1, D2)              f32
      w3_ref : (D2, 3)              f32    1x1 projection, block-diag over heads
      b3_ref : (1, 3)               f32
      o_ref  : (B, 3, Wo*Ho)        f32    lane-dense output (spatial in (w, h) order)
    """

    def kernel(xp_ref, w1_ref, b1_ref, awt_ref, aht_ref,
               w2_ref, b2_ref, w3_ref, b3_ref, o_ref):
        # ---------------- conv1 (3x3, zero padding done on the host) ----------
        # Spatial-major: rows = (b, h, w) fill the MXU M dim, lanes = channels.
        # 9 accumulated matmuls, each K = F (>=128 at DPT feature sizes).
        xp = xp_ref[...]                                     # (B, Hp, Wp, F) bf16
        w1 = w1_ref[...]                                     # (9, F, D1)     bf16
        m1 = b_tile * hin * win
        h1 = jnp.zeros((m1, d1), jnp.float32)
        for ky in range(3):
            for kx in range(3):
                v = xp[:, ky:ky + hin, kx:kx + win, :]       # (B, Hin, Win, F)
                v = v.reshape(m1, feat)
                h1 = h1 + jnp.dot(v, w1[ky * 3 + kx],
                                  preferred_element_type=jnp.float32)
        h1 = h1 + b1_ref[...]                                # conv1 bias, f32

        # -------- separable bilinear resize (align_corners=True): W then H ----
        # Transposes are done in f32 (vanilla XLU path); operands are cast to
        # bf16 right before each MXU matmul, accumulation stays f32.
        t = h1.reshape(b_tile, hin, win, d1)
        t = jnp.swapaxes(t, -1, -2)                          # (B, Hin, D1, Win)
        t = t.astype(jnp.bfloat16).reshape(b_tile * hin * d1, win)
        t = jnp.dot(t, awt_ref[...],                         # contract Win -> Wo
                    preferred_element_type=jnp.float32)
        t = t.reshape(b_tile, hin, d1, wo)

        t = jnp.transpose(t, (0, 2, 1, 3))                   # (B, D1, Hin, Wo)
        t = jnp.swapaxes(t, -1, -2)                          # (B, D1, Wo, Hin)
        t = t.astype(jnp.bfloat16).reshape(b_tile * d1 * wo, hin)
        t = jnp.dot(t, aht_ref[...],                         # contract Hin -> Ho
                    preferred_element_type=jnp.float32)
        t = t.reshape(b_tile, d1, wo, ho)

        # back to spatial-major (rows = (b, w, h), lanes = D1) for conv2.
        r = jnp.transpose(t, (0, 2, 1, 3))                   # (B, Wo, D1, Ho)
        r = jnp.swapaxes(r, -1, -2).astype(jnp.bfloat16)     # (B, Wo, Ho, D1)

        # ---------------- conv2 (3x3, zero padding built in VMEM) -------------
        # 9 accumulated matmuls with K = D1 and M = B*Wo*Ho.
        zw = jnp.zeros((b_tile, 1, ho, d1), jnp.bfloat16)
        rp = jnp.concatenate([zw, r, zw], axis=1)            # (B, Wo+2, Ho, D1)
        zh = jnp.zeros((b_tile, wo + 2, 1, d1), jnp.bfloat16)
        rp = jnp.concatenate([zh, rp, zh], axis=2)           # (B, Wo+2, Ho+2, D1)

        w2 = w2_ref[...]                                     # (9, D1, D2) bf16
        m2 = b_tile * wo * ho
        acc = jnp.zeros((m2, d2), jnp.float32)
        for ky in range(3):
            for kx in range(3):
                v = rp[:, kx:kx + wo, ky:ky + ho, :]         # axis 1 is W here
                v = v.reshape(m2, d1)
                acc = acc + jnp.dot(v, w2[ky * 3 + kx],
                                    preferred_element_type=jnp.float32)
        acc = jnp.maximum(acc + b2_ref[...], 0.0)            # bias + ReLU, f32

        # ---------------- 1x1 projection (block-diag over heads), f32 ---------
        out = jnp.dot(acc, w3_ref[...],
                      preferred_element_type=jnp.float32) + b3_ref[...]  # (M2, 3)

        # lane-dense store: transpose the small (Wo*Ho, 3) slab per image.
        out = out.reshape(b_tile, wo * ho, 3)
        out = jnp.swapaxes(out, -1, -2)                      # (B, 3, Wo*Ho)
        o_ref[...] = out.astype(o_ref.dtype)

    return kernel


# --------------------- host-side constants (cached) ------------------------ #

@functools.lru_cache(maxsize=None)
def _interp_matrix(n_in, n_out):
    """1-D bilinear interpolation matrix (n_out, n_in), align_corners=True."""
    a = np.zeros((n_out, n_in), np.float32)
    if n_in == 1 or n_out == 1:
        src = np.zeros((n_out,), np.float64)
    else:
        src = np.arange(n_out, dtype=np.float64) * (n_in - 1) / (n_out - 1)
    i0 = np.clip(np.floor(src).astype(np.int64), 0, n_in - 1)
    i1 = np.clip(i0 + 1, 0, n_in - 1)
    frac = (src - i0).astype(np.float32)
    for o in range(n_out):
        a[o, i0[o]] += 1.0 - frac[o]
        a[o, i1[o]] += frac[o]
    return a


# ------------------------------ public wrapper ------------------------------ #

def nocs_head_xyz_apply(x_nchw, params_xyz, out_hw, *, b_tile=1):
    """NOCSHead_XYZ forward. Input (N, features, H, W), output (N, 3, Ho, Wo)."""
    n, feat, hin, win = x_nchw.shape
    ho, wo = out_hw
    c1 = feat // 2
    d1 = 3 * c1              # conv1 output channels, heads concatenated
    d2 = 3 * 32              # conv2 output channels, heads concatenated
    hp, wp = hin + 2, win + 2
    assert n % b_tile == 0, "batch must be divisible by b_tile"

    heads = ("x", "y", "z")

    # activations: NCHW -> NHWC, zero-pad H and W by 1 (conv1 padding), bf16.
    x = jnp.transpose(x_nchw, (0, 2, 3, 1))
    xp = jnp.pad(x, ((0, 0), (1, 1), (1, 1), (0, 0))).astype(jnp.bfloat16)

    # conv1: heads concatenated along Cout -> (9, F, D1).
    w1 = jnp.concatenate([params_xyz[k]["w1"] for k in heads], axis=-1)
    w1 = w1.reshape(9, feat, d1).astype(jnp.bfloat16)
    b1 = jnp.concatenate([params_xyz[k]["b1"] for k in heads]
                         ).reshape(1, d1).astype(jnp.float32)

    # conv2: block-diagonal over heads -> (9, D1, D2).
    w2 = jnp.zeros((3, 3, d1, d2), jnp.float32)
    for h, k in enumerate(heads):
        w2 = w2.at[:, :, h * c1:(h + 1) * c1, h * 32:(h + 1) * 32].set(
            params_xyz[k]["w2"])
    w2 = w2.reshape(9, d1, d2).astype(jnp.bfloat16)
    b2 = jnp.concatenate([params_xyz[k]["b2"] for k in heads]
                         ).reshape(1, d2).astype(jnp.float32)

    # 1x1 projection: block-diagonal over heads -> (D2, 3), tiny so kept f32.
    w3 = jnp.zeros((d2, 3), jnp.float32)
    for h, k in enumerate(heads):
        w3 = w3.at[h * 32:(h + 1) * 32, h].set(params_xyz[k]["w3"][:, 0])
    b3 = jnp.concatenate([params_xyz[k]["b3"] for k in heads]
                         ).reshape(1, 3).astype(jnp.float32)

    # separable align_corners=True resize matrices (transposed), bf16.
    awt = jnp.asarray(_interp_matrix(win, wo).T, jnp.bfloat16)   # (Win, Wo)
    aht = jnp.asarray(_interp_matrix(hin, ho).T, jnp.bfloat16)   # (Hin, Ho)

    # VMEM budget sized from the actual buffers, clamped under v7x's 64 MiB.
    def _prod(s):
        return int(np.prod(s))
    blk_bytes = 2 * (_prod((b_tile, hp, wp, feat)) * 2
                     + _prod((b_tile, 3, ho * wo)) * 4)
    const_bytes = 2 * (_prod((9, feat, d1)) * 2 + _prod((9, d1, d2)) * 2
                       + (d2 * 3 + d1 + d2 + 3) * 4
                       + (win * wo + hin * ho) * 2)
    inter_bytes = (_prod((b_tile * hin * win, d1)) * 8        # h1 (+ transposed)
                   + _prod((b_tile * hin * d1, wo)) * 10      # W-resize out
                   + _prod((b_tile * d1 * wo, ho)) * 12       # H-resize out, r, rp
                   + _prod((b_tile * wo * ho, d1)) * 4        # conv2 tap view
                   + _prod((b_tile * wo * ho, d2)) * 8)       # conv2 acc / relu
    vmem_limit = int(min(56 * 2 ** 20,
                         max(32 * 2 ** 20,
                             blk_bytes + const_bytes + 2 * inter_bytes)))

    out = pl.pallas_call(
        _make_nocs_kernel(b_tile, hin, win, ho, wo, feat, d1, d2),
        out_shape=jax.ShapeDtypeStruct((n, 3, wo * ho), jnp.float32),
        grid=(n // b_tile,),
        in_specs=[
            pl.BlockSpec((b_tile, hp, wp, feat), lambda i: (i, 0, 0, 0)),
            pl.BlockSpec((9, feat, d1), lambda i: (0, 0, 0)),
            pl.BlockSpec((1, d1), lambda i: (0, 0)),
            pl.BlockSpec((win, wo), lambda i: (0, 0)),
            pl.BlockSpec((hin, ho), lambda i: (0, 0)),
            pl.BlockSpec((9, d1, d2), lambda i: (0, 0, 0)),
            pl.BlockSpec((1, d2), lambda i: (0, 0)),
            pl.BlockSpec((d2, 3), lambda i: (0, 0)),
            pl.BlockSpec((1, 3), lambda i: (0, 0)),
        ],
        out_specs=pl.BlockSpec((b_tile, 3, wo * ho), lambda i: (i, 0, 0)),
        compiler_params=pltpu.CompilerParams(
            dimension_semantics=("parallel",),
            vmem_limit_bytes=vmem_limit),
    )(xp, w1, b1, awt, aht, w2, b2, w3, b3)

    # kernel emits spatial in (w, h) order (cheapest in-kernel layout); the tiny
    # final transpose to (N, 3, Ho, Wo) is done here in XLA.
    return jnp.transpose(out.reshape(n, 3, wo, ho), (0, 1, 3, 2))


# ------------------------- pure-JAX reference (check) ----------------------- #

def _ref_conv3x3(x, w, b):
    n, h, wd, cin = x.shape
    xp = jnp.pad(x, ((0, 0), (1, 1), (1, 1), (0, 0)))
    cols = jnp.stack([xp[:, ky:ky + h, kx:kx + wd, :]
                      for ky in range(3) for kx in range(3)], axis=-2)
    wr = w.reshape(9, cin, -1)
    return jnp.einsum("nhwkc,kcd->nhwd", cols, wr, precision="highest") + b


def _reference_forward(x_nchw, params_xyz, out_hw):
    ho, wo = out_hw
    x = jnp.transpose(x_nchw, (0, 2, 3, 1)).astype(jnp.float32)
    n, hin, win, _ = x.shape
    m = jnp.asarray(np.kron(_interp_matrix(hin, ho), _interp_matrix(win, wo)))
    outs = []
    for k in ("x", "y", "z"):
        p = params_xyz[k]
        h = _ref_conv3x3(x, p["w1"], p["b1"])
        c = h.shape[-1]
        h = jnp.einsum("pq,nqc->npc", m, h.reshape(n, hin * win, c),
                       precision="highest").reshape(n, ho, wo, c)
        h = jnp.maximum(_ref_conv3x3(h, p["w2"], p["b2"]), 0.0)
        o = jnp.einsum("nhwc,cd->nhwd", h, p["w3"], precision="highest") + p["b3"]
        outs.append(o)
    return jnp.transpose(jnp.concatenate(outs, axis=-1), (0, 3, 1, 2))


# --------------------------- deterministic params --------------------------- #

def _init_head_params(key, features):
    """Synthetic Conv2d params, weight layout (kH, kW, Cin, Cout)."""
    c1 = features // 2
    ks = jax.random.split(key, 6)

    def u(k, shape, fan_in):
        bound = 1.0 / math.sqrt(fan_in)
        return jax.random.uniform(k, shape, jnp.float32, -bound, bound)

    return dict(
        w1=u(ks[0], (3, 3, features, c1), 9 * features),
        b1=u(ks[1], (c1,), 9 * features),
        w2=u(ks[2], (3, 3, c1, 32), 9 * c1),
        b2=u(ks[3], (32,), 9 * c1),
        w3=u(ks[4], (32, 1), 32),
        b3=u(ks[5], (1,), 32),
    )


# ----------------------------------- main ----------------------------------- #

if __name__ == "__main__":
    key = jax.random.PRNGKey(0)
    k_x, k_px, k_py, k_pz = jax.random.split(key, 4)

    features = 8          # -> features // 2 == 4 intermediate channels per head
    batch = 4
    h_in = w_in = 8       # ViT-feature-map-like spatial size
    output_size = (16, 16)

    # PyTorch-convention NCHW input: (N, C=features, H, W)
    x = jax.random.normal(k_x, (batch, features, h_in, w_in), jnp.float32)

    params_xyz = {
        "x": _init_head_params(k_px, features),
        "y": _init_head_params(k_py, features),
        "z": _init_head_params(k_pz, features),
    }

    # b_tile=2 -> grid extent 2 ("parallel"), exercising the multi-image block.
    out = nocs_head_xyz_apply(x, params_xyz, output_size, b_tile=2)
    out = jax.block_until_ready(out)

    assert out.shape == (batch, 3, output_size[0], output_size[1]), out.shape
    assert jnp.all(jnp.isfinite(out))

    ref = jax.block_until_ready(_reference_forward(x, params_xyz, output_size))
    max_err = float(jnp.max(jnp.abs(out - ref)))
    # bf16 operands with f32 accumulation (per perf guidance) vs. an f32
    # precision='highest' reference -> looser tolerance than pure-f32.
    assert max_err < 3e-2, f"max abs error vs reference: {max_err}"

    print("KERNEL_OK")
</pallas_src>

<mosaic_0001>
module attributes {stable_mosaic.version = 11 : i64} {
  func.func @kernel(%arg0: i32, %arg1: memref<2x10x10x8xbf16, #tpu.memory_space<vmem>>, %arg2: memref<9x8x12xbf16, #tpu.memory_space<vmem>>, %arg3: memref<1x12xf32, #tpu.memory_space<vmem>>, %arg4: memref<8x16xbf16, #tpu.memory_space<vmem>>, %arg5: memref<8x16xbf16, #tpu.memory_space<vmem>>, %arg6: memref<9x12x96xbf16, #tpu.memory_space<vmem>>, %arg7: memref<1x96xf32, #tpu.memory_space<vmem>>, %arg8: memref<96x3xf32, #tpu.memory_space<vmem>>, %arg9: memref<1x3xf32, #tpu.memory_space<vmem>>, %arg10: memref<2x3x256xf32, #tpu.memory_space<vmem>>) attributes {dimension_semantics = [#tpu.dimension_semantics<parallel>], iteration_bounds = array<i64: 2>, scalar_prefetch = 0 : i64, scratch_operands = 0 : i64, tpu.core_type = #tpu.core_type<tc>, window_params = [{transform_indices = @transform_0, window_bounds = array<i64: 2, 10, 10, 8>}, {pipeline_mode = #tpu.pipeline_mode<synchronous>, transform_indices = @transform_1, window_bounds = array<i64: 9, 8, 12>}, {pipeline_mode = #tpu.pipeline_mode<synchronous>, transform_indices = @transform_2, window_bounds = array<i64: 1, 12>}, {pipeline_mode = #tpu.pipeline_mode<synchronous>, transform_indices = @transform_3, window_bounds = array<i64: 8, 16>}, {pipeline_mode = #tpu.pipeline_mode<synchronous>, transform_indices = @transform_4, window_bounds = array<i64: 8, 16>}, {pipeline_mode = #tpu.pipeline_mode<synchronous>, transform_indices = @transform_5, window_bounds = array<i64: 9, 12, 96>}, {pipeline_mode = #tpu.pipeline_mode<synchronous>, transform_indices = @transform_6, window_bounds = array<i64: 1, 96>}, {pipeline_mode = #tpu.pipeline_mode<synchronous>, transform_indices = @transform_7, window_bounds = array<i64: 96, 3>}, {pipeline_mode = #tpu.pipeline_mode<synchronous>, transform_indices = @transform_8, window_bounds = array<i64: 1, 3>}, {transform_indices = @transform_9, window_bounds = array<i64: 2, 3, 256>}]} {
    %c0 = arith.constant 0 : index
    %c0_0 = arith.constant 0 : index
    %c0_1 = arith.constant 0 : index
    %c0_2 = arith.constant 0 : index
    %0 = vector.load %arg1[%c0, %c0_0, %c0_1, %c0_2] : memref<2x10x10x8xbf16, #tpu.memory_space<vmem>>, vector<2x10x10x8xbf16>
    %c0_3 = arith.constant 0 : index
    %c0_4 = arith.constant 0 : index
    %c0_5 = arith.constant 0 : index
    %1 = vector.load %arg2[%c0_3, %c0_4, %c0_5] : memref<9x8x12xbf16, #tpu.memory_space<vmem>>, vector<9x8x12xbf16>
    %cst = arith.constant 0.000000e+00 : f32
    %2 = vector.broadcast %cst : f32 to vector<128x12xf32>
    %3 = vector.extract_strided_slice %0 {offsets = [0, 0, 0, 0], sizes = [2, 8, 8, 8], strides = [1, 1, 1, 1]} : vector<2x10x10x8xbf16> to vector<2x8x8x8xbf16>
    %4 = vector.shape_cast %3 : vector<2x8x8x8xbf16> to vector<128x8xbf16>
    %5 = vector.extract_strided_slice %1 {offsets = [0, 0, 0], sizes = [1, 8, 12], strides = [1, 1, 1]} : vector<9x8x12xbf16> to vector<1x8x12xbf16>
    %6 = vector.shape_cast %5 : vector<1x8x12xbf16> to vector<8x12xbf16>
    %cst_6 = arith.constant dense<0.000000e+00> : vector<128x12xf32>
    %7 = tpu.matmul %4, %6, %cst_6 {dimension_numbers = #tpu.dot_dimension_numbers<[1], [0], [0], [1], [0, 0, 1, 1], [], []>} : vector<128x8xbf16>, vector<8x12xbf16>, vector<128x12xf32> -> vector<128x12xf32>
    %8 = arith.addf %2, %7 : vector<128x12xf32>
    %9 = vector.extract_strided_slice %0 {offsets = [0, 0, 1, 0], sizes = [2, 8, 8, 8], strides = [1, 1, 1, 1]} : vector<2x10x10x8xbf16> to vector<2x8x8x8xbf16>
    %10 = vector.shape_cast %9 : vector<2x8x8x8xbf16> to vector<128x8xbf16>
    %11 = vector.extract_strided_slice %1 {offsets = [1, 0, 0], sizes = [1, 8, 12], strides = [1, 1, 1]} : vector<9x8x12xbf16> to vector<1x8x12xbf16>
    %12 = vector.shape_cast %11 : vector<1x8x12xbf16> to vector<8x12xbf16>
    %cst_7 = arith.constant dense<0.000000e+00> : vector<128x12xf32>
    %13 = tpu.matmul %10, %12, %cst_7 {dimension_numbers = #tpu.dot_dimension_numbers<[1], [0], [0], [1], [0, 0, 1, 1], [], []>} : vector<128x8xbf16>, vector<8x12xbf16>, vector<128x12xf32> -> vector<128x12xf32>
    %14 = arith.addf %8, %13 : vector<128x12xf32>
    %15 = vector.extract_strided_slice %0 {offsets = [0, 0, 2, 0], sizes = [2, 8, 8, 8], strides = [1, 1, 1, 1]} : vector<2x10x10x8xbf16> to vector<2x8x8x8xbf16>
    %16 = vector.shape_cast %15 : vector<2x8x8x8xbf16> to vector<128x8xbf16>
    %17 = vector.extract_strided_slice %1 {offsets = [2, 0, 0], sizes = [1, 8, 12], strides = [1, 1, 1]} : vector<9x8x12xbf16> to vector<1x8x12xbf16>
    %18 = vector.shape_cast %17 : vector<1x8x12xbf16> to vector<8x12xbf16>
    %cst_8 = arith.constant dense<0.000000e+00> : vector<128x12xf32>
    %19 = tpu.matmul %16, %18, %cst_8 {dimension_numbers = #tpu.dot_dimension_numbers<[1], [0], [0], [1], [0, 0, 1, 1], [], []>} : vector<128x8xbf16>, vector<8x12xbf16>, vector<128x12xf32> -> vector<128x12xf32>
    %20 = arith.addf %14, %19 : vector<128x12xf32>
    %21 = vector.extract_strided_slice %0 {offsets = [0, 1, 0, 0], sizes = [2, 8, 8, 8], strides = [1, 1, 1, 1]} : vector<2x10x10x8xbf16> to vector<2x8x8x8xbf16>
    %22 = vector.shape_cast %21 : vector<2x8x8x8xbf16> to vector<128x8xbf16>
    %23 = vector.extract_strided_slice %1 {offsets = [3, 0, 0], sizes = [1, 8, 12], strides = [1, 1, 1]} : vector<9x8x12xbf16> to vector<1x8x12xbf16>
    %24 = vector.shape_cast %23 : vector<1x8x12xbf16> to vector<8x12xbf16>
    %cst_9 = arith.constant dense<0.000000e+00> : vector<128x12xf32>
    %25 = tpu.matmul %22, %24, %cst_9 {dimension_numbers = #tpu.dot_dimension_numbers<[1], [0], [0], [1], [0, 0, 1, 1], [], []>} : vector<128x8xbf16>, vector<8x12xbf16>, vector<128x12xf32> -> vector<128x12xf32>
    %26 = arith.addf %20, %25 : vector<128x12xf32>
    %27 = vector.extract_strided_slice %0 {offsets = [0, 1, 1, 0], sizes = [2, 8, 8, 8], strides = [1, 1, 1, 1]} : vector<2x10x10x8xbf16> to vector<2x8x8x8xbf16>
    %28 = vector.shape_cast %27 : vector<2x8x8x8xbf16> to vector<128x8xbf16>
    %29 = vector.extract_strided_slice %1 {offsets = [4, 0, 0], sizes = [1, 8, 12], strides = [1, 1, 1]} : vector<9x8x12xbf16> to vector<1x8x12xbf16>
    %30 = vector.shape_cast %29 : vector<1x8x12xbf16> to vector<8x12xbf16>
    %cst_10 = arith.constant dense<0.000000e+00> : vector<128x12xf32>
    %31 = tpu.matmul %28, %30, %cst_10 {dimension_numbers = #tpu.dot_dimension_numbers<[1], [0], [0], [1], [0, 0, 1, 1], [], []>} : vector<128x8xbf16>, vector<8x12xbf16>, vector<128x12xf32> -> vector<128x12xf32>
    %32 = arith.addf %26, %31 : vector<128x12xf32>
    %33 = vector.extract_strided_slice %0 {offsets = [0, 1, 2, 0], sizes = [2, 8, 8, 8], strides = [1, 1, 1, 1]} : vector<2x10x10x8xbf16> to vector<2x8x8x8xbf16>
    %34 = vector.shape_cast %33 : vector<2x8x8x8xbf16> to vector<128x8xbf16>
    %35 = vector.extract_strided_slice %1 {offsets = [5, 0, 0], sizes = [1, 8, 12], strides = [1, 1, 1]} : vector<9x8x12xbf16> to vector<1x8x12xbf16>
    %36 = vector.shape_cast %35 : vector<1x8x12xbf16> to vector<8x12xbf16>
    %cst_11 = arith.constant dense<0.000000e+00> : vector<128x12xf32>
    %37 = tpu.matmul %34, %36, %cst_11 {dimension_numbers = #tpu.dot_dimension_numbers<[1], [0], [0], [1], [0, 0, 1, 1], [], []>} : vector<128x8xbf16>, vector<8x12xbf16>, vector<128x12xf32> -> vector<128x12xf32>
    %38 = arith.addf %32, %37 : vector<128x12xf32>
    %39 = vector.extract_strided_slice %0 {offsets = [0, 2, 0, 0], sizes = [2, 8, 8, 8], strides = [1, 1, 1, 1]} : vector<2x10x10x8xbf16> to vector<2x8x8x8xbf16>
    %40 = vector.shape_cast %39 : vector<2x8x8x8xbf16> to vector<128x8xbf16>
    %41 = vector.extract_strided_slice %1 {offsets = [6, 0, 0], sizes = [1, 8, 12], strides = [1, 1, 1]} : vector<9x8x12xbf16> to vector<1x8x12xbf16>
    %42 = vector.shape_cast %41 : vector<1x8x12xbf16> to vector<8x12xbf16>
    %cst_12 = arith.constant dense<0.000000e+00> : vector<128x12xf32>
    %43 = tpu.matmul %40, %42, %cst_12 {dimension_numbers = #tpu.dot_dimension_numbers<[1], [0], [0], [1], [0, 0, 1, 1], [], []>} : vector<128x8xbf16>, vector<8x12xbf16>, vector<128x12xf32> -> vector<128x12xf32>
    %44 = arith.addf %38, %43 : vector<128x12xf32>
    %45 = vector.extract_strided_slice %0 {offsets = [0, 2, 1, 0], sizes = [2, 8, 8, 8], strides = [1, 1, 1, 1]} : vector<2x10x10x8xbf16> to vector<2x8x8x8xbf16>
    %46 = vector.shape_cast %45 : vector<2x8x8x8xbf16> to vector<128x8xbf16>
    %47 = vector.extract_strided_slice %1 {offsets = [7, 0, 0], sizes = [1, 8, 12], strides = [1, 1, 1]} : vector<9x8x12xbf16> to vector<1x8x12xbf16>
    %48 = vector.shape_cast %47 : vector<1x8x12xbf16> to vector<8x12xbf16>
    %cst_13 = arith.constant dense<0.000000e+00> : vector<128x12xf32>
    %49 = tpu.matmul %46, %48, %cst_13 {dimension_numbers = #tpu.dot_dimension_numbers<[1], [0], [0], [1], [0, 0, 1, 1], [], []>} : vector<128x8xbf16>, vector<8x12xbf16>, vector<128x12xf32> -> vector<128x12xf32>
    %50 = arith.addf %44, %49 : vector<128x12xf32>
    %51 = vector.extract_strided_slice %0 {offsets = [0, 2, 2, 0], sizes = [2, 8, 8, 8], strides = [1, 1, 1, 1]} : vector<2x10x10x8xbf16> to vector<2x8x8x8xbf16>
    %52 = vector.shape_cast %51 : vector<2x8x8x8xbf16> to vector<128x8xbf16>
    %53 = vector.extract_strided_slice %1 {offsets = [8, 0, 0], sizes = [1, 8, 12], strides = [1, 1, 1]} : vector<9x8x12xbf16> to vector<1x8x12xbf16>
    %54 = vector.shape_cast %53 : vector<1x8x12xbf16> to vector<8x12xbf16>
    %cst_14 = arith.constant dense<0.000000e+00> : vector<128x12xf32>
    %55 = tpu.matmul %52, %54, %cst_14 {dimension_numbers = #tpu.dot_dimension_numbers<[1], [0], [0], [1], [0, 0, 1, 1], [], []>} : vector<128x8xbf16>, vector<8x12xbf16>, vector<128x12xf32> -> vector<128x12xf32>
    %56 = arith.addf %50, %55 : vector<128x12xf32>
    %c0_15 = arith.constant 0 : index
    %c0_16 = arith.constant 0 : index
    %57 = vector.load %arg3[%c0_15, %c0_16] : memref<1x12xf32, #tpu.memory_space<vmem>>, vector<1x12xf32>
    %58 = vector.broadcast %57 : vector<1x12xf32> to vector<128x12xf32>
    %59 = arith.addf %56, %58 : vector<128x12xf32>
    %60 = vector.shape_cast %59 : vector<128x12xf32> to vector<2x8x8x12xf32>
    %61 = tpu.transpose %60, [0, 1, 3, 2] : vector<2x8x8x12xf32> -> vector<2x8x12x8xf32>
    %62 = arith.truncf %61 : vector<2x8x12x8xf32> to vector<2x8x12x8xbf16>
    %63 = vector.shape_cast %62 : vector<2x8x12x8xbf16> to vector<192x8xbf16>
    %c0_17 = arith.constant 0 : index
    %c0_18 = arith.constant 0 : index
    %64 = vector.load %arg4[%c0_17, %c0_18] : memref<8x16xbf16, #tpu.memory_space<vmem>>, vector<8x16xbf16>
    %cst_19 = arith.constant dense<0.000000e+00> : vector<192x16xf32>
    %65 = tpu.matmul %63, %64, %cst_19 {dimension_numbers = #tpu.dot_dimension_numbers<[1], [0], [0], [1], [0, 0, 1, 1], [], []>} : vector<192x8xbf16>, vector<8x16xbf16>, vector<192x16xf32> -> vector<192x16xf32>
    %66 = vector.shape_cast %65 : vector<192x16xf32> to vector<2x8x12x16xf32>
    %67 = tpu.transpose %66, [0, 2, 1, 3] : vector<2x8x12x16xf32> -> vector<2x12x8x16xf32>
    %68 = tpu.transpose %67, [0, 1, 3, 2] : vector<2x12x8x16xf32> -> vector<2x12x16x8xf32>
    %69 = arith.truncf %68 : vector<2x12x16x8xf32> to vector<2x12x16x8xbf16>
    %70 = vector.shape_cast %69 : vector<2x12x16x8xbf16> to vector<384x8xbf16>
    %c0_20 = arith.constant 0 : index
    %c0_21 = arith.constant 0 : index
    %71 = vector.load %arg5[%c0_20, %c0_21] : memref<8x16xbf16, #tpu.memory_space<vmem>>, vector<8x16xbf16>
    %cst_22 = arith.constant dense<0.000000e+00> : vector<384x16xf32>
    %72 = tpu.matmul %70, %71, %cst_22 {dimension_numbers = #tpu.dot_dimension_numbers<[1], [0], [0], [1], [0, 0, 1, 1], [], []>} : vector<384x8xbf16>, vector<8x16xbf16>, vector<384x16xf32> -> vector<384x16xf32>
    %73 = vector.shape_cast %72 : vector<384x16xf32> to vector<2x12x16x16xf32>
    %74 = tpu.transpose %73, [0, 2, 1, 3] : vector<2x12x16x16xf32> -> vector<2x16x12x16xf32>
    %75 = tpu.transpose %74, [0, 1, 3, 2] : vector<2x16x12x16xf32> -> vector<2x16x16x12xf32>
    %76 = arith.truncf %75 : vector<2x16x16x12xf32> to vector<2x16x16x12xbf16>
    %cst_23 = arith.constant 0.000000e+00 : bf16
    %77 = vector.broadcast %cst_23 : bf16 to vector<2x1x16x12xbf16>
    %78 = tpu.concatenate %77, %76, %77 in 1 : vector<2x1x16x12xbf16>, vector<2x16x16x12xbf16>, vector<2x1x16x12xbf16> -> vector<2x18x16x12xbf16>
    %cst_24 = arith.constant 0.000000e+00 : bf16
    %79 = vector.broadcast %cst_24 : bf16 to vector<2x18x1x12xbf16>
    %80 = tpu.concatenate %79, %78, %79 in 2 : vector<2x18x1x12xbf16>, vector<2x18x16x12xbf16>, vector<2x18x1x12xbf16> -> vector<2x18x18x12xbf16>
    %c0_25 = arith.constant 0 : index
    %c0_26 = arith.constant 0 : index
    %c0_27 = arith.constant 0 : index
    %81 = vector.load %arg6[%c0_25, %c0_26, %c0_27] : memref<9x12x96xbf16, #tpu.memory_space<vmem>>, vector<9x12x96xbf16>
    %cst_28 = arith.constant 0.000000e+00 : f32
    %82 = vector.broadcast %cst_28 : f32 to vector<512x96xf32>
    %83 = vector.extract_strided_slice %80 {offsets = [0, 0, 0, 0], sizes = [2, 16, 16, 12], strides = [1, 1, 1, 1]} : vector<2x18x18x12xbf16> to vector<2x16x16x12xbf16>
    %84 = vector.shape_cast %83 : vector<2x16x16x12xbf16> to vector<512x12xbf16>
    %85 = vector.extract_strided_slice %81 {offsets = [0, 0, 0], sizes = [1, 12, 96], strides = [1, 1, 1]} : vector<9x12x96xbf16> to vector<1x12x96xbf16>
    %86 = vector.shape_cast %85 : vector<1x12x96xbf16> to vector<12x96xbf16>
    %cst_29 = arith.constant dense<0.000000e+00> : vector<512x96xf32>
    %87 = tpu.matmul %84, %86, %cst_29 {dimension_numbers = #tpu.dot_dimension_numbers<[1], [0], [0], [1], [0, 0, 1, 1], [], []>} : vector<512x12xbf16>, vector<12x96xbf16>, vector<512x96xf32> -> vector<512x96xf32>
    %88 = arith.addf %82, %87 : vector<512x96xf32>
    %89 = vector.extract_strided_slice %80 {offsets = [0, 1, 0, 0], sizes = [2, 16, 16, 12], strides = [1, 1, 1, 1]} : vector<2x18x18x12xbf16> to vector<2x16x16x12xbf16>
    %90 = vector.shape_cast %89 : vector<2x16x16x12xbf16> to vector<512x12xbf16>
    %91 = vector.extract_strided_slice %81 {offsets = [1, 0, 0], sizes = [1, 12, 96], strides = [1, 1, 1]} : vector<9x12x96xbf16> to vector<1x12x96xbf16>
    %92 = vector.shape_cast %91 : vector<1x12x96xbf16> to vector<12x96xbf16>
    %cst_30 = arith.constant dense<0.000000e+00> : vector<512x96xf32>
    %93 = tpu.matmul %90, %92, %cst_30 {dimension_numbers = #tpu.dot_dimension_numbers<[1], [0], [0], [1], [0, 0, 1, 1], [], []>} : vector<512x12xbf16>, vector<12x96xbf16>, vector<512x96xf32> -> vector<512x96xf32>
    %94 = arith.addf %88, %93 : vector<512x96xf32>
    %95 = vector.extract_strided_slice %80 {offsets = [0, 2, 0, 0], sizes = [2, 16, 16, 12], strides = [1, 1, 1, 1]} : vector<2x18x18x12xbf16> to vector<2x16x16x12xbf16>
    %96 = vector.shape_cast %95 : vector<2x16x16x12xbf16> to vector<512x12xbf16>
    %97 = vector.extract_strided_slice %81 {offsets = [2, 0, 0], sizes = [1, 12, 96], strides = [1, 1, 1]} : vector<9x12x96xbf16> to vector<1x12x96xbf16>
    %98 = vector.shape_cast %97 : vector<1x12x96xbf16> to vector<12x96xbf16>
    %cst_31 = arith.constant dense<0.000000e+00> : vector<512x96xf32>
    %99 = tpu.matmul %96, %98, %cst_31 {dimension_numbers = #tpu.dot_dimension_numbers<[1], [0], [0], [1], [0, 0, 1, 1], [], []>} : vector<512x12xbf16>, vector<12x96xbf16>, vector<512x96xf32> -> vector<512x96xf32>
    %100 = arith.addf %94, %99 : vector<512x96xf32>
    %101 = vector.extract_strided_slice %80 {offsets = [0, 0, 1, 0], sizes = [2, 16, 16, 12], strides = [1, 1, 1, 1]} : vector<2x18x18x12xbf16> to vector<2x16x16x12xbf16>
    %102 = vector.shape_cast %101 : vector<2x16x16x12xbf16> to vector<512x12xbf16>
    %103 = vector.extract_strided_slice %81 {offsets = [3, 0, 0], sizes = [1, 12, 96], strides = [1, 1, 1]} : vector<9x12x96xbf16> to vector<1x12x96xbf16>
    %104 = vector.shape_cast %103 : vector<1x12x96xbf16> to vector<12x96xbf16>
    %cst_32 = arith.constant dense<0.000000e+00> : vector<512x96xf32>
    %105 = tpu.matmul %102, %104, %cst_32 {dimension_numbers = #tpu.dot_dimension_numbers<[1], [0], [0], [1], [0, 0, 1, 1], [], []>} : vector<512x12xbf16>, vector<12x96xbf16>, vector<512x96xf32> -> vector<512x96xf32>
    %106 = arith.addf %100, %105 : vector<512x96xf32>
    %107 = vector.extract_strided_slice %80 {offsets = [0, 1, 1, 0], sizes = [2, 16, 16, 12], strides = [1, 1, 1, 1]} : vector<2x18x18x12xbf16> to vector<2x16x16x12xbf16>
    %108 = vector.shape_cast %107 : vector<2x16x16x12xbf16> to vector<512x12xbf16>
    %109 = vector.extract_strided_slice %81 {offsets = [4, 0, 0], sizes = [1, 12, 96], strides = [1, 1, 1]} : vector<9x12x96xbf16> to vector<1x12x96xbf16>
    %110 = vector.shape_cast %109 : vector<1x12x96xbf16> to vector<12x96xbf16>
    %cst_33 = arith.constant dense<0.000000e+00> : vector<512x96xf32>
    %111 = tpu.matmul %108, %110, %cst_33 {dimension_numbers = #tpu.dot_dimension_numbers<[1], [0], [0], [1], [0, 0, 1, 1], [], []>} : vector<512x12xbf16>, vector<12x96xbf16>, vector<512x96xf32> -> vector<512x96xf32>
    %112 = arith.addf %106, %111 : vector<512x96xf32>
    %113 = vector.extract_strided_slice %80 {offsets = [0, 2, 1, 0], sizes = [2, 16, 16, 12], strides = [1, 1, 1, 1]} : vector<2x18x18x12xbf16> to vector<2x16x16x12xbf16>
    %114 = vector.shape_cast %113 : vector<2x16x16x12xbf16> to vector<512x12xbf16>
    %115 = vector.extract_strided_slice %81 {offsets = [5, 0, 0], sizes = [1, 12, 96], strides = [1, 1, 1]} : vector<9x12x96xbf16> to vector<1x12x96xbf16>
    %116 = vector.shape_cast %115 : vector<1x12x96xbf16> to vector<12x96xbf16>
    %cst_34 = arith.constant dense<0.000000e+00> : vector<512x96xf32>
    %117 = tpu.matmul %114, %116, %cst_34 {dimension_numbers = #tpu.dot_dimension_numbers<[1], [0], [0], [1], [0, 0, 1, 1], [], []>} : vector<512x12xbf16>, vector<12x96xbf16>, vector<512x96xf32> -> vector<512x96xf32>
    %118 = arith.addf %112, %117 : vector<512x96xf32>
    %119 = vector.extract_strided_slice %80 {offsets = [0, 0, 2, 0], sizes = [2, 16, 16, 12], strides = [1, 1, 1, 1]} : vector<2x18x18x12xbf16> to vector<2x16x16x12xbf16>
    %120 = vector.shape_cast %119 : vector<2x16x16x12xbf16> to vector<512x12xbf16>
    %121 = vector.extract_strided_slice %81 {offsets = [6, 0, 0], sizes = [1, 12, 96], strides = [1, 1, 1]} : vector<9x12x96xbf16> to vector<1x12x96xbf16>
    %122 = vector.shape_cast %121 : vector<1x12x96xbf16> to vector<12x96xbf16>
    %cst_35 = arith.constant dense<0.000000e+00> : vector<512x96xf32>
    %123 = tpu.matmul %120, %122, %cst_35 {dimension_numbers = #tpu.dot_dimension_numbers<[1], [0], [0], [1], [0, 0, 1, 1], [], []>} : vector<512x12xbf16>, vector<12x96xbf16>, vector<512x96xf32> -> vector<512x96xf32>
    %124 = arith.addf %118, %123 : vector<512x96xf32>
    %125 = vector.extract_strided_slice %80 {offsets = [0, 1, 2, 0], sizes = [2, 16, 16, 12], strides = [1, 1, 1, 1]} : vector<2x18x18x12xbf16> to vector<2x16x16x12xbf16>
    %126 = vector.shape_cast %125 : vector<2x16x16x12xbf16> to vector<512x12xbf16>
    %127 = vector.extract_strided_slice %81 {offsets = [7, 0, 0], sizes = [1, 12, 96], strides = [1, 1, 1]} : vector<9x12x96xbf16> to vector<1x12x96xbf16>
    %128 = vector.shape_cast %127 : vector<1x12x96xbf16> to vector<12x96xbf16>
    %cst_36 = arith.constant dense<0.000000e+00> : vector<512x96xf32>
    %129 = tpu.matmul %126, %128, %cst_36 {dimension_numbers = #tpu.dot_dimension_numbers<[1], [0], [0], [1], [0, 0, 1, 1], [], []>} : vector<512x12xbf16>, vector<12x96xbf16>, vector<512x96xf32> -> vector<512x96xf32>
    %130 = arith.addf %124, %129 : vector<512x96xf32>
    %131 = vector.extract_strided_slice %80 {offsets = [0, 2, 2, 0], sizes = [2, 16, 16, 12], strides = [1, 1, 1, 1]} : vector<2x18x18x12xbf16> to vector<2x16x16x12xbf16>
    %132 = vector.shape_cast %131 : vector<2x16x16x12xbf16> to vector<512x12xbf16>
    %133 = vector.extract_strided_slice %81 {offsets = [8, 0, 0], sizes = [1, 12, 96], strides = [1, 1, 1]} : vector<9x12x96xbf16> to vector<1x12x96xbf16>
    %134 = vector.shape_cast %133 : vector<1x12x96xbf16> to vector<12x96xbf16>
    %cst_37 = arith.constant dense<0.000000e+00> : vector<512x96xf32>
    %135 = tpu.matmul %132, %134, %cst_37 {dimension_numbers = #tpu.dot_dimension_numbers<[1], [0], [0], [1], [0, 0, 1, 1], [], []>} : vector<512x12xbf16>, vector<12x96xbf16>, vector<512x96xf32> -> vector<512x96xf32>
    %136 = arith.addf %130, %135 : vector<512x96xf32>
    %c0_38 = arith.constant 0 : index
    %c0_39 = arith.constant 0 : index
    %137 = vector.load %arg7[%c0_38, %c0_39] : memref<1x96xf32, #tpu.memory_space<vmem>>, vector<1x96xf32>
    %138 = vector.broadcast %137 : vector<1x96xf32> to vector<512x96xf32>
    %139 = arith.addf %136, %138 : vector<512x96xf32>
    %cst_40 = arith.constant 0.000000e+00 : f32
    %140 = vector.broadcast %cst_40 : f32 to vector<512x96xf32>
    %141 = arith.maximumf %139, %140 : vector<512x96xf32>
    %c0_41 = arith.constant 0 : index
    %c0_42 = arith.constant 0 : index
    %142 = vector.load %arg8[%c0_41, %c0_42] : memref<96x3xf32, #tpu.memory_space<vmem>>, vector<96x3xf32>
    %cst_43 = arith.constant dense<0.000000e+00> : vector<512x3xf32>
    %143 = tpu.matmul %141, %142, %cst_43 {dimension_numbers = #tpu.dot_dimension_numbers<[1], [0], [0], [1], [0, 0, 1, 1], [], []>} : vector<512x96xf32>, vector<96x3xf32>, vector<512x3xf32> -> vector<512x3xf32>
    %c0_44 = arith.constant 0 : index
    %c0_45 = arith.constant 0 : index
    %144 = vector.load %arg9[%c0_44, %c0_45] : memref<1x3xf32, #tpu.memory_space<vmem>>, vector<1x3xf32>
    %145 = vector.broadcast %144 : vector<1x3xf32> to vector<512x3xf32>
    %146 = arith.addf %143, %145 : vector<512x3xf32>
    %147 = vector.shape_cast %146 : vector<512x3xf32> to vector<2x256x3xf32>
    %148 = tpu.transpose %147, [0, 2, 1] : vector<2x256x3xf32> -> vector<2x3x256xf32>
    %c0_46 = arith.constant 0 : index
    %c0_47 = arith.constant 0 : index
    %c0_48 = arith.constant 0 : index
    %149 = vector.load %arg10[%c0_46, %c0_47, %c0_48] : memref<2x3x256xf32, #tpu.memory_space<vmem>>, vector<2x3x256xf32>
    tpu.vector_store %arg10[%c0_46, %c0_47, %c0_48], %148 {strides = array<i32>} : memref<2x3x256xf32, #tpu.memory_space<vmem>>, vector<2x3x256xf32>,
    return
  }
  func.func @transform_0(%arg0: i32) -> (i32, i32, i32, i32) {
    %c0_i32 = arith.constant 0 : i32
    %c0_i32_0 = arith.constant 0 : i32
    %c0_i32_1 = arith.constant 0 : i32
    %c0_i32_2 = arith.constant 0 : i32
    return %arg0, %c0_i32, %c0_i32_0, %c0_i32_1 : i32, i32, i32, i32
  }
  func.func @transform_1(%arg0: i32) -> (i32, i32, i32) {
    %c0_i32 = arith.constant 0 : i32
    %c0_i32_0 = arith.constant 0 : i32
    %c0_i32_1 = arith.constant 0 : i32
    %c0_i32_2 = arith.constant 0 : i32
    return %c0_i32, %c0_i32_0, %c0_i32_1 : i32, i32, i32
  }
  func.func @transform_2(%arg0: i32) -> (i32, i32) {
    %c0_i32 = arith.constant 0 : i32
    %c0_i32_0 = arith.constant 0 : i32
    %c0_i32_1 = arith.constant 0 : i32
    return %c0_i32, %c0_i32_0 : i32, i32
  }
  func.func @transform_3(%arg0: i32) -> (i32, i32) {
    %c0_i32 = arith.constant 0 : i32
    %c0_i32_0 = arith.constant 0 : i32
    %c0_i32_1 = arith.constant 0 : i32
    return %c0_i32, %c0_i32_0 : i32, i32
  }
  func.func @transform_4(%arg0: i32) -> (i32, i32) {
    %c0_i32 = arith.constant 0 : i32
    %c0_i32_0 = arith.constant 0 : i32
    %c0_i32_1 = arith.constant 0 : i32
    return %c0_i32, %c0_i32_0 : i32, i32
  }
  func.func @transform_5(%arg0: i32) -> (i32, i32, i32) {
    %c0_i32 = arith.constant 0 : i32
    %c0_i32_0 = arith.constant 0 : i32
    %c0_i32_1 = arith.constant 0 : i32
    %c0_i32_2 = arith.constant 0 : i32
    return %c0_i32, %c0_i32_0, %c0_i32_1 : i32, i32, i32
  }
  func.func @transform_6(%arg0: i32) -> (i32, i32) {
    %c0_i32 = arith.constant 0 : i32
    %c0_i32_0 = arith.constant 0 : i32
    %c0_i32_1 = arith.constant 0 : i32
    return %c0_i32, %c0_i32_0 : i32, i32
  }
  func.func @transform_7(%arg0: i32) -> (i32, i32) {
    %c0_i32 = arith.constant 0 : i32
    %c0_i32_0 = arith.constant 0 : i32
    %c0_i32_1 = arith.constant 0 : i32
    return %c0_i32, %c0_i32_0 : i32, i32
  }
  func.func @transform_8(%arg0: i32) -> (i32, i32) {
    %c0_i32 = arith.constant 0 : i32
    %c0_i32_0 = arith.constant 0 : i32
    %c0_i32_1 = arith.constant 0 : i32
    return %c0_i32, %c0_i32_0 : i32, i32
  }
  func.func @transform_9(%arg0: i32) -> (i32, i32, i32) {
    %c0_i32 = arith.constant 0 : i32
    %c0_i32_0 = arith.constant 0 : i32
    %c0_i32_1 = arith.constant 0 : i32
    return %arg0, %c0_i32, %c0_i32_0 : i32, i32, i32
  }
}

</mosaic_0001>

<bundles_post_ra>
// kernel: tpu_custom_call.1
= control target key start
LH: loop header
LB: loop body
LE: loop exit
PB: predicated region body
PF: predicated region fallthrough
CT: control target
= control target key end

     0   :  { %s15331_s30 = smov 0   ;;  %s18451_s0 = inlined_call_operand.vmem [shape: bf16[4,10,10,8], index: 0, kind: input, shape index: {}]   ;;  %s18452_s1 = inlined_call_operand.vmem [shape: bf16[9,8,12], index: 1, kind: input, shape index: {}]   ;;  %s18453_s2 = inlined_call_operand.vmem [shape: f32[1,12], index: 2, kind: input, shape index: {}]   ;;  %s18454_s3 = inlined_call_operand.vmem [shape: bf16[8,16], index: 3, kind: input, shape index: {}]   ;;  %s18455_s4 = inlined_call_operand.vmem [shape: bf16[8,16], index: 4, kind: input, shape index: {}]   ;;  %s18456_s5 = inlined_call_operand.vmem [shape: bf16[9,12,96], index: 5, kind: input, shape index: {}]   ;;  %s18457_s6 = inlined_call_operand.vmem [shape: f32[1,96], index: 6, kind: input, shape index: {}]   ;;  %s18458_s7 = inlined_call_operand.vmem [shape: f32[96,3], index: 7, kind: input, shape index: {}]   ;;  %s18459_s8 = inlined_call_operand.vmem [shape: f32[1,3], index: 8, kind: input, shape index: {}]   ;;  %s18460_s9 = inlined_call_operand.vmem [shape: f32[4,3,256], index: 9, kind: output, shape index: {}]  }
   0x1 LB: > { %s12086_s10 = sadd.s32 4294967295, %s15275_s30   ;;  %p12090_p0 = scmp.ge.s32.totalorder %s15275_s30, 1  ;;  %s15275_s30 = sphi %s15331_s30, %s19_s30  }
   0x2   : > { %p289_p1 = scmp.lt.s32.totalorder %s15275_s30, 3 }
   0x4   : > { %p290_p2 = pnand %p12090_p0, %p289_p1 }
   0x6   : > { %293 = sbr.rel (%p290_p2) target bundleno = 2774 (0xad6), region = 56 }
   0xd   : > { %v383_v0 = vld [vmem:[%s18452_s1 + $0x4] sm:$0xf]  ;;  %vm667_vm0 = vcmask 1043456   ;;  %s12091_s13 = sshll.u32 %s12086_s10, 1  ;;  %v382_v2 = vld [vmem:[%s18452_s1] sm:$0xf] }
   0xe   : > { %14795 = vmatprep.subr.msk.bf16.mxu0 %vm667_vm0, %v383_v0  ;;  %v669_v1 = vsel %vm667_vm0, %v383_v0, 0  ;;  %p328_p3 = scmp.lt.s32.totalorder %s12091_s13, 3  ;;  %vm391_vm1 = vsmask.f32 3328  ;;  %vm392_vm2 = vsmask.f32 7440 }
   0xf   : > { %13178 = vmatpush3.bf16.msra.mxu0 %v669_v1  ;;  %vm948_vm3 = vcmask 1042432   ;;  %vm949_vm4 = vcmask 1046532   ;;  %vm15399_vm5 = vmor %vm391_vm1, %vm392_vm2  ;;  %vm642_vm6 = vcmask 64512   ;;  %v833_v53 = vsel %vm667_vm0, %v382_v2, 0 }
  0x10   : > { %s18783_s13 = smov (!%p328_p3, %s12091_s13), 3  ;;  %14796 = vmatprep.subr.msk.bf16.mxu0 %vm667_vm0, %v382_v2  ;;  %vm15423_vm7 = vmor %vm948_vm3, %vm949_vm4  ;;  %vm7310_vm8 = vcmask 1045504   ;;  %vm7121_vm9 = vcmask 1040384   ;;  %vm7122_vm10 = vsmask.f32 256  ;;  %vm7213_vm13 = vcmask 97280  }
  0x11   : > { %s14816_s16 = smul.u32 80, %s18783_s13  ;;  %vm16564_vm11 = vmand %vm7121_vm9, %vm7122_vm10  ;;  %vm8264_vm12 = vsmask.f32 7424  ;;  %vm9872_vm14 = vcmask 1046528   ;;  %vm11312_vm15 = vcmask 785408   ;;  %s12684_s11 = sshll.u32 %s18783_s13, 3 }
  0x12   : > { %s339_s15 = scalar_lea.vmem %s18460_s9, %s12684_s11 }
  0x13   : > { %s15354_s19 = scalar_lea.vmem %s18451_s0, %s14816_s16 }
  0x14   : > { %v15357_v3 = vld [vmem:[%s15354_s19] sm:$0xf]  ;;  %v15360_v4 = vld [vmem:[%s15354_s19 + $0x4] sm:$0x1]  ;;  %v15363_v5 = vld [vmem:[%s15354_s19 + $0x8] sm:$0xf] }
  0x15   : > { %v15366_v6 = vld [vmem:[%s15354_s19 + $0xc] sm:$0x1]  ;;  %v15369_v7 = vld [vmem:[%s15354_s19 + $0x10] sm:$0xf]  ;;  %v15372_v8 = vld [vmem:[%s15354_s19 + $0x14] sm:$0x1] }
  0x16   : > { %v15377_v10 = vld [vmem:[%s15354_s19 + $0x18] sm:$0xf]  ;;  %v395_v11 = vshrl.u32 %v15357_v3, 16  ;;  %v398_v12 = vshll.u32 %v15357_v3, 16  ;;  %v404_v13 = vshll.u32 %v15360_v4, 16  ;;  %v409_v14 = vshrl.u32 %v15363_v5, 16 }
  0x17   : > { %v349_v15 = vld [vmem:[%s15354_s19 + $0x1c] sm:$0x1]  ;;  %v412_v16 = vshll.u32 %v15363_v5, 16  ;;  %v418_v17 = vshll.u32 %v15366_v6, 16  ;;  %v423_v18 = vshrl.u32 %v15369_v7, 16  ;;  %v426_v19 = vshll.u32 %v15369_v7, 16 }
  0x18   : > { %v15389_v20 = vld [vmem:[%s15354_s19 + $0x20] sm:$0xf]  ;;  %v397_v21 = vrot.slane %v395_v11, 4  ;;  %v400_v22 = vrot.slane %v398_v12, 5  ;;  %v406_v23 = vrot.slane %v404_v13, 5  ;;  %v411_v24 = vrot.slane %v409_v14, 4 }
  0x19   : > { %v414_v25 = vrot.slane %v412_v16, 5  ;;  %v420_v26 = vrot.slane %v418_v17, 5  ;;  %v425_v27 = vrot.slane %v423_v18, 4  ;;  %v428_v28 = vrot.slane %v426_v19, 5  ;;  %v15395_v33 = vld [vmem:[%s15354_s19 + $0x24] sm:$0x1] }
  0x1a   : > { %v401_v29 = vor.u32 %v400_v22, %v397_v21  ;;  %v432_v30 = vshll.u32 %v15372_v8, 16  ;;  %v437_v31 = vshrl.u32 %v15377_v10, 16  ;;  %v440_v32 = vshll.u32 %v15377_v10, 16  ;;  %v15418_v54 = vld [vmem:[%s15354_s19 + $0x28] sm:$0xf] }
  0x1b   : > { %v415_v35 = vor.u32 %v414_v25, %v411_v24  ;;  %v429_v36 = vor.u32 %v428_v28, %v425_v27  ;;  %v446_v37 = vshll.u32 %v349_v15, 16  ;;  %v451_v38 = vshrl.u32 %v15389_v20, 16  ;;  %v15431_v0 = vld [vmem:[%s15354_s19 + $0x2c] sm:$0x1]  ;;  %v15442_v13 = vld [vmem:[%s15354_s19 + $0x30] sm:$0xf] }
  0x1c   : > { %v402_v39 = vrot.slane %v401_v29, 4  ;;  %v434_v40 = vrot.slane %v432_v30, 5  ;;  %v439_v41 = vrot.slane %v437_v31, 4  ;;  %v442_v42 = vrot.slane %v440_v32, 5  ;;  %v15461_v18 = vld [vmem:[%s15354_s19 + $0x38] sm:$0xf] }
  0x1d   : > { %v416_v43 = vrot.slane %v415_v35, 4  ;;  %v430_v44 = vrot.slane %v429_v36, 4  ;;  %v448_v45 = vrot.slane %v446_v37, 5  ;;  %v453_v46 = vrot.slane %v451_v38, 4  ;;  %v15471_v24 = vld [vmem:[%s18452_s1 + $0x8] sm:$0xf] }
  0x1e   : > { %v407_v47 = vsel %vm15399_vm5, %v402_v39, %v406_v23  ;;  %v443_v48 = vor.u32 %v442_v42, %v439_v41  ;;  %v454_v49 = vshll.u32 %v15389_v20, 16  ;;  %v460_v50 = vshll.u32 %v15395_v33, 16  ;;  %v15488_v36 = vld [vmem:[%s15354_s19 + $0x50] sm:$0xf]  ;;  %v15493_v41 = vld [vmem:[%s15354_s19 + $0x54] sm:$0x1] }
  0x1f   : > { %v15410_v51 = vsel %vm15399_vm5, %v416_v43, %v420_v26  ;;  %v15414_v52 = vsel %vm15399_vm5, %v430_v44, %v434_v40  ;;  %v12130_v60 = vrot.slane %v15369_v7, 9  ;;  %v961_v61 = vrot.slane %v15372_v8, 5  ;;  %v15445_v8 = vld [vmem:[%s15354_s19 + $0x34] sm:$0x1]  ;;  %v15476_v26 = vld [vmem:[%s15354_s19 + $0x3c] sm:$0x1] }
  0x20   : > { %v444_v55 = vrot.slane %v443_v48, 4  ;;  %v456_v56 = vrot.slane %v454_v49, 5  ;;  %v462_v57 = vrot.slane %v460_v50, 5  ;;  %v12096_v58 = vcombine.low %v407_v47, %v15410_v51  ;;  %v15496_v42 = vld [vmem:[%s15354_s19 + $0x58] sm:$0xf] }
  0x21   : > { %v12131_v62 = vrot.slane %v15377_v10, 9  ;;  %v965_v63 = vrot.slane %v349_v15, 5  ;;  %v465_v12 = vshrl.u32 %v15418_v54, 16  ;;  %v15453_v15 = vsel %vm15423_vm7, %v12130_v60, %v961_v61  ;;  %v15502_v47 = vld [vmem:[%s15354_s19 + $0x5c] sm:$0x1] }
  0x22   : > { %v15435_v1 = vsel %vm15399_vm5, %v444_v55, %v448_v45  ;;  %v457_v2 = vor.u32 %v456_v56, %v453_v46  ;;  %13179 = vmatprep.mubr.msk.bf16.mxu0 %vm642_vm6, %v12096_v58  ;;  %v468_v17 = vshll.u32 %v15418_v54, 16  ;;  %v474_v23 = vshll.u32 %v15431_v0, 16  ;;  %v15507_v55 = vld [vmem:[%s15354_s19 + $0x60] sm:$0xf]  ;;  %v15510_v56 = vld [vmem:[%s15354_s19 + $0x64] sm:$0x1] }
  0x23   : > { %18552 = vst [vmem:[#allocation2_spill] sm:$0xff] %v15435_v1  ;;  %v15449_v14 = vcombine.low %v15414_v52, %v15435_v1  ;;  %v15457_v16 = vsel %vm15423_vm7, %v12131_v62, %v965_v63  ;;  %v467_v22 = vrot.slane %v465_v12, 4  ;;  %v479_v27 = vshrl.u32 %v15442_v13, 16  ;;  %v15566_v37 = vld [vmem:[%s15354_s19 + $0x7c] sm:$0x1] }
  0x24   : > { %v458_v19 = vrot.slane %v457_v2, 4  ;;  %v15465_v21 = vcombine.low %v15453_v15, %v15457_v16  ;;  %v470_v25 = vrot.slane %v468_v17, 5  ;;  %v482_v28 = vshll.u32 %v15442_v13, 16  ;;  %v15519_v17 = vld [vmem:[%s15354_s19 + $0x68] sm:$0xf] }
  0x25   : > { %18553 = vst [vmem:[#allocation3_spill] sm:$0xff] %v15449_v14  ;;  %13180 = vmatmul.mubr.msk.bf16.vlgmr.msra.gmra.mrb[0].mxu0 %vm642_vm6, %v15449_v14  ;;  %v488_v29 = vshll.u32 %v15445_v8, 16  ;;  %v476_v31 = vrot.slane %v474_v23, 5  ;;  %v493_v32 = vshrl.u32 %v15461_v18, 16  ;;  %v496_v35 = vshll.u32 %v15461_v18, 16 }
  0x26   : > { %v15483_v30 = vsel %vm15399_vm5, %v458_v19, %v462_v57  ;;  %13196 = vmatpush3.bf16.msra.mxu0 %v833_v53  ;;  %v471_v38 = vor.u32 %v470_v25, %v467_v22  ;;  %v481_v39 = vrot.slane %v479_v27, 4  ;;  %v484_v40 = vrot.slane %v482_v28, 5  ;;  %v15526_v27 = vld [vmem:[%s15354_s19 + $0x6c] sm:$0x1]  ;;  %v15582_v9 = vld [vmem:[%s15354_s19 + $0x88] sm:$0xf] }
  0x27   : > { %18554 = vst [vmem:[#allocation4_spill] sm:$0xff] %v15483_v30  ;;  %14797 = vmatprep.subr.msk.bf16.mxu0 %vm667_vm0, %v15471_v24  ;;  %v490_v43 = vrot.slane %v488_v29, 5  ;;  %v495_v44 = vrot.slane %v493_v32, 4  ;;  %v498_v45 = vrot.slane %v496_v35, 5  ;;  %v502_v46 = vshll.u32 %v15476_v26, 16 }
  0x28   : > { %v472_v48 = vrot.slane %v471_v38, 4  ;;  %v485_v49 = vor.u32 %v484_v40, %v481_v39  ;;  %v507_v50 = vshrl.u32 %v15488_v36, 16  ;;  %v510_v53 = vshll.u32 %v15488_v36, 16  ;;  %v15535_v35 = vld [vmem:[%s15354_s19 + $0x70] sm:$0xf] }
  0x29   : > { %v499_v57 = vor.u32 %v498_v45, %v495_v44  ;;  %v504_v58 = vrot.slane %v502_v46, 5  ;;  %v516_v60 = vshll.u32 %v15493_v41, 16  ;;  %v521_v61 = vshrl.u32 %v15496_v42, 16  ;;  %v15547_v44 = vld [vmem:[%s15354_s19 + $0x74] sm:$0x1] }
  0x2a   : > { %v15516_v62 = vsel %vm15399_vm5, %v472_v48, %v476_v31  ;;  %v486_v63 = vrot.slane %v485_v49, 4  ;;  %v509_v2 = vrot.slane %v507_v50, 4  ;;  %v512_v12 = vrot.slane %v510_v53, 5  ;;  %v15554_v50 = vld [vmem:[%s15354_s19 + $0x78] sm:$0xf] }
  0x2b   : > { %v15523_v19 = vcombine.low %v15483_v30, %v15516_v62  ;;  %v500_v22 = vrot.slane %v499_v57, 4  ;;  %v518_v23 = vrot.slane %v516_v60, 5  ;;  %v523_v25 = vrot.slane %v521_v61, 4 }
  0x2c   : > { %v15530_v28 = vsel %vm15399_vm5, %v486_v63, %v490_v43  ;;  %v513_v29 = vor.u32 %v512_v12, %v509_v2  ;;  %v524_v31 = vshll.u32 %v15496_v42, 16  ;;  %v530_v32 = vshll.u32 %v15502_v47, 16 }
  0x2d   : > { %18555 = vst [vmem:[#allocation5_spill] sm:$0xff] %v15523_v19  ;;  %13183 = vmatprep.mubr.msk.bf16.mxu0 %vm642_vm6, %v15523_v19  ;;  %v15541_v38 = vsel %vm15399_vm5, %v500_v22, %v504_v58  ;;  %v535_v39 = vshrl.u32 %v15507_v55, 16  ;;  %v538_v40 = vshll.u32 %v15507_v55, 16  ;;  %v544_v43 = vshll.u32 %v15510_v56, 16 }
  0x2e   : > { %18556 = vst [vmem:[#allocation6_spill] sm:$0xff] %v15541_v38  ;;  %v15551_v45 = vcombine.low %v15530_v28, %v15541_v38  ;;  %v514_v46 = vrot.slane %v513_v29, 4  ;;  %v526_v48 = vrot.slane %v524_v31, 5  ;;  %v532_v49 = vrot.slane %v530_v32, 5 }
  0x2f   : > { %v537_v53 = vrot.slane %v535_v39, 4  ;;  %v540_v57 = vrot.slane %v538_v40, 5  ;;  %v546_v58 = vrot.slane %v544_v43, 5  ;;  %v549_v60 = vshrl.u32 %v15519_v17, 16 }
  0x30   : > { %18557 = vst [vmem:[#allocation7_spill] sm:$0xff] %v15551_v45  ;;  %13184 = vmatmul.mubr.msk.bf16.gmra.mrb[4].mxu0 %vm642_vm6, %v15551_v45  ;;  %v519_v61 = vsel %vm15399_vm5, %v514_v46, %v518_v23  ;;  %v527_v63 = vor.u32 %v526_v48, %v523_v25  ;;  %v552_v2 = vshll.u32 %v15519_v17, 16  ;;  %v558_v12 = vshll.u32 %v15526_v27, 16 }
  0x31   : > { %v541_v22 = vor.u32 %v540_v57, %v537_v53  ;;  %v551_v29 = vrot.slane %v549_v60, 4  ;;  %v563_v31 = vshrl.u32 %v15535_v35, 16  ;;  %v566_v32 = vshll.u32 %v15535_v35, 16  ;;  %v15571_v53 = vld [vmem:[%s15354_s19 + $0x80] sm:$0xf] }
  0x32   : > { %v528_v39 = vrot.slane %v527_v63, 4  ;;  %v554_v40 = vrot.slane %v552_v2, 5  ;;  %v560_v43 = vrot.slane %v558_v12, 5  ;;  %v572_v23 = vshll.u32 %v15547_v44, 16  ;;  %v15579_v12 = vld [vmem:[%s15354_s19 + $0x84] sm:$0x1] }
  0x33   : > { %v542_v25 = vrot.slane %v541_v22, 4  ;;  %v565_v46 = vrot.slane %v563_v31, 4  ;;  %v568_v48 = vrot.slane %v566_v32, 5  ;;  %v577_v11 = vshrl.u32 %v15554_v50, 16 }
  0x34   : > { %v15575_v57 = vsel %vm15399_vm5, %v528_v39, %v532_v49  ;;  %v555_v60 = vor.u32 %v554_v40, %v551_v29  ;;  %v574_v63 = vrot.slane %v572_v23, 5  ;;  %v580_v2 = vshll.u32 %v15554_v50, 16  ;;  %v15593_v23 = vld [vmem:[%s15354_s19 + $0x8c] sm:$0x1] }
  0x35   : > { %v12100_v22 = vcombine.low %v519_v61, %v15575_v57  ;;  %v15587_v31 = vsel %vm15399_vm5, %v542_v25, %v546_v58  ;;  %v569_v32 = vor.u32 %v568_v48, %v565_v46  ;;  %v579_v45 = vrot.slane %v577_v11, 4 }
  0x36   : > { %v556_v19 = vrot.slane %v555_v60, 4  ;;  %v582_v49 = vrot.slane %v580_v2, 5  ;;  %v586_v39 = vshll.u32 %v15566_v37, 16  ;;  %v591_v29 = vshrl.u32 %v15571_v53, 16 }
  0x37   : > { %13187 = vmatprep.mubr.msk.bf16.mxu0 %vm642_vm6, %v12100_v22  ;;  %v570_v40 = vrot.slane %v569_v32, 4  ;;  %v594_v14 = vshll.u32 %v15571_v53, 16  ;;  %v600_v61 = vshll.u32 %v15579_v12, 16  ;;  %v605_v58 = vshrl.u32 %v15582_v9, 16 }
  0x38   : > { %v15600_v11 = vsel %vm15399_vm5, %v556_v19, %v560_v43  ;;  %v583_v25 = vor.u32 %v582_v49, %v579_v45  ;;  %v588_v46 = vrot.slane %v586_v39, 5  ;;  %v593_v48 = vrot.slane %v591_v29, 4 }
  0x39   : > { %v15604_v60 = vcombine.low %v15587_v31, %v15600_v11  ;;  %v15608_v2 = vsel %vm15399_vm5, %v570_v40, %v574_v63  ;;  %v596_v22 = vrot.slane %v594_v14, 5  ;;  %v607_v38 = vrot.slane %v605_v58, 4 }
  0x3a   : > { %v584_v32 = vrot.slane %v583_v25, 4  ;;  %v608_v30 = vshll.u32 %v15582_v9, 16  ;;  %v614_v1 = vshll.u32 %v15593_v23, 16  ;;  %v602_v45 = vrot.slane %v600_v61, 5 }
  0x3b   : > { %13188 = vmatmul.mubr.msk.bf16.gmra.mrb[8].mxu0 %vm642_vm6, %v15604_v60  ;;  %v597_v19 = vor.u32 %v596_v22, %v593_v48  ;;  %v12112_v43 = vcombine.low %v15357_v3, %v15363_v5  ;;  %v953_v49 = vrot.slane %v15360_v4, 5  ;;  %v957_v63 = vrot.slane %v15366_v6, 5 }
  0x3c   : > { %v15620_v14 = vsel %vm15399_vm5, %v584_v32, %v588_v46  ;;  %v610_v39 = vrot.slane %v608_v30, 5  ;;  %v15628_v61 = vcombine.low %v15369_v7, %v15377_v10  ;;  %v15632_v58 = vcombine.low %v15389_v20, %v15418_v54 }
  0x3d   : > { %v15624_v29 = vcombine.low %v15608_v2, %v15620_v14  ;;  %v598_v40 = vrot.slane %v597_v19, 4  ;;  %v616_v6 = vrot.slane %v614_v1, 5  ;;  %v12128_v25 = vrot.slane %v15357_v3, 9 }
  0x3e   : > { %v611_v4 = vor.u32 %v610_v39, %v607_v38  ;;  %v12129_v46 = vrot.slane %v15363_v5, 9  ;;  %v12132_v48 = vrot.slane %v15389_v20, 9  ;;  %v969_v22 = vrot.slane %v15395_v33, 5 }
  0x3f   : > { %13191 = vmatprep.mubr.msk.bf16.mxu0 %vm642_vm6, %v15624_v29  ;;  %v15640_v30 = vsel %vm15399_vm5, %v598_v40, %v602_v45  ;;  %v12133_v32 = vrot.slane %v15418_v54, 9  ;;  %v15647_v1 = vsel %vm15423_vm7, %v12128_v25, %v953_v49  ;;  %v973_v38 = vrot.slane %v15431_v0, 5 }
  0x40   : > { %v612_v19 = vrot.slane %v611_v4, 4  ;;  %v15651_v3 = vsel %vm15423_vm7, %v12129_v46, %v957_v63  ;;  %v15658_v39 = vsel %vm15423_vm7, %v12132_v48, %v969_v22  ;;  %v12134_v33 = vrot.slane %v15442_v13, 9 }
  0x41   : > { %v977_v40 = vrot.slane %v15445_v8, 5  ;;  %v15668_v63 = vsel %vm15423_vm7, %v12133_v32, %v973_v38  ;;  %v12135_v4 = vrot.slane %v15461_v18, 9  ;;  %v981_v46 = vrot.slane %v15476_v26, 5 }
  0x42   : > { %v15664_v49 = vsel %vm15399_vm5, %v612_v19, %v616_v6  ;;  %v15679_v8 = vcombine.low %v15658_v39, %v15668_v63  ;;  %v12136_v48 = vrot.slane %v15488_v36, 9  ;;  %v985_v22 = vrot.slane %v15493_v41, 5 }
  0x43   : > { %v15675_v25 = vcombine.low %v15640_v30, %v15664_v49  ;;  %v15683_v6 = vsel %vm15423_vm7, %v12134_v33, %v977_v40  ;;  %v12137_v32 = vrot.slane %v15496_v42, 9  ;;  %v989_v19 = vrot.slane %v15502_v47, 5 }
  0x44   : > { %v15694_v38 = vsel %vm15423_vm7, %v12135_v4, %v981_v46  ;;  %v12138_v33 = vrot.slane %v15507_v55, 9  ;;  %v993_v40 = vrot.slane %v15510_v56, 5  ;;  %v12139_v26 = vrot.slane %v15519_v17, 9 }
  0x45   : > { %18558 = vst [vmem:[#allocation8_spill] sm:$0xff] %v15675_v25  ;;  %13192 = vmatmul.mubr.msk.bf16.gmra.mrb[12].mxu0 %vm642_vm6, %v15675_v25  ;;  %v15702_v41 = vcombine.low %v15683_v6, %v15694_v38  ;;  %v986_v47 = vsel %vm15423_vm7, %v12136_v48, %v985_v22  ;;  %v15708_v0 = vsel %vm15423_vm7, %v12137_v32, %v989_v19  ;;  %v997_v4 = vrot.slane %v15526_v27, 5 }
  0x46   : > { %13197 = vmatprep.mubr.msk.bf16.mxu0 %vm642_vm6, %v12112_v43  ;;  %v12148_v46 = vcombine.low %v986_v47, %v15708_v0  ;;  %v15714_v56 = vsel %vm15423_vm7, %v12138_v33, %v993_v40  ;;  %v12140_v43 = vrot.slane %v15535_v35, 9  ;;  %v1001_v45 = vrot.slane %v15547_v44, 5 }
  0x47   : > { %v15720_v25 = vsel %vm15423_vm7, %v12139_v26, %v997_v4  ;;  %v12141_v48 = vrot.slane %v15554_v50, 9  ;;  %v1005_v22 = vrot.slane %v15566_v37, 5  ;;  %v12142_v27 = vrot.slane %v15571_v53, 9 }
  0x48   : > { %v15727_v32 = vcombine.low %v15714_v56, %v15720_v25  ;;  %v15731_v19 = vsel %vm15423_vm7, %v12140_v43, %v1001_v45  ;;  %v1009_v44 = vrot.slane %v15579_v12, 5  ;;  %v12143_v33 = vrot.slane %v15582_v9, 9 }
  0x49   : > { %v15737_v40 = vsel %vm15423_vm7, %v12141_v48, %v1005_v22  ;;  %v1013_v37 = vrot.slane %v15593_v23, 5  ;;  %v12161_v26 = vcombine.low %v15377_v10, %v15389_v20  ;;  %v12162_v47 = vcombine.low %v15418_v54, %v15442_v13  ;;  %v385_v10 = vld [vmem:[%s18452_s1 + $0xc] sm:$0xf] }
  0x4a   : > { %v1064_v45 = vsel %vm667_vm0, %v15471_v24, 0  ;;  %v15748_v12 = vcombine.low %v15731_v19, %v15737_v40  ;;  %v15752_v4 = vsel %vm15423_vm7, %v12142_v27, %v1009_v44  ;;  %v12164_v23 = vcombine.low %v15496_v42, %v15507_v55 }
  0x4b   : > { %v15761_v20 = vsel %vm15423_vm7, %v12143_v33, %v1013_v37  ;;  %v12165_v54 = vcombine.low %v15519_v17, %v15535_v35  ;;  %v12166_v24 = vcombine.low %v15554_v50, %v15571_v53  ;;  %v12178_v48 = vcombine.low %v15516_v62, %v15530_v28 }
  0x4c   : > { %v15771_v43 = vcombine.low %v15752_v4, %v15761_v20  ;;  %v12182_v44 = vcombine.low %v15620_v14, %v15640_v30  ;;  %v15788_v37 = vcombine.low %v15442_v13, %v15461_v18  ;;  %v12116_v22 = vcombine.low %v15488_v36, %v15496_v42  ;;  %v389_v30 = vld [vmem:[%s18452_s1 + $0x1c] sm:$0xf] }
  0x4d   : > { %13198 = vmatmul.mubr.msk.bf16.vlgmr.msra.gmra.mrb[0].mxu0 %vm642_vm6, %v15628_v61  ;;  %v12198_v27 = vcombine.low %v15708_v0, %v15714_v56  ;;  %v12199_v33 = vcombine.low %v15720_v25, %v15731_v19  ;;  %v15803_v13 = vcombine.low %v15507_v55, %v15519_v17  ;;  %v12200_v36 = vcombine.low %v15737_v40, %v15752_v4  ;;  %v380_v19 = vld [vmem:[%s15354_s19 + $0x98] sm:$0xf] }
  0x4e   : > { %13214 = vmatpush3.bf16.msra.mxu0 %v1064_v45  ;;  %13201 = vmatprep.mubr.msk.bf16.mxu0 %vm642_vm6, %v15632_v58  ;;  %v15807_v45 = vcombine.low %v15535_v35, %v15554_v50  ;;  %v15817_v42 = vcombine.low %v15571_v53, %v15582_v9  ;;  %v18559_v55 = vcombine.low %v15647_v1, %v15651_v3  ;;  %v1216_v17 = vsel %vm667_vm0, %v385_v10, 0  ;;  %v386_v35 = vld [vmem:[%s18452_s1 + $0x10] sm:$0xf]  ;;  %v387_v1 = vld [vmem:[%s18452_s1 + $0x14] sm:$0xf] }
  0x4f   : > { %14798 = vmatprep.subr.msk.bf16.mxu0 %vm667_vm0, %v385_v10  ;;  %v18560_v50 = vcombine.low %v15363_v5, %v15369_v7  ;;  %v1394_v53 = vsel %vm667_vm0, %v386_v35, 0  ;;  %v15864_v7 = vld [vmem:[%s15354_s19 + $0x90] sm:$0xf]  ;;  %v18566_v62 = vcombine.low %v15575_v57, %v15587_v31  ;;  %v18568_v31 = vcombine.low %v15651_v3, %v15453_v15 }
  0x50   : > { %v12167_v10 = vcombine.low %v15582_v9, %v15864_v7  ;;  %v388_v9 = vld [vmem:[%s18452_s1 + $0x18] sm:$0xf]  ;;  %v18570_v15 = vcombine.low %v15668_v63, %v15683_v6  ;;  %v1836_v25 = vsel %vm667_vm0, %v389_v30, 0  ;;  %v390_v6 = vld [vmem:[%s18452_s1 + $0x20] sm:$0xf]  ;;  %v12211_v40 = vcombine.low %v15864_v7, %v380_v19 }
  0x51   : > { %v1682_v14 = vsel %vm667_vm0, %v388_v9, 0 }
  0x55   : > { %13202 = vmatmul.mubr.msk.bf16.gmra.mrb[4].mxu0 %vm642_vm6, %v15788_v37 }
  0x56   : > { %13205 = vmatprep.mubr.msk.bf16.mxu0 %vm642_vm6, %v12116_v22 }
  0x5d   : > { %13206 = vmatmul.mubr.msk.bf16.gmra.mrb[8].mxu0 %vm642_vm6, %v15803_v13 }
  0x5e   : > { %13209 = vmatprep.mubr.msk.bf16.mxu0 %vm642_vm6, %v15807_v45 }
  0x65   : > { %13210 = vmatmul.mubr.msk.bf16.gmra.mrb[12].mxu0 %vm642_vm6, %v15817_v42 }
  0x66   : > { %13215 = vmatprep.mubr.msk.bf16.mxu0 %vm642_vm6, %v18559_v55 }
  0x6d   : > { %13216 = vmatmul.mubr.msk.bf16.vlgmr.msra.gmra.mrb[0].mxu0 %vm642_vm6, %v15465_v21 }
  0x6e   : > { %13232 = vmatpush3.bf16.msra.mxu0 %v1216_v17  ;;  %13219 = vmatprep.mubr.msk.bf16.mxu0 %vm642_vm6, %v15679_v8 }
  0x6f   : > { %14799 = vmatprep.subr.msk.bf16.mxu0 %vm667_vm0, %v386_v35 }
  0x75   : > { %13220 = vmatmul.mubr.msk.bf16.gmra.mrb[4].mxu0 %vm642_vm6, %v15702_v41 }
  0x76   : > { %13223 = vmatprep.mubr.msk.bf16.mxu0 %vm642_vm6, %v12148_v46  ;;  %v15854_v46 = vld [vmem:[%s15354_s19 + $0x40] sm:$0xf] }
  0x77   : > { %v12163_v5 = vcombine.low %v15461_v18, %v15854_v46  ;;  %v359_v18 = vld [vmem:[%s15354_s19 + $0x44] sm:$0x1] }
  0x7d   : > { %13224 = vmatmul.mubr.msk.bf16.gmra.mrb[8].mxu0 %vm642_vm6, %v15727_v32 }
  0x7e   : > { %13227 = vmatprep.mubr.msk.bf16.mxu0 %vm642_vm6, %v15748_v12 }
  0x85   : > { %13228 = vmatmul.mubr.msk.bf16.gmra.mrb[12].mxu0 %vm642_vm6, %v15771_v43 }
  0x86   : > { %13233 = vmatprep.mubr.msk.bf16.mxu0 %vm642_vm6, %v18560_v50  ;;  %v1554_v50 = vsel %vm667_vm0, %v387_v1, 0 }
  0x8d   : > { %13234 = vmatmul.mubr.msk.bf16.vlgmr.msra.gmra.mrb[0].mxu0 %vm642_vm6, %v12161_v26  ;;  %v1332_v26 = vshrl.u32 %v15854_v46, 16 }
  0x8e   : > { %13250 = vmatpush3.bf16.msra.mxu0 %v1394_v53  ;;  %13237 = vmatprep.mubr.msk.bf16.mxu0 %vm642_vm6, %v12162_v47  ;;  %v1335_v47 = vshll.u32 %v15854_v46, 16  ;;  %v18562_v53 = vld [vmem:[#allocation2_spill] sm:$0xff] }
  0x8f   : > { %14800 = vmatprep.subr.msk.bf16.mxu0 %vm667_vm0, %v387_v1  ;;  %v1334_v22 = vrot.slane %v1332_v26, 4  ;;  %v1349_v1 = vshll.u32 %v15864_v7, 16 }
  0x90   : > { %v1337_v55 = vrot.slane %v1335_v47, 5  ;;  %v18565_v47 = vld [vmem:[#allocation6_spill] sm:$0xff] }
  0x95   : > { %13238 = vmatmul.mubr.msk.bf16.gmra.mrb[4].mxu0 %vm642_vm6, %v12163_v5  ;;  %v18563_v5 = vld [vmem:[#allocation4_spill] sm:$0xff] }
  0x96   : > { %13241 = vmatprep.mubr.msk.bf16.mxu0 %vm642_vm6, %v12164_v23  ;;  %v18561_v23 = vcombine.low %v15410_v51, %v15414_v52  ;;  %v18564_v26 = vcombine.low %v18562_v53, %v18563_v5  ;;  %v1346_v52 = vshrl.u32 %v15864_v7, 16 }
  0x9d   : > { %13242 = vmatmul.mubr.msk.bf16.gmra.mrb[8].mxu0 %vm642_vm6, %v12165_v54  ;;  %v1338_v54 = vor.u32 %v1337_v55, %v1334_v22  ;;  %v1348_v22 = vrot.slane %v1346_v52, 4  ;;  %v1351_v55 = vrot.slane %v1349_v1, 5  ;;  %v381_v52 = vld [vmem:[%s15354_s19 + $0x9c] sm:$0x1] }
  0x9e   : > { %13245 = vmatprep.mubr.msk.bf16.mxu0 %vm642_vm6, %v12166_v24  ;;  %v1341_v24 = vshll.u32 %v359_v18, 16 }
  0x9f   : > { %v1339_v17 = vrot.slane %v1338_v54, 4  ;;  %v1352_v28 = vor.u32 %v1351_v55, %v1348_v22  ;;  %v18574_v55 = vld [vmem:[#allocation8_spill] sm:$0xff] }
  0xa0   : > { %v1343_v35 = vrot.slane %v1341_v24, 5 }
  0xa1   : > { %v1353_v54 = vrot.slane %v1352_v28, 4  ;;  %v12231_v28 = vrot.slane %v380_v19, 9 }
  0xa2   : > { %v15890_v51 = vsel %vm15399_vm5, %v1339_v17, %v1343_v35  ;;  %v18567_v17 = vcombine.low %v15600_v11, %v15608_v2  ;;  %v12192_v11 = vrot.slane %v15854_v46, 9  ;;  %v1513_v2 = vrot.slane %v359_v18, 5  ;;  %v18572_v18 = vld [vmem:[#allocation5_spill] sm:$0xff] }
  0xa4   : > { %v15937_v3 = vsel %vm15423_vm7, %v12192_v11, %v1513_v2 }
  0xa5   : > { %13246 = vmatmul.mubr.msk.bf16.gmra.mrb[12].mxu0 %vm642_vm6, %v12167_v10  ;;  %v12179_v10 = vcombine.low %v18565_v47, %v15890_v51  ;;  %v1821_v47 = vshll.u32 %v381_v52, 16 }
  0xa6   : > { %13251 = vmatprep.mubr.msk.bf16.mxu0 %vm642_vm6, %v18561_v23  ;;  %v379_v23 = vld [vmem:[%s15354_s19 + $0x94] sm:$0x1] }
  0xa7   : > { %v1823_v22 = vrot.slane %v1821_v47, 5 }
  0xad   : > { %13252 = vmatmul.mubr.msk.bf16.vlgmr.msra.gmra.mrb[0].mxu0 %vm642_vm6, %v18564_v26 }
  0xae   : > { %13268 = vmatpush3.bf16.msra.mxu0 %v1554_v50  ;;  %13255 = vmatprep.mubr.msk.bf16.mxu0 %vm642_vm6, %v12178_v48  ;;  %v1355_v48 = vshll.u32 %v379_v23, 16  ;;  %v18573_v50 = vld [vmem:[#allocation7_spill] sm:$0xff] }
  0xaf   : > { %14801 = vmatprep.subr.msk.bf16.mxu0 %vm667_vm0, %v388_v9 }
  0xb0   : > { %v1357_v24 = vrot.slane %v1355_v48, 5 }
  0xb2   : > { %v15913_v35 = vsel %vm15399_vm5, %v1353_v54, %v1357_v24 }
  0xb3   : > { %v12183_v57 = vcombine.low %v15664_v49, %v15913_v35  ;;  %v12197_v49 = vcombine.low %v15694_v38, %v15937_v3  ;;  %v360_v38 = vld [vmem:[%s15354_s19 + $0x48] sm:$0xf] }
  0xb4   : > { %v12210_v56 = vcombine.low %v15854_v46, %v360_v38  ;;  %v1972_v46 = vsel %vm667_vm0, %v390_v6, 0 }
  0xb5   : > { %13256 = vmatmul.mubr.msk.bf16.gmra.mrb[4].mxu0 %vm642_vm6, %v12179_v10 }
  0xb6   : > { %13259 = vmatprep.mubr.msk.bf16.mxu0 %vm642_vm6, %v18566_v62 }
  0xbd   : > { %13260 = vmatmul.mubr.msk.bf16.gmra.mrb[8].mxu0 %vm642_vm6, %v18567_v17 }
  0xbe   : > { %13263 = vmatprep.mubr.msk.bf16.mxu0 %vm642_vm6, %v12182_v44  ;;  %v18569_v44 = vcombine.low %v15457_v16, %v15658_v39  ;;  %v12193_v16 = vrot.slane %v15864_v7, 9  ;;  %v1517_v39 = vrot.slane %v379_v23, 5  ;;  %v1815_v7 = vshll.u32 %v380_v19, 16 }
  0xc0   : > { %v15958_v63 = vsel %vm15423_vm7, %v12193_v16, %v1517_v39  ;;  %v1817_v26 = vrot.slane %v1815_v7, 5 }
  0xc1   : > { %v12201_v0 = vcombine.low %v15761_v20, %v15958_v63 }
  0xc5   : > { %13264 = vmatmul.mubr.msk.bf16.gmra.mrb[12].mxu0 %vm642_vm6, %v12183_v57 }
  0xc6   : > { %13269 = vmatprep.mubr.msk.bf16.mxu0 %vm642_vm6, %v18568_v31 }
  0xcd   : > { %13270 = vmatmul.mubr.msk.bf16.vlgmr.msra.gmra.mrb[0].mxu0 %vm642_vm6, %v18569_v44 }
  0xce   : > { %13286 = vmatpush3.bf16.msra.mxu0 %v1682_v14  ;;  %13273 = vmatprep.mubr.msk.bf16.mxu0 %vm642_vm6, %v18570_v15 }
  0xcf   : > { %14802 = vmatprep.subr.msk.bf16.mxu0 %vm667_vm0, %v389_v30 }
  0xd5   : > { %13274 = vmatmul.mubr.msk.bf16.gmra.mrb[4].mxu0 %vm642_vm6, %v12197_v49 }
  0xd6   : > { %13277 = vmatprep.mubr.msk.bf16.mxu0 %vm642_vm6, %v12198_v27  ;;  %v361_v27 = vld [vmem:[%s15354_s19 + $0x4c] sm:$0x1] }
  0xd7   : > { %v1955_v62 = vrot.slane %v361_v27, 5 }
  0xdd   : > { %13278 = vmatmul.mubr.msk.bf16.gmra.mrb[8].mxu0 %vm642_vm6, %v12199_v33  ;;  %v18571_v33 = vld [vmem:[#allocation3_spill] sm:$0xff] }
  0xde   : > { %13281 = vmatprep.mubr.msk.bf16.mxu0 %vm642_vm6, %v12200_v36 }
  0xe5   : > { %13282 = vmatmul.mubr.msk.bf16.gmra.mrb[12].mxu0 %vm642_vm6, %v12201_v0 }
  0xe6   : > { %13287 = vmatprep.mubr.msk.bf16.mxu0 %vm642_vm6, %v15628_v61  ;;  %v1798_v61 = vshrl.u32 %v360_v38, 16 }
  0xe8   : > { %v1800_v4 = vrot.slane %v1798_v61, 4 }
  0xed   : > { %13288 = vmatmul.mubr.msk.bf16.vlgmr.msra.gmra.mrb[0].mxu0 %vm642_vm6, %v15632_v58  ;;  %v1801_v58 = vshll.u32 %v360_v38, 16 }
  0xee   : > { %13304 = vmatpush3.bf16.msra.mxu0 %v1836_v25  ;;  %13291 = vmatprep.mubr.msk.bf16.mxu0 %vm642_vm6, %v15788_v37 }
  0xef   : > { %14803 = vmatprep.subr.msk.bf16.mxu0 %vm667_vm0, %v390_v6  ;;  %v1803_v20 = vrot.slane %v1801_v58, 5 }
  0xf1   : > { %v1804_v37 = vor.u32 %v1803_v20, %v1800_v4 }
  0xf5   : > { %13292 = vmatmul.mubr.msk.bf16.gmra.mrb[4].mxu0 %vm642_vm6, %v12210_v56 }
  0xf6   : > { %13295 = vmatprep.mubr.msk.bf16.mxu0 %vm642_vm6, %v15803_v13  ;;  %v1807_v13 = vshll.u32 %v361_v27, 16 }
  0xf8   : > { %v1809_v36 = vrot.slane %v1807_v13, 5 }
  0xfd   : > { %13296 = vmatmul.mubr.msk.bf16.gmra.mrb[8].mxu0 %vm642_vm6, %v15807_v45  ;;  %v1805_v45 = vrot.slane %v1804_v37, 4 }
  0xfe   : > { %13299 = vmatprep.mubr.msk.bf16.mxu0 %vm642_vm6, %v15817_v42  ;;  %v1812_v42 = vshrl.u32 %v380_v19, 16 }
  0xff   : > { %v1810_v9 = vsel %vm15399_vm5, %v1805_v45, %v1809_v36 }
 0x100   : > { %v12220_v53 = vcombine.low %v15890_v51, %v1810_v9  ;;  %v1814_v5 = vrot.slane %v1812_v42, 4  ;;  %v15277_v42 = vmov 1983009808  }
 0x101   : > { %v2656_v7 = vunpack.c.l.s4 %v15277_v42 }
 0x102   : > { %v1818_v1 = vor.u32 %v1817_v26, %v1814_v5 }
 0x104   : > { %v1819_v10 = vrot.slane %v1818_v1, 4 }
 0x105   : > { %13300 = vmatmul.mubr.msk.bf16.gmra.mrb[12].mxu0 %vm642_vm6, %v12211_v40 }
 0x106   : > { %13305 = vmatprep.mubr.msk.bf16.mxu0 %vm642_vm6, %v18571_v33  ;;  %v1824_v51 = vsel %vm15399_vm5, %v1819_v10, %v1823_v22 }
 0x107   : > { %v12221_v23 = vcombine.low %v15913_v35, %v1824_v51 }
 0x10d   : > { %13306 = vmatmul.mubr.msk.bf16.vlgmr.msra.gmra.mrb[0].mxu0 %vm642_vm6, %v18572_v18 }
 0x10e   : > { %13322 = vmatpush3.bf16.msra.mxu0 %v1972_v46  ;;  %13309 = vmatprep.mubr.msk.bf16.mxu0 %vm642_vm6, %v18573_v50  ;;  %v2910_v46 = vld [vmem:[%s18454_s3] sm:$0xf]  ;;  %v2658_v50 = vlaneseq }
 0x10f   : > { %14804 = vmatprep.subr.msk.bf16.mxu1 %vm667_vm0, %v2910_v46  ;;  %v3152_v18 = vsel %vm667_vm0, %v2910_v46, 0 }
 0x110   : > { %13340 = vmatpush3.bf16.msra.mxu1 %v3152_v18  ;;  %v16037_v5 = vshrl.u32 %v2658_v50, 7 }
 0x115   : > { %13310 = vmatmul.mubr.msk.bf16.gmra.mrb[4].mxu0 %vm642_vm6, %v12220_v53  ;;  %v2657_v53 = vunpack.c.0.s8 %v2656_v7 }
 0x116   : > { %13313 = vmatprep.mubr.msk.bf16.mxu0 %vm642_vm6, %v15604_v60  ;;  %v12230_v60 = vrot.slane %v360_v38, 9 }
 0x117   : > { %v16040_v1 = vsub.s32 %v2657_v53, %v16037_v5 }
 0x11d   : > { %13314 = vmatmul.mubr.msk.bf16.gmra.mrb[8].mxu0 %vm642_vm6, %v15624_v29  ;;  %v1956_v29 = vsel %vm15423_vm7, %v12230_v60, %v1955_v62 }
 0x11e   : > { %13317 = vmatprep.mubr.msk.bf16.mxu0 %vm642_vm6, %v18574_v55  ;;  %v12232_v34 = vcombine.low %v15937_v3, %v1956_v29 }
 0x125   : > { %13318 = vmatmul.mubr.msk.bf16.gmra.mrb[12].mxu0 %vm642_vm6, %v12221_v23 }
 0x126   : > { %13323 = vmatprep.mubr.msk.bf16.mxu0 %vm642_vm6, %v15465_v21  ;;  %v1959_v21 = vrot.slane %v381_v52, 5 }
 0x12d   : > { %13324 = vmatmul.mubr.msk.bf16.vlgmr.msra.gmra.mrb[0].mxu0 %vm642_vm6, %v15679_v8  ;;  %v1960_v8 = vsel %vm15423_vm7, %v12231_v28, %v1959_v21 }
 0x12e   : > { %13327 = vmatprep.mubr.msk.bf16.mxu0 %vm642_vm6, %v15702_v41  ;;  %v12233_v41 = vcombine.low %v15958_v63, %v1960_v8 }
 0x135   : > { %13328 = vmatmul.mubr.msk.bf16.gmra.mrb[4].mxu0 %vm642_vm6, %v12232_v34 }
 0x136   : > { %13331 = vmatprep.mubr.msk.bf16.mxu0 %vm642_vm6, %v15727_v32  ;;  %v12242_v32 = vld [vmem:[%s18453_s2] ss:$0 sm:$0xff] }
 0x13d   : > { %13332 = vmatmul.mubr.msk.bf16.gmra.mrb[8].mxu0 %vm642_vm6, %v15748_v12 }
 0x13e   : > { %13335 = vmatprep.mubr.msk.bf16.mxu0 %vm642_vm6, %v15771_v43 }
 0x145   : > { %13336 = vmatmul.mubr.msk.bf16.gmra.mrb[12].mxu0 %vm642_vm6, %v12233_v41 }
 0x200   : > { %v13325_v48 = vpop.f32.mrb[0].mxu0 }
 0x201   : > { %v2008_v54 = vpop.f32.mrb[1].mxu0  ;;  %v2096_v14 = vadd.f32 %v13325_v48, %v12242_v32 }
 0x202   : > { %v13326_v24 = vpop.f32.mrb[2].mxu0  ;;  %v2094_v35 = vadd.f32 %v12242_v32, %v2008_v54 }
 0x203   : > { %v2011_v17 = vpop.f32.mrb[3].mxu0  ;;  %v2097_v59 = vadd.f32 %v13326_v24, %v12242_v32 }
 0x204   : > { %v2095_v12 = vadd.f32 %v12242_v32, %v2011_v17 }
 0x206   : > { %v14829_v57 = vpack.i.bf16 %v2095_v12, %v2094_v35 }
 0x208   : > { %14830 = vxpose.xlu0.b32.start.end [1/1] (short) (narrow) %v14829_v57, 16  ;;  %v13329_v43 = vpop.f32.mrb[4].mxu0 }
 0x209   : > { %v2024_v31 = vpop.f32.mrb[5].mxu0  ;;  %v2100_v30 = vadd.f32 %v13329_v43, %v12242_v32 }
 0x20a   : > { %v2098_v11 = vadd.f32 %v12242_v32, %v2024_v31  ;;  %v13330_v2 = vpop.f32.mrb[6].mxu0 }
 0x20b   : > { %v2101_v44 = vadd.f32 %v13330_v2, %v12242_v32  ;;  %v2027_v15 = vpop.f32.mrb[7].mxu0 }
 0x20c   : > { %v14841_v3 = vpack.i.bf16 %v2098_v11, %v2097_v59  ;;  %v2099_v39 = vadd.f32 %v12242_v32, %v2027_v15 }
 0x20d   : > { %2174 = vxpose.xlu0.b32.start.end [1/1] (short) (narrow) %v2096_v14, 16  ;;  %v14853_v49 = vpack.i.bf16 %v2101_v44, %v2100_v30 }
 0x20e   : > { %14842 = vxpose.xlu1.b32.start.end [1/1] (short) (narrow) %v14841_v3, 16 }
 0x210   : > { %v13333_v16 = vpop.f32.mrb[8].mxu0 }
 0x211   : > { %v2040_v63 = vpop.f32.mrb[9].mxu0  ;;  %v2104_v56 = vadd.f32 %v13333_v16, %v12242_v32 }
 0x212   : > { %14854 = vxpose.xlu0.b32.start.end [1/1] (short) (narrow) %v14853_v49, 16  ;;  %v13334_v0 = vpop.f32.mrb[10].mxu0  ;;  %v2102_v6 = vadd.f32 %v12242_v32, %v2040_v63 }
 0x213   : > { %2270 = vxpose.xlu1.b32.start.end [1/1] (short) (narrow) %v2099_v39, 16  ;;  %v2043_v25 = vpop.f32.mrb[11].mxu0  ;;  %v2105_v40 = vadd.f32 %v13334_v0, %v12242_v32 }
 0x214   : > { %v2103_v38 = vadd.f32 %v12242_v32, %v2043_v25 }
 0x216   : > { %v14865_v61 = vpack.i.bf16 %v2103_v38, %v2102_v6 }
 0x217   : > { %2430 = vxpose.xlu0.b32.start.end [1/1] (short) (narrow) %v2104_v56, 16 }
 0x218   : > { %14866 = vxpose.xlu1.b32.start.end [1/1] (short) (narrow) %v14865_v61, 16  ;;  %v13337_v58 = vpop.f32.mrb[12].mxu0 }
 0x219   : > { %v2056_v19 = vpop.f32.mrb[13].mxu0  ;;  %v2108_v27 = vadd.f32 %v13337_v58, %v12242_v32 }
 0x21a   : > { %v2106_v4 = vadd.f32 %v12242_v32, %v2056_v19  ;;  %v13338_v20 = vpop.f32.mrb[14].mxu0 }
 0x21b   : > { %v2109_v33 = vadd.f32 %v13338_v20, %v12242_v32  ;;  %v2059_v37 = vpop.f32.mrb[15].mxu0 }
 0x21c   : > { %v2107_v13 = vadd.f32 %v12242_v32, %v2059_v37  ;;  %v14877_v45 = vpack.i.bf16 %v2106_v4, %v2105_v40 }
 0x21d   : > { %v14889_v36 = vpack.i.bf16 %v2109_v33, %v2108_v27 }
 0x21e   : > { %14878 = vxpose.xlu1.b32.start.end [1/1] (short) (narrow) %v14877_v45, 16  ;;  %2526 = vxpose.xlu0.b32.start.end [1/1] (short) (narrow) %v2107_v13, 16 }
 0x223   : > { %14890 = vxpose.xlu1.b32.start.end [1/1] (short) (narrow) %v14889_v36, 16 }
 0x288   : > { %v14831_v9 = vpop.trf.xlu0 }
 0x289   : > { %v14835_v26 = vunpack.i.h.bf16 %v14831_v9  ;;  %v14832_v52 = vunpack.i.l.bf16 %v14831_v9 }
 0x28c   : > { %v14836_v47 = vpop.trf.xlu0 }
 0x28d   : > { %v14840_v10 = vunpack.i.h.bf16 %v14836_v47  ;;  %v14837_v22 = vunpack.i.l.bf16 %v14836_v47 }
 0x28e   : > { %v14843_v55 = vpop.trf.xlu1 }
 0x28f   : > { %v2622_v51 = vpack.c.bf16 %v14837_v22, %v14832_v52  ;;  %v2623_v23 = vpack.c.bf16 %v14840_v10, %v14835_v26  ;;  %v12243_v60 = vpack.c.bf16 %v14837_v22, %v14837_v22  ;;  %v12244_v62 = vpack.c.bf16 %v14840_v10, %v14840_v10 }
 0x290   : > { %v14847_v29 = vunpack.i.h.bf16 %v14843_v55  ;;  %v2190_v34 = vpop.trf.xlu0  ;;  %v14844_v28 = vunpack.i.l.bf16 %v14843_v55 }
 0x291   : > { %v2661_v21 = vrot.slane %v2622_v51, %v16040_v1  ;;  %v2668_v8 = vrot.slane %v12243_v60, %v16040_v1  ;;  %v2677_v41 = vrot.slane %v2623_v23, %v16040_v1  ;;  %v2684_v24 = vrot.slane %v12244_v62, %v16040_v1 }
 0x292   : > { %v14848_v48 = vpop.trf.xlu1 }
 0x293   : > { %v14852_v32 = vunpack.i.h.bf16 %v14848_v48  ;;  %v14849_v54 = vunpack.i.l.bf16 %v14848_v48  ;;  %v2669_v35 = vcombine.high %v2661_v21, %v2661_v21  ;;  %v2685_v12 = vcombine.high %v2677_v41, %v2677_v41 }
 0x294   : > { %v2191_v17 = vpop.trf.xlu0  ;;  %v2912_v57 = vcombine.low %v2668_v8, %v2677_v41 }
 0x295   : > { %v12247_v43 = vpack.c.bf16 %v14852_v32, %v14852_v32  ;;  %v2625_v31 = vpack.c.bf16 %v14849_v54, %v14844_v28  ;;  %v2626_v59 = vpack.c.bf16 %v14852_v32, %v14847_v29  ;;  %v12246_v11 = vpack.c.bf16 %v14849_v54, %v14849_v54 }
 0x296   : > { %v2624_v2 = vpack.c.bf16 %v2191_v17, %v2190_v34  ;;  %v12245_v14 = vpack.c.bf16 %v2191_v17, %v2191_v17  ;;  %v2286_v30 = vpop.trf.xlu1  ;;  %v2911_v44 = vcombine.low %v2661_v21, %v2669_v35  ;;  %v2926_v15 = vrot.slane %v2912_v57, %v16040_v1 }
 0x297   : > { %v2716_v3 = vrot.slane %v12246_v11, %v16040_v1  ;;  %v2725_v49 = vrot.slane %v2626_v59, %v16040_v1  ;;  %v2709_v16 = vrot.slane %v2625_v31, %v16040_v1  ;;  %v2732_v39 = vrot.slane %v12247_v43, %v16040_v1 }
 0x298   : > { %v2693_v63 = vrot.slane %v2624_v2, %v16040_v1  ;;  %v2700_v0 = vrot.slane %v12245_v14, %v16040_v1  ;;  %v14855_v25 = vpop.trf.xlu0  ;;  %v2919_v6 = vrot.slane %v2911_v44, %v16040_v1  ;;  %v2928_v38 = vcombine.low %v2685_v12, %v2684_v24 }
 0x299   : > { %v2733_v56 = vcombine.high %v2725_v49, %v2725_v49  ;;  %v2717_v61 = vcombine.high %v2709_v16, %v2709_v16  ;;  %v14859_v58 = vunpack.i.h.bf16 %v14855_v25  ;;  %v14856_v4 = vunpack.i.l.bf16 %v14855_v25 }
 0x29a   : > { %v2701_v19 = vcombine.high %v2693_v63, %v2693_v63  ;;  %v2945_v40 = vcombine.low %v2700_v0, %v2709_v16  ;;  %v2287_v20 = vpop.trf.xlu1  ;;  %v2927_v37 = vcombine.low %v2919_v6, %v2926_v15  ;;  %v2936_v13 = vrot.slane %v2928_v38, %v16040_v1 }
 0x29b   : > { %v2627_v27 = vpack.c.bf16 %v2287_v20, %v2286_v30  ;;  %v12248_v33 = vpack.c.bf16 %v2287_v20, %v2287_v20  ;;  %v2946_v18 = vcombine.low %v2717_v61, %v2716_v3  ;;  %v2962_v42 = vcombine.low %v2725_v49, %v2733_v56 }
 0x29c   : > { %v2929_v45 = vcombine.low %v2693_v63, %v2701_v19  ;;  %v2953_v36 = vrot.slane %v2945_v40, %v16040_v1  ;;  %v14860_v46 = vpop.trf.xlu0  ;;  %13341 = vmatprep.mubr.msk.bf16.mxu1 %vm642_vm6, %v2927_v37 }
 0x29d   : > { %v2741_v7 = vrot.slane %v2627_v27, %v16040_v1  ;;  %v2748_v50 = vrot.slane %v12248_v33, %v16040_v1  ;;  %v14864_v9 = vunpack.i.h.bf16 %v14860_v46  ;;  %v14861_v26 = vunpack.i.l.bf16 %v14860_v46 }
 0x29e   : > { %v2943_v53 = vrot.slane %v2929_v45, %v16040_v1  ;;  %v2960_v52 = vrot.slane %v2946_v18, %v16040_v1  ;;  %v14867_v47 = vpop.trf.xlu1  ;;  %v2970_v54 = vrot.slane %v2962_v42, %v16040_v1 }
 0x29f   : > { %v2749_v10 = vcombine.high %v2741_v7, %v2741_v7  ;;  %v2963_v22 = vcombine.low %v2732_v39, %v2741_v7  ;;  %v12250_v55 = vpack.c.bf16 %v14864_v9, %v14864_v9  ;;  %v2629_v51 = vpack.c.bf16 %v14864_v9, %v14859_v58 }
 0x2a0   : > { %v2628_v23 = vpack.c.bf16 %v14861_v26, %v14856_v4  ;;  %v12249_v60 = vpack.c.bf16 %v14861_v26, %v14861_v26  ;;  %v2944_v62 = vcombine.low %v2936_v13, %v2943_v53  ;;  %v2961_v29 = vcombine.low %v2953_v36, %v2960_v52  ;;  %v2446_v34 = vpop.trf.xlu0 }
 0x2a1   : > { %v2977_v28 = vrot.slane %v2963_v22, %v16040_v1  ;;  %v2979_v21 = vcombine.low %v2749_v10, %v2748_v50  ;;  %v2780_v8 = vrot.slane %v12250_v55, %v16040_v1  ;;  %v2773_v41 = vrot.slane %v2629_v51, %v16040_v1 }
 0x2a2   : > { %v2757_v48 = vrot.slane %v2628_v23, %v16040_v1  ;;  %v2764_v32 = vrot.slane %v12249_v60, %v16040_v1  ;;  %13342 = vmatmul.mubr.msk.bf16.vlgmr.msra.gmra.mrb[0].mxu1 %vm642_vm6, %v2944_v62  ;;  %v14871_v24 = vunpack.i.h.bf16 %v14867_v47  ;;  %v14872_v17 = vpop.trf.xlu1  ;;  %v14868_v59 = vunpack.i.l.bf16 %v14867_v47 }
 0x2a3   : > { %v2987_v35 = vrot.slane %v2979_v21, %v16040_v1  ;;  %v2781_v12 = vcombine.high %v2773_v41, %v2773_v41  ;;  %13345 = vmatprep.mubr.msk.bf16.mxu1 %vm642_vm6, %v2961_v29  ;;  %v2978_v43 = vcombine.low %v2970_v54, %v2977_v28  ;;  %v14876_v14 = vunpack.i.h.bf16 %v14872_v17 }
 0x2a4   : > { %v2765_v57 = vcombine.high %v2757_v48, %v2757_v48  ;;  %v2996_v31 = vcombine.low %v2764_v32, %v2773_v41  ;;  %v2447_v11 = vpop.trf.xlu0  ;;  %v14873_v15 = vunpack.i.l.bf16 %v14872_v17 }
 0x2a5   : > { %v2997_v2 = vcombine.low %v2781_v12, %v2780_v8  ;;  %v2632_v3 = vpack.c.bf16 %v2447_v11, %v2446_v34  ;;  %v12252_v39 = vpack.c.bf16 %v14876_v14, %v14876_v14  ;;  %v2631_v63 = vpack.c.bf16 %v14876_v14, %v14871_v24 }
 0x2a6   : > { %v2980_v30 = vcombine.low %v2757_v48, %v2765_v57  ;;  %v3004_v44 = vrot.slane %v2996_v31, %v16040_v1  ;;  %v14879_v49 = vpop.trf.xlu1  ;;  %v12253_v0 = vpack.c.bf16 %v2447_v11, %v2447_v11  ;;  %v2630_v6 = vpack.c.bf16 %v14873_v15, %v14868_v59 }
 0x2a7   : > { %v3011_v16 = vrot.slane %v2997_v2, %v16040_v1  ;;  %v12251_v38 = vpack.c.bf16 %v14873_v15, %v14873_v15  ;;  %v2821_v56 = vrot.slane %v2632_v3, %v16040_v1  ;;  %v2812_v19 = vrot.slane %v12252_v39, %v16040_v1 }
 0x2a8   : > { %v2994_v25 = vrot.slane %v2980_v30, %v16040_v1  ;;  %v2542_v61 = vpop.trf.xlu0  ;;  %v2789_v4 = vrot.slane %v2630_v6, %v16040_v1  ;;  %v2805_v20 = vrot.slane %v2631_v63, %v16040_v1  ;;  %v2828_v37 = vrot.slane %v12253_v0, %v16040_v1 }
 0x2a9   : > { %v3012_v58 = vcombine.low %v3004_v44, %v3011_v16  ;;  %v2829_v27 = vcombine.high %v2821_v56, %v2821_v56  ;;  %v14883_v13 = vunpack.i.h.bf16 %v14879_v49  ;;  %v2796_v45 = vrot.slane %v12251_v38, %v16040_v1 }
 0x2aa   : > { %13346 = vmatmul.mubr.msk.bf16.gmra.mrb[4].mxu1 %vm642_vm6, %v2978_v43  ;;  %v2995_v40 = vcombine.low %v2987_v35, %v2994_v25  ;;  %v14884_v33 = vpop.trf.xlu1  ;;  %v14880_v46 = vunpack.i.l.bf16 %v14879_v49  ;;  %v2797_v9 = vcombine.high %v2789_v4, %v2789_v4  ;;  %v2813_v53 = vcombine.high %v2805_v20, %v2805_v20 }
 0x2ab   : > { %v3031_v36 = vcombine.low %v2821_v56, %v2829_v27  ;;  %v14888_v18 = vunpack.i.h.bf16 %v14884_v33  ;;  %v14885_v7 = vunpack.i.l.bf16 %v14884_v33  ;;  %v3014_v41 = vcombine.low %v2796_v45, %v2805_v20 }
 0x2ac   : > { %13349 = vmatprep.mubr.msk.bf16.mxu1 %vm642_vm6, %v2995_v40  ;;  %v2543_v42 = vpop.trf.xlu0  ;;  %v3013_v8 = vcombine.low %v2789_v4, %v2797_v9  ;;  %v3030_v48 = vcombine.low %v2813_v53, %v2812_v19 }
 0x2ad   : > { %v2635_v50 = vpack.c.bf16 %v2543_v42, %v2542_v61  ;;  %v12255_v26 = vpack.c.bf16 %v14888_v18, %v14888_v18  ;;  %v2634_v52 = vpack.c.bf16 %v14888_v18, %v14883_v13  ;;  %v3045_v10 = vrot.slane %v3031_v36, %v16040_v1 }
 0x2ae   : > { %v14891_v47 = vpop.trf.xlu1  ;;  %v2633_v22 = vpack.c.bf16 %v14885_v7, %v14880_v46  ;;  %v12254_v55 = vpack.c.bf16 %v14885_v7, %v14885_v7  ;;  %v12256_v60 = vpack.c.bf16 %v2543_v42, %v2543_v42  ;;  %v3021_v12 = vrot.slane %v3013_v8, %v16040_v1 }
 0x2af   : > { %v2853_v51 = vrot.slane %v2634_v52, %v16040_v1  ;;  %v2860_v23 = vrot.slane %v12255_v26, %v16040_v1  ;;  %v14895_v29 = vunpack.i.h.bf16 %v14891_v47  ;;  %v14892_v34 = vunpack.i.l.bf16 %v14891_v47 }
 0x2b0   : > { %v2837_v62 = vrot.slane %v2633_v22, %v16040_v1  ;;  %v2869_v28 = vrot.slane %v2635_v50, %v16040_v1  ;;  %v2844_v21 = vrot.slane %v12254_v55, %v16040_v1  ;;  %v3028_v57 = vrot.slane %v3014_v41, %v16040_v1  ;;  %v4651_v50 = vld [vmem:[%s18455_s4] sm:$0xf] }
 0x2b1   : > { %v2861_v24 = vcombine.high %v2853_v51, %v2853_v51  ;;  %v3038_v43 = vrot.slane %v3030_v48, %v16040_v1  ;;  %v2876_v31 = vrot.slane %v12256_v60, %v16040_v1  ;;  %14805 = vmatprep.subr.msk.bf16.mxu0 %vm667_vm0, %v4651_v50  ;;  %v4725_v9 = vsel %vm667_vm0, %v4651_v50, 0  ;;  %14806 = vmatprep.subr.msk.bf16.mxu1 %vm667_vm0, %v4651_v50 }
 0x2b2   : > { %13350 = vmatmul.mubr.msk.bf16.gmra.mrb[8].mxu1 %vm642_vm6, %v3012_v58  ;;  %v14896_v32 = vpop.trf.xlu1  ;;  %v2845_v54 = vcombine.high %v2837_v62, %v2837_v62  ;;  %v3065_v17 = vcombine.low %v2860_v23, %v2869_v28  ;;  %v2877_v59 = vcombine.high %v2869_v28, %v2869_v28  ;;  %v3029_v2 = vcombine.low %v3021_v12, %v3028_v57 }
 0x2b3   : > { %v14900_v35 = vunpack.i.h.bf16 %v14896_v32  ;;  %v3046_v14 = vcombine.low %v3038_v43, %v3045_v10  ;;  %v14897_v30 = vunpack.i.l.bf16 %v14896_v32  ;;  %v3047_v3 = vcombine.low %v2828_v37, %v2837_v62  ;;  %13366 = vmatpush3.bf16.msra.mxu0 %v4725_v9  ;;  %14154 = vmatpush3.bf16.msra.mxu1 %v4725_v9 }
 0x2b4   : > { %v3079_v15 = vrot.slane %v3065_v17, %v16040_v1  ;;  %v3048_v49 = vcombine.low %v2845_v54, %v2844_v21  ;;  %13353 = vmatprep.mubr.msk.bf16.mxu1 %vm642_vm6, %v3029_v2  ;;  %v3064_v0 = vcombine.low %v2853_v51, %v2861_v24  ;;  %v3081_v25 = vcombine.low %v2877_v59, %v2876_v31 }
 0x2b5   : > { %v12258_v11 = vpack.c.bf16 %v14900_v35, %v14900_v35  ;;  %v2637_v44 = vpack.c.bf16 %v14900_v35, %v14895_v29  ;;  %v2636_v16 = vpack.c.bf16 %v14897_v30, %v14892_v34  ;;  %v12257_v39 = vpack.c.bf16 %v14897_v30, %v14897_v30 }
 0x2b6   : > { %v3055_v38 = vrot.slane %v3047_v3, %v16040_v1  ;;  %v3062_v56 = vrot.slane %v3048_v49, %v16040_v1  ;;  %v3072_v40 = vrot.slane %v3064_v0, %v16040_v1  ;;  %v3089_v27 = vrot.slane %v3081_v25, %v16040_v1 }
 0x2b7   : > { %v2901_v63 = vrot.slane %v2637_v44, %v16040_v1  ;;  %v2908_v6 = vrot.slane %v12258_v11, %v16040_v1  ;;  %v2885_v61 = vrot.slane %v2636_v16, %v16040_v1  ;;  %v2892_v58 = vrot.slane %v12257_v39, %v16040_v1 }
 0x2b8   : > { %v3063_v4 = vcombine.low %v3055_v38, %v3062_v56  ;;  %v3080_v33 = vcombine.low %v3072_v40, %v3079_v15  ;;  %v15278_v23 = vmov 1934713408  }
 0x2b9   : > { %v2909_v19 = vcombine.high %v2901_v63, %v2901_v63  ;;  %v2893_v20 = vcombine.high %v2885_v61, %v2885_v61  ;;  %v3098_v13 = vcombine.low %v2892_v58, %v2901_v63  ;;  %v3374_v60 = vunpack.c.l.s4 %v15278_v23 }
 0x2ba   : > { %13354 = vmatmul.mubr.msk.bf16.gmra.mrb[12].mxu1 %vm642_vm6, %v3046_v14 }
 0x2bb   : > { %13357 = vmatprep.mubr.msk.bf16.mxu1 %vm642_vm6, %v3063_v4  ;;  %v3082_v37 = vcombine.low %v2885_v61, %v2893_v20  ;;  %v3099_v45 = vcombine.low %v2909_v19, %v2908_v6  ;;  %v3106_v18 = vrot.slane %v3098_v13, %v16040_v1  ;;  %v3375_v24 = vunpack.c.0.s8 %v3374_v60 }
 0x2bd   : > { %v3096_v36 = vrot.slane %v3082_v37, %v16040_v1  ;;  %v3113_v42 = vrot.slane %v3099_v45, %v16040_v1  ;;  %v16123_v15 = vsub.s32 %v3375_v24, %v16037_v5 }
 0x2bf   : > { %v3097_v46 = vcombine.low %v3089_v27, %v3096_v36  ;;  %v3114_v7 = vcombine.low %v3106_v18, %v3113_v42 }
 0x2c2   : > { %13358 = vmatmul.mubr.msk.bf16.gmra.mrb[16].mxu1 %vm642_vm6, %v3080_v33 }
 0x2c3   : > { %13361 = vmatprep.mubr.msk.bf16.mxu1 %vm642_vm6, %v3097_v46 }
 0x2ca   : > { %13362 = vmatmul.mubr.msk.bf16.gmra.mrb[20].mxu1 %vm642_vm6, %v3114_v7 }
 0x375   : > { %v13343_v53 = vpop.f32.mrb[0].mxu1 }
 0x376   : > { %v3188_v26 = vpop.f32.mrb[1].mxu1 }
 0x377   : > { %v13344_v52 = vpop.f32.mrb[2].mxu1 }
 0x378   : > { %v3355_v47 = vcombine.low %v3188_v26, %v13344_v52  ;;  %v12273_v10 = vcombine.high %v3188_v26, %v13344_v52  ;;  %v3191_v22 = vpop.f32.mrb[3].mxu1 }
 0x37a   : > { %v3362_v21 = vrot.slane %v3355_v47, %v16040_v1  ;;  %v3430_v32 = vrot.slane %v12273_v10, %v16040_v1 }
 0x37d   : > { %v13347_v55 = vpop.f32.mrb[4].mxu1 }
 0x37e   : > { %v3204_v51 = vpop.f32.mrb[5].mxu1 }
 0x37f   : > { %v12271_v62 = vcombine.high %v3191_v22, %v3204_v51  ;;  %v3491_v29 = vcombine.low %v3191_v22, %v3204_v51  ;;  %v13348_v34 = vpop.f32.mrb[6].mxu1 }
 0x380   : > { %v3207_v28 = vpop.f32.mrb[7].mxu1 }
 0x381   : > { %v3370_v8 = vrot.slane %v12271_v62, %v16040_v1  ;;  %v3431_v41 = vcombine.low %v13343_v53, %v3207_v28  ;;  %v12275_v48 = vcombine.high %v13343_v53, %v3207_v28  ;;  %v3498_v54 = vrot.slane %v3491_v29, %v16040_v1 }
 0x383   : > { %v3371_v17 = vcombine.low %v3362_v21, %v3370_v8  ;;  %v3372_v35 = vcombine.high %v3362_v21, %v3370_v8  ;;  %v3438_v12 = vrot.slane %v3431_v41, %v16040_v1  ;;  %v3506_v57 = vrot.slane %v12275_v48, %v16040_v1 }
 0x385   : > { %v3439_v43 = vcombine.low %v3430_v32, %v3438_v12  ;;  %v3440_v31 = vcombine.high %v3430_v32, %v3438_v12  ;;  %v3507_v59 = vcombine.low %v3498_v54, %v3506_v57  ;;  %v3508_v11 = vcombine.high %v3498_v54, %v3506_v57  ;;  %v13351_v2 = vpop.f32.mrb[8].mxu1 }
 0x386   : > { %v12272_v14 = vcombine.high %v13348_v34, %v13351_v2  ;;  %v3525_v30 = vcombine.low %v13348_v34, %v13351_v2  ;;  %v3220_v44 = vpop.f32.mrb[9].mxu1  ;;  %v3386_v56 = vrot.slane %v3372_v35, %v16123_v15  ;;  %v3379_v19 = vrot.slane %v3371_v17, %v16123_v15 }
 0x387   : > { %v13352_v3 = vpop.f32.mrb[10].mxu1  ;;  %v3454_v20 = vrot.slane %v3440_v31, %v16123_v15  ;;  %v3447_v27 = vrot.slane %v3439_v43, %v16123_v15  ;;  %v3522_v46 = vrot.slane %v3508_v11, %v16123_v15  ;;  %v3515_v42 = vrot.slane %v3507_v59, %v16123_v15 }
 0x388   : > { %v3465_v49 = vcombine.low %v3220_v44, %v13352_v3  ;;  %v12276_v16 = vcombine.high %v3220_v44, %v13352_v3  ;;  %v3223_v39 = vpop.f32.mrb[11].mxu1  ;;  %v3532_v25 = vrot.slane %v3525_v30, %v16040_v1  ;;  %v3404_v61 = vrot.slane %v12272_v14, %v16040_v1 }
 0x389   : > { %v3389_v63 = vcombine.low %v13347_v55, %v3223_v39  ;;  %v12274_v0 = vcombine.high %v13347_v55, %v3223_v39 }
 0x38a   : > { %v3472_v6 = vrot.slane %v3465_v49, %v16040_v1  ;;  %v3540_v38 = vrot.slane %v12276_v16, %v16040_v1 }
 0x38b   : > { %v3396_v58 = vrot.slane %v3389_v63, %v16040_v1  ;;  %v3464_v5 = vrot.slane %v12274_v0, %v16040_v1 }
 0x38c   : > { %v3541_v40 = vcombine.low %v3532_v25, %v3540_v38  ;;  %v3542_v4 = vcombine.high %v3532_v25, %v3540_v38 }
 0x38d   : > { %v3405_v33 = vcombine.low %v3396_v58, %v3404_v61  ;;  %v3406_v37 = vcombine.high %v3396_v58, %v3404_v61  ;;  %v3473_v13 = vcombine.low %v3464_v5, %v3472_v6  ;;  %v3474_v45 = vcombine.high %v3464_v5, %v3472_v6  ;;  %v13355_v36 = vpop.f32.mrb[12].mxu1 }
 0x38e   : > { %v3556_v18 = vrot.slane %v3542_v4, %v16123_v15  ;;  %v3549_v7 = vrot.slane %v3541_v40, %v16123_v15  ;;  %v3236_v50 = vpop.f32.mrb[13].mxu1 }
 0x38f   : > { %v3420_v9 = vrot.slane %v3406_v37, %v16123_v15  ;;  %v3413_v53 = vrot.slane %v3405_v33, %v16123_v15  ;;  %v3488_v26 = vrot.slane %v3474_v45, %v16123_v15  ;;  %v3481_v52 = vrot.slane %v3473_v13, %v16123_v15  ;;  %v13356_v47 = vpop.f32.mrb[14].mxu1 }
 0x390   : > { %v3821_v10 = vcombine.low %v3522_v46, %v3556_v18  ;;  %v12288_v22 = vcombine.high %v3522_v46, %v3556_v18  ;;  %v3819_v55 = vcombine.low %v3515_v42, %v3549_v7  ;;  %v12287_v51 = vcombine.high %v3515_v42, %v3549_v7  ;;  %v3239_v23 = vpop.f32.mrb[15].mxu1 }
 0x391   : > { %v3813_v60 = vcombine.low %v3386_v56, %v3420_v9  ;;  %v12284_v62 = vcombine.high %v3386_v56, %v3420_v9  ;;  %v3811_v29 = vcombine.low %v3379_v19, %v3413_v53  ;;  %v12283_v34 = vcombine.high %v3379_v19, %v3413_v53 }
 0x392   : > { %v3817_v28 = vcombine.low %v3454_v20, %v3488_v26  ;;  %v12286_v21 = vcombine.high %v3454_v20, %v3488_v26  ;;  %v3815_v8 = vcombine.low %v3447_v27, %v3481_v52  ;;  %v12285_v41 = vcombine.high %v3447_v27, %v3481_v52 }
 0x393   : > { %v14913_v48 = vpack.i.bf16 %v12284_v62, %v3813_v60  ;;  %v14901_v32 = vpack.i.bf16 %v12283_v34, %v3811_v29  ;;  %v14961_v54 = vpack.i.bf16 %v12288_v22, %v3821_v10  ;;  %v14949_v24 = vpack.i.bf16 %v12287_v51, %v3819_v55 }
 0x394   : > { %v14937_v17 = vpack.i.bf16 %v12286_v21, %v3817_v28  ;;  %v14925_v35 = vpack.i.bf16 %v12285_v41, %v3815_v8  ;;  %v3559_v12 = vcombine.low %v3236_v50, %v13356_v47  ;;  %v12279_v57 = vcombine.high %v3236_v50, %v13356_v47 }
 0x395   : > { %14914 = vxpose.xlu1.b32.start.end [1/1] (short) (narrow) %v14913_v48, 16  ;;  %14902 = vxpose.xlu0.b32.start.end [1/1] (short) (narrow) %v14901_v32, 16  ;;  %v13359_v43 = vpop.f32.mrb[16].mxu1 }
 0x396   : > { %v3252_v31 = vpop.f32.mrb[17].mxu1  ;;  %v3566_v59 = vrot.slane %v3559_v12, %v16040_v1  ;;  %v3634_v30 = vrot.slane %v12279_v57, %v16040_v1 }
 0x397   : > { %v12277_v11 = vcombine.high %v3239_v23, %v3252_v31  ;;  %v3695_v2 = vcombine.low %v3239_v23, %v3252_v31  ;;  %v13360_v14 = vpop.f32.mrb[18].mxu1 }
 0x398   : > { %v3255_v44 = vpop.f32.mrb[19].mxu1 }
 0x399   : > { %v3574_v3 = vrot.slane %v12277_v11, %v16040_v1  ;;  %v3702_v49 = vrot.slane %v3695_v2, %v16040_v1  ;;  %v3635_v16 = vcombine.low %v13355_v36, %v3255_v44  ;;  %v12281_v39 = vcombine.high %v13355_v36, %v3255_v44 }
 0x39a   : > { %14938 = vxpose.xlu1.b32.start.end [1/1] (short) (narrow) %v14937_v17, 16  ;;  %14926 = vxpose.xlu0.b32.start.end [1/1] (short) (narrow) %v14925_v35, 16 }
 0x39b   : > { %v3575_v63 = vcombine.low %v3566_v59, %v3574_v3  ;;  %v3576_v0 = vcombine.high %v3566_v59, %v3574_v3  ;;  %v3642_v25 = vrot.slane %v3635_v16, %v16040_v1  ;;  %v3710_v6 = vrot.slane %v12281_v39, %v16040_v1 }
 0x39d   : > { %v3643_v38 = vcombine.low %v3634_v30, %v3642_v25  ;;  %v3644_v56 = vcombine.high %v3634_v30, %v3642_v25  ;;  %v3711_v61 = vcombine.low %v3702_v49, %v3710_v6  ;;  %v3712_v58 = vcombine.high %v3702_v49, %v3710_v6  ;;  %v13363_v5 = vpop.f32.mrb[20].mxu1 }
 0x39e   : > { %v12278_v19 = vcombine.high %v13360_v14, %v13363_v5  ;;  %v3729_v40 = vcombine.low %v13360_v14, %v13363_v5  ;;  %v3268_v4 = vpop.f32.mrb[21].mxu1  ;;  %v3590_v53 = vrot.slane %v3576_v0, %v16123_v15  ;;  %v3583_v34 = vrot.slane %v3575_v63, %v16123_v15 }
 0x39f   : > { %14962 = vxpose.xlu1.b32.start.end [1/1] (short) (narrow) %v14961_v54, 16  ;;  %14950 = vxpose.xlu0.b32.start.end [1/1] (short) (narrow) %v14949_v24, 16  ;;  %v13364_v20 = vpop.f32.mrb[22].mxu1  ;;  %v3651_v9 = vrot.slane %v3643_v38, %v16123_v15  ;;  %v3719_v47 = vrot.slane %v3711_v61, %v16123_v15  ;;  %v3726_v10 = vrot.slane %v3712_v58, %v16123_v15 }
 0x3a0   : > { %v3736_v27 = vrot.slane %v3729_v40, %v16040_v1  ;;  %v3669_v33 = vcombine.low %v3268_v4, %v13364_v20  ;;  %v12282_v37 = vcombine.high %v3268_v4, %v13364_v20  ;;  %v3271_v13 = vpop.f32.mrb[23].mxu1  ;;  %v3608_v45 = vrot.slane %v12278_v19, %v16040_v1 }
 0x3a1   : > { %v3593_v36 = vcombine.low %v13359_v43, %v3271_v13  ;;  %v12280_v46 = vcombine.high %v13359_v43, %v3271_v13  ;;  %v3658_v62 = vrot.slane %v3644_v56, %v16123_v15 }
 0x3a2   : > { %v3676_v18 = vrot.slane %v3669_v33, %v16040_v1  ;;  %v3744_v42 = vrot.slane %v12282_v37, %v16040_v1 }
 0x3a3   : > { %v3600_v7 = vrot.slane %v3593_v36, %v16040_v1  ;;  %v3668_v50 = vrot.slane %v12280_v46, %v16040_v1 }
 0x3a4   : > { %v3745_v26 = vcombine.low %v3736_v27, %v3744_v42  ;;  %v3746_v52 = vcombine.high %v3736_v27, %v3744_v42 }
 0x3a5   : > { %v3609_v22 = vcombine.low %v3600_v7, %v3608_v45  ;;  %v3610_v55 = vcombine.high %v3600_v7, %v3608_v45  ;;  %v3677_v51 = vcombine.low %v3668_v50, %v3676_v18  ;;  %v3678_v23 = vcombine.high %v3668_v50, %v3676_v18 }
 0x3a6   : > { %v3753_v60 = vrot.slane %v3745_v26, %v16123_v15  ;;  %v3760_v29 = vrot.slane %v3746_v52, %v16123_v15 }
 0x3a7   : > { %v3685_v28 = vrot.slane %v3677_v51, %v16123_v15  ;;  %v3624_v21 = vrot.slane %v3610_v55, %v16123_v15  ;;  %v3692_v8 = vrot.slane %v3678_v23, %v16123_v15  ;;  %v3617_v41 = vrot.slane %v3609_v22, %v16123_v15 }
 0x3a8   : > { %v3831_v48 = vcombine.low %v3719_v47, %v3753_v60  ;;  %v12293_v32 = vcombine.high %v3719_v47, %v3753_v60  ;;  %v3833_v54 = vcombine.low %v3726_v10, %v3760_v29  ;;  %v12294_v24 = vcombine.high %v3726_v10, %v3760_v29 }
 0x3a9   : > { %v3827_v17 = vcombine.low %v3651_v9, %v3685_v28  ;;  %v12291_v35 = vcombine.high %v3651_v9, %v3685_v28  ;;  %v3825_v12 = vcombine.low %v3590_v53, %v3624_v21  ;;  %v12290_v57 = vcombine.high %v3590_v53, %v3624_v21 }
 0x3aa   : > { %v15009_v43 = vpack.i.bf16 %v12293_v32, %v3831_v48  ;;  %v3829_v31 = vcombine.low %v3658_v62, %v3692_v8  ;;  %v12292_v59 = vcombine.high %v3658_v62, %v3692_v8  ;;  %v15033_v11 = vpack.i.bf16 %v12294_v24, %v3833_v54 }
 0x3ab   : > { %v14985_v2 = vpack.i.bf16 %v12291_v35, %v3827_v17  ;;  %v14973_v14 = vpack.i.bf16 %v12290_v57, %v3825_v12  ;;  %v3823_v30 = vcombine.low %v3583_v34, %v3617_v41  ;;  %v12289_v44 = vcombine.high %v3583_v34, %v3617_v41 }
 0x3ac   : > { %v14997_v3 = vpack.i.bf16 %v12292_v59, %v3829_v31 }
 0x3ad   : > { %14986 = vxpose.xlu1.b32.start.end [1/1] (short) (narrow) %v14985_v2, 16  ;;  %14974 = vxpose.xlu0.b32.start.end [1/1] (short) (narrow) %v14973_v14, 16  ;;  %v15021_v49 = vpack.i.bf16 %v12289_v44, %v3823_v30 }
 0x3b2   : > { %15010 = vxpose.xlu1.b32.start.end [1/1] (short) (narrow) %v15009_v43, 16  ;;  %14998 = vxpose.xlu0.b32.start.end [1/1] (short) (narrow) %v14997_v3, 16 }
 0x3b7   : > { %15034 = vxpose.xlu1.b32.start.end [1/1] (short) (narrow) %v15033_v11, 16  ;;  %15022 = vxpose.xlu0.b32.start.end [1/1] (short) (narrow) %v15021_v49, 16 }
 0x415   : > { %v14903_v16 = vpop.trf.xlu0  ;;  %v14915_v39 = vpop.trf.xlu1 }
 0x416   : > { %v14907_v63 = vunpack.i.h.bf16 %v14903_v16  ;;  %v14904_v0 = vunpack.i.l.bf16 %v14903_v16  ;;  %v14916_v25 = vunpack.i.l.bf16 %v14915_v39  ;;  %v14919_v33 = vunpack.i.h.bf16 %v14915_v39 }
 0x419   : > { %v14908_v6 = vpop.trf.xlu0  ;;  %v14920_v38 = vpop.trf.xlu1 }
 0x41a   : > { %v14912_v56 = vunpack.i.h.bf16 %v14908_v6  ;;  %v14909_v61 = vunpack.i.l.bf16 %v14908_v6  ;;  %v14921_v58 = vunpack.i.l.bf16 %v14920_v38  ;;  %v14924_v37 = vunpack.i.h.bf16 %v14920_v38 }
 0x41c   : > { %v4628_v5 = vpack.c.bf16 %v14912_v56, %v14907_v63  ;;  %v4627_v19 = vpack.c.bf16 %v14909_v61, %v14904_v0  ;;  %v4629_v4 = vpack.c.bf16 %v14921_v58, %v14916_v25  ;;  %v4630_v18 = vpack.c.bf16 %v14924_v37, %v14919_v33 }
 0x41d   : > { %v14927_v40 = vpop.trf.xlu0  ;;  %v14939_v20 = vpop.trf.xlu1 }
 0x41e   : > { %13367 = vmatprep.mubr.msk.bf16.mxu0 %vm642_vm6, %v4627_v19  ;;  %v14928_v27 = vunpack.i.l.bf16 %v14927_v40  ;;  %v14940_v50 = vunpack.i.l.bf16 %v14939_v20  ;;  %v14931_v53 = vunpack.i.h.bf16 %v14927_v40  ;;  %v14943_v34 = vunpack.i.h.bf16 %v14939_v20 }
 0x41f   : > { %13368 = vmatmul.mubr.msk.bf16.vlgmr.msra.gmra.mrb[16].mxu0 %vm642_vm6, %v4628_v5 }
 0x420   : > { %13371 = vmatprep.mubr.msk.bf16.mxu0 %vm642_vm6, %v4629_v4 }
 0x421   : > { %v14932_v13 = vpop.trf.xlu0  ;;  %v14944_v45 = vpop.trf.xlu1 }
 0x422   : > { %v14933_v36 = vunpack.i.l.bf16 %v14932_v13  ;;  %v14945_v9 = vunpack.i.l.bf16 %v14944_v45  ;;  %v14936_v26 = vunpack.i.h.bf16 %v14932_v13  ;;  %v14948_v28 = vunpack.i.h.bf16 %v14944_v45 }
 0x424   : > { %v4631_v46 = vpack.c.bf16 %v14933_v36, %v14928_v27  ;;  %v4633_v10 = vpack.c.bf16 %v14945_v9, %v14940_v50  ;;  %v4632_v22 = vpack.c.bf16 %v14936_v26, %v14931_v53  ;;  %v4634_v12 = vpack.c.bf16 %v14948_v28, %v14943_v34 }
 0x425   : > { %v14951_v42 = vpop.trf.xlu0  ;;  %v16170_v7 = vpop.trf.xlu1 }
 0x426   : > { %v14952_v23 = vunpack.i.l.bf16 %v14951_v42  ;;  %v14964_v2 = vunpack.i.l.bf16 %v16170_v7  ;;  %v14955_v44 = vunpack.i.h.bf16 %v14951_v42  ;;  %v14967_v4 = vunpack.i.h.bf16 %v16170_v7 }
 0x427   : > { %13372 = vmatmul.mubr.msk.bf16.gmra.mrb[20].mxu0 %vm642_vm6, %v4630_v18 }
 0x428   : > { %13375 = vmatprep.mubr.msk.bf16.mxu0 %vm642_vm6, %v4631_v46 }
 0x429   : > { %v14956_v52 = vpop.trf.xlu0  ;;  %v16174_v47 = vpop.trf.xlu1 }
 0x42a   : > { %v14957_v60 = vunpack.i.l.bf16 %v14956_v52  ;;  %v14969_v14 = vunpack.i.l.bf16 %v16174_v47  ;;  %v14960_v3 = vunpack.i.h.bf16 %v14956_v52  ;;  %v14972_v20 = vunpack.i.h.bf16 %v16174_v47 }
 0x42c   : > { %v4635_v24 = vpack.c.bf16 %v14957_v60, %v14952_v23  ;;  %v4637_v0 = vpack.c.bf16 %v14969_v14, %v14964_v2  ;;  %v4636_v6 = vpack.c.bf16 %v14960_v3, %v14955_v44  ;;  %v4638_v46 = vpack.c.bf16 %v14972_v20, %v14967_v4 }
 0x42d   : > { %v14975_v55 = vpop.trf.xlu0  ;;  %v14987_v51 = vpop.trf.xlu1 }
 0x42e   : > { %v14979_v62 = vunpack.i.h.bf16 %v14975_v55  ;;  %v14976_v29 = vunpack.i.l.bf16 %v14975_v55  ;;  %v14988_v8 = vunpack.i.l.bf16 %v14987_v51  ;;  %v14991_v59 = vunpack.i.h.bf16 %v14987_v51  ;;  %v15259_v51 = vld [vmem:[%s18456_s5 + $0x18] sm:$0x3f]  }
 0x42f   : > { %13376 = vmatmul.mubr.msk.bf16.gmra.mrb[24].mxu0 %vm642_vm6, %v4632_v22  ;;  %14810 = vmatprep.subr.msk.bf16.mxu1 %vm7310_vm8, %v15259_v51  ;;  %v8705_v23 = vsel %vm7310_vm8, %v15259_v51, 0 }
 0x430   : > { %13379 = vmatprep.mubr.msk.bf16.mxu0 %vm642_vm6, %v4633_v10 }
 0x431   : > { %v14980_v21 = vpop.trf.xlu0  ;;  %v14992_v41 = vpop.trf.xlu1 }
 0x432   : > { %v14984_v48 = vunpack.i.h.bf16 %v14980_v21  ;;  %v14981_v32 = vunpack.i.l.bf16 %v14980_v21  ;;  %v14993_v54 = vunpack.i.l.bf16 %v14992_v41  ;;  %v14996_v11 = vunpack.i.h.bf16 %v14992_v41 }
 0x434   : > { %v4642_v17 = vpack.c.bf16 %v14984_v48, %v14979_v62  ;;  %v4641_v35 = vpack.c.bf16 %v14981_v32, %v14976_v29  ;;  %v4643_v43 = vpack.c.bf16 %v14993_v54, %v14988_v8  ;;  %v4644_v63 = vpack.c.bf16 %v14996_v11, %v14991_v59 }
 0x435   : > { %v14999_v57 = vpop.trf.xlu0  ;;  %v15011_v31 = vpop.trf.xlu1 }
 0x436   : > { %13395 = vmatprep.mubr.msk.bf16.mxu1 %vm642_vm6, %v4641_v35  ;;  %v15000_v30 = vunpack.i.l.bf16 %v14999_v57  ;;  %v15003_v61 = vunpack.i.h.bf16 %v14999_v57  ;;  %v15012_v5 = vunpack.i.l.bf16 %v15011_v31  ;;  %v15015_v18 = vunpack.i.h.bf16 %v15011_v31 }
 0x437   : > { %13380 = vmatmul.mubr.msk.bf16.gmra.mrb[28].mxu0 %vm642_vm6, %v4634_v12  ;;  %13396 = vmatmul.mubr.msk.bf16.vlgmr.msra.gmra.mrb[24].mxu1 %vm642_vm6, %v4642_v17 }
 0x438   : > { %13383 = vmatprep.mubr.msk.bf16.mxu0 %vm642_vm6, %v4635_v24  ;;  %13399 = vmatprep.mubr.msk.bf16.mxu1 %vm642_vm6, %v4643_v43 }
 0x439   : > { %v15004_v49 = vpop.trf.xlu0  ;;  %v15016_v16 = vpop.trf.xlu1  ;;  %13614 = vmatpush3.bf16.msra.mxu1 %v8705_v23 }
 0x43a   : > { %v15005_v39 = vunpack.i.l.bf16 %v15004_v49  ;;  %v15008_v58 = vunpack.i.h.bf16 %v15004_v49  ;;  %v15017_v40 = vunpack.i.l.bf16 %v15016_v16  ;;  %v15020_v50 = vunpack.i.h.bf16 %v15016_v16 }
 0x43c   : > { %v4645_v25 = vpack.c.bf16 %v15005_v39, %v15000_v30  ;;  %v4646_v13 = vpack.c.bf16 %v15008_v58, %v15003_v61  ;;  %v4647_v36 = vpack.c.bf16 %v15017_v40, %v15012_v5  ;;  %v4648_v52 = vpack.c.bf16 %v15020_v50, %v15015_v18 }
 0x43d   : > { %v15023_v38 = vpop.trf.xlu0  ;;  %v15035_v56 = vpop.trf.xlu1 }
 0x43e   : > { %v15024_v19 = vunpack.i.l.bf16 %v15023_v38  ;;  %v15027_v42 = vunpack.i.h.bf16 %v15023_v38  ;;  %v15036_v53 = vunpack.i.l.bf16 %v15035_v56  ;;  %v15039_v10 = vunpack.i.h.bf16 %v15035_v56 }
 0x43f   : > { %13384 = vmatmul.mubr.msk.bf16.gmra.mrb[32].mxu0 %vm642_vm6, %v4636_v6  ;;  %13400 = vmatmul.mubr.msk.bf16.gmra.mrb[28].mxu1 %vm642_vm6, %v4644_v63 }
 0x440   : > { %13387 = vmatprep.mubr.msk.bf16.mxu0 %vm642_vm6, %v4637_v0  ;;  %13403 = vmatprep.mubr.msk.bf16.mxu1 %vm642_vm6, %v4645_v25 }
 0x441   : > { %v15028_v27 = vpop.trf.xlu0  ;;  %v15040_v37 = vpop.trf.xlu1 }
 0x442   : > { %v15029_v33 = vunpack.i.l.bf16 %v15028_v27  ;;  %v15032_v9 = vunpack.i.h.bf16 %v15028_v27  ;;  %v15041_v7 = vunpack.i.l.bf16 %v15040_v37  ;;  %v15044_v22 = vunpack.i.h.bf16 %v15040_v37 }
 0x444   : > { %v4639_v45 = vpack.c.bf16 %v15029_v33, %v15024_v19  ;;  %v4640_v26 = vpack.c.bf16 %v15032_v9, %v15027_v42  ;;  %v4649_v47 = vpack.c.bf16 %v15041_v7, %v15036_v53  ;;  %v4650_v55 = vpack.c.bf16 %v15044_v22, %v15039_v10 }
 0x447   : > { %13388 = vmatmul.mubr.msk.bf16.gmra.mrb[36].mxu0 %vm642_vm6, %v4638_v46  ;;  %13404 = vmatmul.mubr.msk.bf16.gmra.mrb[32].mxu1 %vm642_vm6, %v4646_v13 }
 0x448   : > { %13391 = vmatprep.mubr.msk.bf16.mxu0 %vm642_vm6, %v4639_v45  ;;  %13407 = vmatprep.mubr.msk.bf16.mxu1 %vm642_vm6, %v4647_v36 }
 0x44f   : > { %13392 = vmatmul.mubr.msk.bf16.gmra.mrb[40].mxu0 %vm642_vm6, %v4640_v26  ;;  %13408 = vmatmul.mubr.msk.bf16.gmra.mrb[36].mxu1 %vm642_vm6, %v4648_v52 }
 0x450   : > { %13411 = vmatprep.mubr.msk.bf16.mxu1 %vm642_vm6, %v4649_v47 }
 0x457   : > { %13412 = vmatmul.mubr.msk.bf16.gmra.mrb[40].mxu1 %vm642_vm6, %v4650_v55 }
 0x4f2   : > { %v13369_v60 = vpop.f32.mrb[16].mxu0 }
 0x4f3   : > { %v4761_v62 = vpop.f32.mrb[17].mxu0 }
 0x4f4   : > { %v13370_v29 = vpop.f32.mrb[18].mxu0 }
 0x4f5   : > { %v4764_v34 = vpop.f32.mrb[19].mxu0 }
 0x4fa   : > { %v13373_v28 = vpop.f32.mrb[20].mxu0 }
 0x4fb   : > { %v4968_v21 = vcombine.low %v13369_v60, %v13373_v28  ;;  %v4969_v8 = vcombine.high %v13369_v60, %v13373_v28  ;;  %v4777_v41 = vpop.f32.mrb[21].mxu0 }
 0x4fc   : > { %v4952_v48 = vcombine.low %v4761_v62, %v4777_v41  ;;  %v4953_v32 = vcombine.high %v4761_v62, %v4777_v41  ;;  %v13374_v54 = vpop.f32.mrb[22].mxu0 }
 0x4fd   : > { %v4976_v24 = vrot.slane %v4968_v21, %v16040_v1  ;;  %v4983_v17 = vrot.slane %v4969_v8, %v16040_v1  ;;  %v5172_v35 = vcombine.low %v13370_v29, %v13374_v54  ;;  %v5173_v12 = vcombine.high %v13370_v29, %v13374_v54  ;;  %v4780_v57 = vpop.f32.mrb[23].mxu0 }
 0x4fe   : > { %v4960_v43 = vrot.slane %v4952_v48, %v16040_v1  ;;  %v4967_v31 = vrot.slane %v4953_v32, %v16040_v1  ;;  %v5156_v59 = vcombine.low %v4764_v34, %v4780_v57  ;;  %v5157_v11 = vcombine.high %v4764_v34, %v4780_v57 }
 0x4ff   : > { %v5180_v2 = vrot.slane %v5172_v35, %v16040_v1  ;;  %v16210_v14 = vrot.slane %v5173_v12, %v16040_v1 }
 0x500   : > { %v5017_v30 = vcombine.high %v4960_v43, %v4976_v24  ;;  %v5032_v44 = vcombine.low %v4967_v31, %v4983_v17  ;;  %v5033_v3 = vcombine.high %v4967_v31, %v4983_v17  ;;  %v5164_v49 = vrot.slane %v5156_v59, %v16040_v1 }
 0x501   : > { %v16214_v16 = vrot.slane %v5157_v11, %v16040_v1  ;;  %v5016_v39 = vcombine.low %v4960_v43, %v4976_v24 }
 0x502   : > { %v5220_v63 = vcombine.low %v5164_v49, %v5180_v2  ;;  %v5221_v0 = vcombine.high %v5164_v49, %v5180_v2  ;;  %v13377_v25 = vpop.f32.mrb[24].mxu0  ;;  %v5031_v27 = vrot.slane %v5017_v30, %v16123_v15  ;;  %v5040_v46 = vrot.slane %v5032_v44, %v16123_v15 }
 0x503   : > { %v5236_v6 = vcombine.low %v16214_v16, %v16210_v14  ;;  %v5237_v38 = vcombine.high %v16214_v16, %v16210_v14  ;;  %v4793_v56 = vpop.f32.mrb[25].mxu0  ;;  %v5024_v36 = vrot.slane %v5016_v39, %v16123_v15  ;;  %v5047_v23 = vrot.slane %v5033_v3, %v16123_v15 }
 0x504   : > { %v13378_v61 = vpop.f32.mrb[26].mxu0  ;;  %v5228_v60 = vrot.slane %v5220_v63, %v16123_v15  ;;  %v16242_v41 = vrot.slane %v5221_v0, %v16123_v15 }
 0x505   : > { %v4796_v58 = vpop.f32.mrb[27].mxu0  ;;  %v16245_v48 = vrot.slane %v5236_v6, %v16123_v15 }
 0x50a   : > { %v13381_v5 = vpop.f32.mrb[28].mxu0  ;;  %v16220_v19 = vpop.f32.mrb[24].mxu1 }
 0x50b   : > { %v5000_v40 = vcombine.low %v13377_v25, %v13381_v5  ;;  %v5001_v4 = vcombine.high %v13377_v25, %v13381_v5  ;;  %v4809_v20 = vpop.f32.mrb[29].mxu0  ;;  %v16223_v33 = vpop.f32.mrb[25].mxu1 }
 0x50c   : > { %v4984_v37 = vcombine.low %v4793_v56, %v4809_v20  ;;  %v4985_v13 = vcombine.high %v4793_v56, %v4809_v20  ;;  %v13382_v45 = vpop.f32.mrb[30].mxu0  ;;  %v16227_v18 = vpop.f32.mrb[26].mxu1 }
 0x50d   : > { %v5008_v42 = vrot.slane %v5000_v40, %v16040_v1  ;;  %v5015_v50 = vrot.slane %v5001_v4, %v16040_v1  ;;  %v5204_v9 = vcombine.low %v13378_v61, %v13382_v45  ;;  %v5205_v53 = vcombine.high %v13378_v61, %v13382_v45  ;;  %v4812_v7 = vpop.f32.mrb[31].mxu0  ;;  %v16231_v26 = vpop.f32.mrb[27].mxu1 }
 0x50e   : > { %v4992_v52 = vrot.slane %v4984_v37, %v16040_v1  ;;  %v4999_v47 = vrot.slane %v4985_v13, %v16040_v1  ;;  %v5188_v10 = vcombine.low %v4796_v58, %v4812_v7  ;;  %v5189_v22 = vcombine.high %v4796_v58, %v4812_v7 }
 0x50f   : > { %v5212_v55 = vrot.slane %v5204_v9, %v16040_v1  ;;  %v5219_v51 = vrot.slane %v5205_v53, %v16040_v1  ;;  %v16274_v13 = vrot.slane %v5237_v38, %v16123_v15 }
 0x510   : > { %v5049_v62 = vcombine.high %v4992_v52, %v5008_v42  ;;  %v5064_v29 = vcombine.low %v4999_v47, %v5015_v50  ;;  %v5065_v34 = vcombine.high %v4999_v47, %v5015_v50  ;;  %v5196_v28 = vrot.slane %v5188_v10, %v16040_v1 }
 0x511   : > { %v5203_v21 = vrot.slane %v5189_v22, %v16040_v1  ;;  %v5048_v8 = vcombine.low %v4992_v52, %v5008_v42 }
 0x512   : > { %v5252_v32 = vcombine.low %v5196_v28, %v5212_v55  ;;  %v5253_v54 = vcombine.high %v5196_v28, %v5212_v55  ;;  %v13385_v24 = vpop.f32.mrb[32].mxu0  ;;  %v5063_v17 = vrot.slane %v5049_v62, %v16123_v15  ;;  %v5072_v35 = vrot.slane %v5064_v29, %v16123_v15  ;;  %v16249_v12 = vpop.f32.mrb[28].mxu1 }
 0x513   : > { %v5268_v57 = vcombine.low %v5203_v21, %v5219_v51  ;;  %v5269_v43 = vcombine.high %v5203_v21, %v5219_v51  ;;  %v4825_v31 = vpop.f32.mrb[33].mxu0  ;;  %v5056_v59 = vrot.slane %v5048_v8, %v16123_v15  ;;  %v5079_v11 = vrot.slane %v5065_v34, %v16123_v15  ;;  %v16253_v2 = vpop.f32.mrb[29].mxu1 }
 0x514   : > { %v13386_v30 = vpop.f32.mrb[34].mxu0  ;;  %v5082_v44 = vcombine.low %v5031_v27, %v5063_v17  ;;  %v5083_v3 = vcombine.high %v5031_v27, %v5063_v17  ;;  %v5084_v49 = vcombine.low %v5040_v46, %v5072_v35  ;;  %v5085_v39 = vcombine.high %v5040_v46, %v5072_v35  ;;  %v16255_v63 = vpop.f32.mrb[30].mxu1 }
 0x515   : > { %v4828_v0 = vpop.f32.mrb[35].mxu0  ;;  %v5080_v25 = vcombine.low %v5024_v36, %v5056_v59  ;;  %v5081_v6 = vcombine.high %v5024_v36, %v5056_v59  ;;  %v5086_v56 = vcombine.low %v5047_v23, %v5079_v11  ;;  %v5087_v61 = vcombine.high %v5047_v23, %v5079_v11  ;;  %v16257_v58 = vpop.f32.mrb[31].mxu1 }
 0x516   : > { %v16259_v5 = vpack.i.bf16 %v5084_v49, %v5083_v3  ;;  %v5260_v40 = vrot.slane %v5252_v32, %v16123_v15  ;;  %v16263_v4 = vrot.slane %v5253_v54, %v16123_v15  ;;  %v16266_v20 = vrot.slane %v5268_v57, %v16123_v15 }
 0x517   : > { %5768 = vxpose.xlu0.b32.start [1/2] (short) (narrow) %v5080_v25, 16  ;;  %v15045_v27 = vpack.i.bf16 %v5082_v44, %v5081_v6  ;;  %v16268_v37 = vpack.i.bf16 %v5086_v56, %v5085_v39  ;;  %v16277_v45 = vrot.slane %v5269_v43, %v16123_v15 }
 0x518   : > { %v5284_v36 = vcombine.low %v5228_v60, %v5260_v40  ;;  %v5285_v46 = vcombine.high %v5228_v60, %v5260_v40  ;;  %v5286_v42 = vcombine.low %v16242_v41, %v16263_v4  ;;  %v5287_v50 = vcombine.high %v16242_v41, %v16263_v4 }
 0x519   : > { %15046 = vxpose.xlu1.b32.start [1/2] (short) (narrow) %v15045_v27, 16  ;;  %v5288_v9 = vcombine.low %v16245_v48, %v16266_v20  ;;  %v5289_v14 = vcombine.high %v16245_v48, %v16266_v20  ;;  %v5290_v16 = vcombine.low %v16274_v13, %v16277_v45 }
 0x51a   : > { %v13389_v53 = vpop.f32.mrb[36].mxu0  ;;  %v16291_v7 = vpack.i.bf16 %v5284_v36, %v5087_v61  ;;  %v13405_v52 = vpop.f32.mrb[32].mxu1  ;;  %v16293_v47 = vpack.i.bf16 %v5286_v42, %v5285_v46 }
 0x51b   : > { %v5104_v10 = vcombine.low %v13385_v24, %v13389_v53  ;;  %v5105_v22 = vcombine.high %v13385_v24, %v13389_v53  ;;  %v4841_v55 = vpop.f32.mrb[37].mxu0  ;;  %v5408_v51 = vcombine.low %v16249_v12, %v13405_v52  ;;  %v5409_v23 = vcombine.high %v16249_v12, %v13405_v52  ;;  %v4905_v60 = vpop.f32.mrb[33].mxu1 }
 0x51c   : > { %v5088_v62 = vcombine.low %v4825_v31, %v4841_v55  ;;  %v5089_v29 = vcombine.high %v4825_v31, %v4841_v55  ;;  %v13390_v34 = vpop.f32.mrb[38].mxu0  ;;  %v5392_v28 = vcombine.low %v16253_v2, %v4905_v60  ;;  %v5393_v21 = vcombine.high %v16253_v2, %v4905_v60  ;;  %v16299_v8 = vpop.f32.mrb[34].mxu1 }
 0x51d   : > { %v5112_v32 = vrot.slane %v5104_v10, %v16040_v1  ;;  %v5119_v54 = vrot.slane %v5105_v22, %v16040_v1  ;;  %v5308_v24 = vcombine.low %v13386_v30, %v13390_v34  ;;  %v5309_v17 = vcombine.high %v13386_v30, %v13390_v34  ;;  %v4844_v35 = vpop.f32.mrb[39].mxu0  ;;  %v16303_v57 = vpop.f32.mrb[35].mxu1 }
 0x51e   : > { %v5096_v12 = vrot.slane %v5088_v62, %v16040_v1  ;;  %v5103_v43 = vrot.slane %v5089_v29, %v16040_v1  ;;  %v5292_v31 = vcombine.low %v4828_v0, %v4844_v35  ;;  %v5293_v59 = vcombine.high %v4828_v0, %v4844_v35 }
 0x51f   : > { %v16308_v11 = vrot.slane %v5308_v24, %v16040_v1  ;;  %v16311_v2 = vrot.slane %v5309_v17, %v16040_v1  ;;  %v16314_v44 = vrot.slane %v5408_v51, %v16040_v1  ;;  %v16317_v30 = vrot.slane %v5409_v23, %v16040_v1 }
 0x520   : > { %v5120_v3 = vcombine.low %v5096_v12, %v5112_v32  ;;  %v5121_v49 = vcombine.high %v5096_v12, %v5112_v32  ;;  %v5136_v39 = vcombine.low %v5103_v43, %v5119_v54  ;;  %v5137_v25 = vcombine.high %v5103_v43, %v5119_v54 }
 0x521   : > { %v16320_v6 = vrot.slane %v5292_v31, %v16040_v1  ;;  %v16323_v0 = vrot.slane %v5293_v59, %v16040_v1  ;;  %v16326_v56 = vrot.slane %v5392_v28, %v16040_v1  ;;  %v16329_v61 = vrot.slane %v5393_v21, %v16040_v1 }
 0x522   : > { %v5128_v40 = vrot.slane %v5120_v3, %v16123_v15  ;;  %v5135_v27 = vrot.slane %v5121_v49, %v16123_v15  ;;  %v5144_v36 = vrot.slane %v5136_v39, %v16123_v15  ;;  %v16335_v46 = vrot.slane %v5137_v25, %v16123_v15  ;;  %v13393_v42 = vpop.f32.mrb[40].mxu0  ;;  %v16337_v53 = vpop.f32.mrb[36].mxu1 }
 0x523   : > { %v5324_v52 = vcombine.low %v16320_v6, %v16308_v11  ;;  %v5325_v10 = vcombine.high %v16320_v6, %v16308_v11  ;;  %v5340_v22 = vcombine.low %v16323_v0, %v16311_v2  ;;  %v5341_v55 = vcombine.high %v16323_v0, %v16311_v2  ;;  %v4857_v51 = vpop.f32.mrb[41].mxu0  ;;  %v16347_v23 = vpop.f32.mrb[37].mxu1 }
 0x524   : > { %5769 = vxpose.xlu0.b32.end [2/2] (short) (narrow) %v5128_v40, 16  ;;  %v15279_v60 = vmov 0.0   ;;  %v5376_v28 = vcombine.low %v13393_v42, %v16220_v19  ;;  %v13394_v21 = vpop.f32.mrb[42].mxu0  ;;  %v16353_v32 = vpop.f32.mrb[38].mxu1  ;;  %v5377_v54 = vcombine.high %v13393_v42, %v16220_v19  ;;  %v5360_v24 = vcombine.low %v4857_v51, %v16223_v33 }
 0x525   : > { %v5152_v62 = vcombine.high %v5128_v40, %v15279_v60  ;;  %v5153_v29 = vcombine.high %v5135_v27, %v15279_v60  ;;  %v5154_v34 = vcombine.high %v5144_v36, %v15279_v60  ;;  %v5361_v17 = vcombine.high %v4857_v51, %v16223_v33  ;;  %v4860_v12 = vpop.f32.mrb[43].mxu0  ;;  %v16360_v43 = vpop.f32.mrb[39].mxu1 }
 0x526   : > { %v5457_v35 = vcombine.high %v16326_v56, %v16314_v44  ;;  %v16364_v3 = vrot.slane %v5376_v28, %v16040_v1  ;;  %v16367_v49 = vrot.slane %v5377_v54, %v16040_v1  ;;  %v16370_v19 = vrot.slane %v5360_v24, %v16040_v1 }
 0x527   : > { %v15047_v31 = vpack.i.bf16 %v5135_v27, %v5152_v62  ;;  %v15061_v59 = vpack.i.bf16 %v5144_v36, %v5153_v29  ;;  %v15075_v11 = vpack.i.bf16 %v16335_v46, %v5154_v34  ;;  %v16373_v33 = vrot.slane %v5361_v17, %v16040_v1 }
 0x528   : > { %v5472_v39 = vcombine.low %v16329_v61, %v16317_v30  ;;  %15060 = vxpose.xlu0.b32.start [1/2] (short) (narrow) %v16259_v5, 16  ;;  %v5473_v25 = vcombine.high %v16329_v61, %v16317_v30  ;;  %v5612_v6 = vcombine.low %v16255_v63, %v16299_v8  ;;  %v5613_v40 = vcombine.high %v16255_v63, %v16299_v8 }
 0x529   : > { %15048 = vxpose.xlu1.b32.end [2/2] (short) (narrow) %v15047_v31, 16  ;;  %v5425_v27 = vcombine.high %v16370_v19, %v16364_v3  ;;  %v5440_v36 = vcombine.low %v16373_v33, %v16367_v49  ;;  %v5441_v42 = vcombine.high %v16373_v33, %v16367_v49  ;;  %v5155_v5 = vcombine.high %v16335_v46, %v15279_v60 }
 0x52a   : > { %v16393_v51 = vrot.slane %v5612_v6, %v16040_v1  ;;  %v16396_v62 = vrot.slane %v5613_v40, %v16040_v1  ;;  %v5332_v63 = vrot.slane %v5324_v52, %v16123_v15  ;;  %v5580_v8 = vcombine.low %v13394_v21, %v16227_v18  ;;  %v13413_v29 = vpop.f32.mrb[40].mxu1 }
 0x52b   : > { %v5581_v34 = vcombine.high %v13394_v21, %v16227_v18  ;;  %v5564_v28 = vcombine.low %v4860_v12, %v16231_v26  ;;  %v5565_v54 = vcombine.high %v4860_v12, %v16231_v26  ;;  %v5596_v46 = vcombine.low %v16257_v58, %v16303_v57  ;;  %v4937_v24 = vpop.f32.mrb[41].mxu1 }
 0x52c   : > { %15062 = vxpose.xlu0.b32.end [2/2] (short) (narrow) %v15061_v59, 16  ;;  %v15089_v17 = vpack.i.bf16 %v5332_v63, %v5155_v5  ;;  %v16407_v31 = vrot.slane %v5580_v8, %v16040_v1  ;;  %v5597_v52 = vcombine.high %v16257_v58, %v16303_v57  ;;  %v16411_v6 = vpop.f32.mrb[42].mxu1  ;;  %v15115_v58 = vpack.i.bf16 %v5288_v9, %v5287_v50 }
 0x52d   : > { %15074 = vxpose.xlu1.b32.start [1/2] (short) (narrow) %v16268_v37, 16  ;;  %v16414_v18 = vrot.slane %v5581_v34, %v16040_v1  ;;  %v16417_v26 = vrot.slane %v5564_v28, %v16040_v1  ;;  %v16420_v21 = vrot.slane %v5565_v54, %v16040_v1  ;;  %v16423_v37 = vrot.slane %v5596_v46, %v16040_v1  ;;  %v16425_v12 = vpop.f32.mrb[43].mxu1 }
 0x52e   : > { %v16428_v59 = vrot.slane %v5597_v52, %v16040_v1  ;;  %v5339_v57 = vrot.slane %v5325_v10, %v16123_v15  ;;  %v5356_v40 = vcombine.high %v5332_v63, %v15279_v60  ;;  %v5512_v28 = vcombine.low %v16337_v53, %v13413_v29 }
 0x52f   : > { %v5628_v5 = vcombine.low %v16417_v26, %v16407_v31  ;;  %v5629_v8 = vcombine.high %v16417_v26, %v16407_v31  ;;  %v5644_v34 = vcombine.low %v16420_v21, %v16414_v18  ;;  %v5645_v41 = vcombine.high %v16420_v21, %v16414_v18 }
 0x530   : > { %15088 = vxpose.xlu0.b32.start [1/2] (short) (narrow) %v16291_v7, 16  ;;  %v5660_v4 = vcombine.low %v16423_v37, %v16393_v51  ;;  %v5661_v50 = vcombine.high %v16423_v37, %v16393_v51  ;;  %v5676_v9 = vcombine.low %v16428_v59, %v16396_v62  ;;  %v15103_v63 = vpack.i.bf16 %v5339_v57, %v5356_v40 }
 0x531   : > { %15076 = vxpose.xlu1.b32.end [2/2] (short) (narrow) %v15075_v11, 16  ;;  %v5513_v54 = vcombine.high %v16337_v53, %v13413_v29  ;;  %v5496_v7 = vcombine.low %v16347_v23, %v4937_v24  ;;  %v5497_v11 = vcombine.high %v16347_v23, %v4937_v24  ;;  %v5348_v46 = vrot.slane %v5340_v22, %v16123_v15 }
 0x532   : > { %v5357_v52 = vcombine.high %v5339_v57, %v15279_v60  ;;  %v5520_v38 = vrot.slane %v5512_v28, %v16040_v1  ;;  %v15129_v53 = vpack.i.bf16 %v5290_v16, %v5289_v14  ;;  %v16476_v23 = vrot.slane %v5341_v55, %v16123_v15 }
 0x533   : > { %v5527_v10 = vrot.slane %v5513_v54, %v16040_v1  ;;  %v5504_v22 = vrot.slane %v5496_v7, %v16040_v1  ;;  %v5511_v29 = vrot.slane %v5497_v11, %v16040_v1  ;;  %v5358_v48 = vcombine.high %v5348_v46, %v15279_v60 }
 0x534   : > { %15090 = vxpose.xlu0.b32.end [2/2] (short) (narrow) %v15089_v17, 16  ;;  %v15117_v24 = vpack.i.bf16 %v5348_v46, %v5357_v52  ;;  %v5424_v20 = vcombine.low %v16370_v19, %v16364_v3  ;;  %v5456_v14 = vcombine.low %v16326_v56, %v16314_v44  ;;  %v5439_v16 = vrot.slane %v5425_v27, %v16123_v15 }
 0x535   : > { %15102 = vxpose.xlu1.b32.start [1/2] (short) (narrow) %v16293_v47, 16  ;;  %v15260_v47 = vld [vmem:[%s18456_s5 + $0x8] sm:$0x3f]   ;;  %v5528_v2 = vcombine.low %v5504_v22, %v5520_v38  ;;  %v5529_v0 = vcombine.high %v5504_v22, %v5520_v38  ;;  %v5544_v55 = vcombine.low %v5511_v29, %v5527_v10  ;;  %v5545_v17 = vcombine.high %v5511_v29, %v5527_v10 }
 0x536   : > { %v15131_v57 = vpack.i.bf16 %v16476_v23, %v5358_v48  ;;  %v5432_v40 = vrot.slane %v5424_v20, %v16123_v15  ;;  %v5464_v3 = vrot.slane %v5456_v14, %v16123_v15  ;;  %v5471_v19 = vrot.slane %v5457_v35, %v16123_v15  ;;  %14807 = vmatprep.subr.msk.bf16.mxu0 %vm7310_vm8, %v15260_v47 }
 0x537   : > { %v5536_v38 = vrot.slane %v5528_v2, %v16123_v15  ;;  %v5716_v27 = vcombine.low %v16353_v32, %v16411_v6  ;;  %v5717_v10 = vcombine.high %v16353_v32, %v16411_v6  ;;  %v7312_v28 = vsel %vm7310_vm8, %v15260_v47, 0 }
 0x538   : > { %15116 = vxpose.xlu0.b32.start [1/2] (short) (narrow) %v15115_v58, 16  ;;  %v5488_v54 = vcombine.low %v5432_v40, %v5464_v3  ;;  %v5489_v7 = vcombine.high %v5432_v40, %v5464_v3  ;;  %v5490_v11 = vcombine.low %v5439_v16, %v5471_v19  ;;  %v16505_v44 = vrot.slane %v5529_v0, %v16123_v15 }
 0x539   : > { %15104 = vxpose.xlu1.b32.end [2/2] (short) (narrow) %v15103_v63, 16  ;;  %13416 = vmatpush3.bf16.msra.mxu0 %v7312_v28  ;;  %v5724_v56 = vrot.slane %v5716_v27, %v16040_v1  ;;  %v16509_v35 = vrot.slane %v5717_v10, %v16040_v1  ;;  %v16512_v58 = vcombine.high %v5536_v38, %v15279_v60  ;;  %v15280_v47 = vmov 0  }
 0x53a   : > { %v5448_v32 = vrot.slane %v5440_v36, %v16123_v15  ;;  %v15143_v6 = vpack.i.bf16 %v5490_v11, %v5489_v7  ;;  %v5480_v63 = vrot.slane %v5472_v39, %v16123_v15  ;;  %v5491_v46 = vcombine.high %v5439_v16, %v5471_v19  ;;  %v16535_v39 = vld [vmem:[%s18456_s5 + $0x20] sm:$0x3f]  }
 0x53b   : > { %v5700_v52 = vcombine.low %v16360_v43, %v16425_v12  ;;  %v15145_v22 = vpack.i.bf16 %v16505_v44, %v16512_v58  ;;  %v5701_v29 = vcombine.high %v16360_v43, %v16425_v12  ;;  %v5455_v36 = vrot.slane %v5441_v42, %v16123_v15  ;;  %14811 = vmatprep.subr.msk.bf16.mxu1 %vm7310_vm8, %v16535_v39 }
 0x53c   : > { %15118 = vxpose.xlu0.b32.end [2/2] (short) (narrow) %v15117_v24, 16  ;;  %v5492_v48 = vcombine.low %v5448_v32, %v5480_v63  ;;  %v5493_v20 = vcombine.high %v5448_v32, %v5480_v63  ;;  %v16544_v12 = vrot.slane %v5544_v55, %v16123_v15  ;;  %v5561_v49 = vcombine.high %v16505_v44, %v15279_v60 }
 0x53d   : > { %15130 = vxpose.xlu1.b32.start [1/2] (short) (narrow) %v15129_v53, 16  ;;  %v5708_v24 = vrot.slane %v5700_v52, %v16040_v1  ;;  %v5487_v53 = vrot.slane %v5473_v25, %v16123_v15  ;;  %v5715_v43 = vrot.slane %v5701_v29, %v16040_v1  ;;  %v16549_v33 = vrot.slane %v5545_v17, %v16123_v15 }
 0x53e   : > { %v15157_v42 = vpack.i.bf16 %v5492_v48, %v5491_v46  ;;  %v15159_v25 = vpack.i.bf16 %v16544_v12, %v5561_v49  ;;  %v6827_v2 = vrot.slane %v15280_v47, 7  ;;  %v5562_v55 = vcombine.high %v16544_v12, %v15279_v60 }
 0x53f   : > { %v5732_v14 = vcombine.low %v5708_v24, %v5724_v56  ;;  %v5733_v16 = vcombine.high %v5708_v24, %v5724_v56  ;;  %v5494_v30 = vcombine.low %v5455_v36, %v5487_v53  ;;  %v5748_v1 = vcombine.low %v5715_v43, %v16509_v35 }
 0x540   : > { %6280 = vxpose.xlu0.b32.start [1/2] (short) (narrow) %v5488_v54, 16  ;;  %v5749_v61 = vcombine.high %v5715_v43, %v16509_v35  ;;  %v5495_v17 = vcombine.high %v5455_v36, %v5487_v53  ;;  %v5636_v40 = vrot.slane %v5628_v5, %v16123_v15  ;;  %v5668_v3 = vrot.slane %v5660_v4, %v16123_v15 }
 0x541   : > { %15132 = vxpose.xlu1.b32.end [2/2] (short) (narrow) %v15131_v57, 16  ;;  %v15171_v0 = vpack.i.bf16 %v5494_v30, %v5493_v20  ;;  %v5643_v19 = vrot.slane %v5629_v8, %v16123_v15  ;;  %v5675_v5 = vrot.slane %v5661_v50, %v16123_v15  ;;  %v5563_v27 = vcombine.high %v16549_v33, %v15279_v60 }
 0x542   : > { %v15173_v10 = vpack.i.bf16 %v16549_v33, %v5562_v55  ;;  %v5740_v28 = vrot.slane %v5732_v14, %v16123_v15  ;;  %v5747_v54 = vrot.slane %v5733_v16, %v16123_v15  ;;  %v5652_v31 = vrot.slane %v5644_v34, %v16123_v15 }
 0x543   : > { %v5692_v26 = vcombine.low %v5636_v40, %v5668_v3  ;;  %v5693_v8 = vcombine.high %v5636_v40, %v5668_v3  ;;  %v5694_v51 = vcombine.low %v5643_v19, %v5675_v5  ;;  %v16591_v37 = vsel %vm16564_vm11, 0, %v6827_v2 }
 0x544   : > { %6281 = vxpose.xlu0.b32.end [2/2] (short) (narrow) %v5536_v38, 16  ;;  %v15187_v4 = vpack.i.bf16 %v5740_v28, %v5563_v27  ;;  %v5764_v50 = vcombine.high %v5740_v28, %v15279_v60  ;;  %v5684_v7 = vrot.slane %v5676_v9, %v16123_v15  ;;  %v5695_v11 = vcombine.high %v5643_v19, %v5675_v5 }
 0x545   : > { %15144 = vxpose.xlu1.b32.start [1/2] (short) (narrow) %v15143_v6, 16  ;;  %v15185_v44 = vpack.i.bf16 %v5692_v26, %v5495_v17  ;;  %v15199_v34 = vpack.i.bf16 %v5694_v51, %v5693_v8  ;;  %v5659_v38 = vrot.slane %v5645_v41, %v16123_v15  ;;  %v18577_v56 = vcombine.high %v16428_v59, %v16396_v62 }
 0x546   : > { %v15201_v58 = vpack.i.bf16 %v5747_v54, %v5764_v50  ;;  %v5696_v32 = vcombine.low %v5652_v31, %v5684_v7  ;;  %v5697_v6 = vcombine.high %v5652_v31, %v5684_v7  ;;  %v5756_v63 = vrot.slane %v5748_v1, %v16123_v15 }
 0x547   : > { %v5691_v35 = vrot.slane %v18577_v56, %v16123_v15  ;;  %v5765_v46 = vcombine.high %v5747_v54, %v15279_v60  ;;  %v5763_v52 = vrot.slane %v5749_v61, %v16123_v15  ;;  %v16611_v18 = vsel %vm16564_vm11, %v6827_v2, 0 }
 0x548   : > { %15158 = vxpose.xlu0.b32.start [1/2] (short) (narrow) %v15157_v42, 16  ;;  %18578 = vst [vmem:[#allocation2_spill] sm:$0xff] %v16611_v18  ;;  %v15213_v21 = vpack.i.bf16 %v5696_v32, %v5695_v11  ;;  %v5766_v62 = vcombine.high %v5756_v63, %v15279_v60  ;;  %v8267_v24 = vshll.u32 %v16591_v37, 16  ;;  %v8272_v53 = vshll.u32 %v16611_v18, 16 }
 0x549   : > { %15146 = vxpose.xlu1.b32.end [2/2] (short) (narrow) %v15145_v22, 16  ;;  %v5698_v9 = vcombine.low %v5659_v38, %v5691_v35  ;;  %v5699_v59 = vcombine.high %v5659_v38, %v5691_v35  ;;  %v15215_v29 = vpack.i.bf16 %v5756_v63, %v5765_v46  ;;  %v5767_v36 = vcombine.high %v5763_v52, %v15279_v60 }
 0x54a   : > { %v15229_v48 = vpack.i.bf16 %v5763_v52, %v5766_v62  ;;  %v8265_v22 = vshrl.u32 %v16591_v37, 16  ;;  %v8269_v15 = vrot.slane %v8267_v24, 1  ;;  %v8274_v20 = vrot.slane %v8272_v53, 1 }
 0x54b   : > { %v15227_v41 = vpack.i.bf16 %v5698_v9, %v5697_v6  ;;  %v18580_v49 = vcombine.high %v16274_v13, %v16277_v45  ;;  %v5359_v33 = vcombine.high %v16476_v23, %v15279_v60 }
 0x54c   : > { %15160 = vxpose.xlu0.b32.end [2/2] (short) (narrow) %v15159_v25, 16  ;;  %v8270_v43 = vor.u32 %v8269_v15, %v8265_v22  ;;  %v9094_v15 = vsel %vm7310_vm8, %v16535_v39, 0 }
 0x54d   : > { %15172 = vxpose.xlu1.b32.start [1/2] (short) (narrow) %v15171_v0, 16 }
 0x54e   : > { %v16619_v12 = vsel %vm8264_vm12, %v8270_v43, %v8274_v20 }
 0x54f   : > { %18579 = vst [vmem:[#allocation4_spill] sm:$0xff] %v16619_v12  ;;  %13615 = vmatprep.mubr.msk.bf16.mxu1 %vm7213_vm13, %v16619_v12 }
 0x550   : > { %15186 = vxpose.xlu0.b32.start [1/2] (short) (narrow) %v15185_v44, 16 }
 0x551   : > { %15174 = vxpose.xlu1.b32.end [2/2] (short) (narrow) %v15173_v10, 16 }
 0x554   : > { %15188 = vxpose.xlu0.b32.end [2/2] (short) (narrow) %v15187_v4, 16 }
 0x555   : > { %15200 = vxpose.xlu1.b32.start [1/2] (short) (narrow) %v15199_v34, 16 }
 0x558   : > { %15214 = vxpose.xlu0.b32.start [1/2] (short) (narrow) %v15213_v21, 16 }
 0x559   : > { %15202 = vxpose.xlu1.b32.end [2/2] (short) (narrow) %v15201_v58, 16 }
 0x55c   : > { %15216 = vxpose.xlu0.b32.end [2/2] (short) (narrow) %v15215_v29, 16 }
 0x55d   : > { %15228 = vxpose.xlu1.b32.start [1/2] (short) (narrow) %v15227_v41, 16 }
 0x560   : > { %6248 = vxpose.xlu0.b32.start [1/2] (short) (narrow) %v18580_v49, 16 }
 0x561   : > { %15230 = vxpose.xlu1.b32.end [2/2] (short) (narrow) %v15229_v48, 16 }
 0x564   : > { %6249 = vxpose.xlu0.b32.end [2/2] (short) (narrow) %v5359_v33, 16 }
 0x565   : > { %6760 = vxpose.xlu1.b32.start [1/2] (short) (narrow) %v5699_v59, 16 }
 0x569   : > { %6761 = vxpose.xlu1.b32.end [2/2] (short) (narrow) %v5767_v36, 16 }
 0x5a0   : > { %v5784_v42 = vpop.trf.xlu0 }
 0x5a4   : > { %v5785_v14 = vpop.trf.xlu0 }
 0x5a5   : > { %v15049_v16 = vpop.trf.xlu1  ;;  %v6792_v30 = vpack.c.bf16 %v5785_v14, %v5784_v42 }
 0x5a6   : > { %v15053_v47 = vunpack.i.h.bf16 %v15049_v16  ;;  %v15050_v55 = vunpack.i.l.bf16 %v15049_v16 }
 0x5a7   : > { %v6832_v1 = vshrl.u32 %v6792_v30, 16  ;;  %v6835_v13 = vshll.u32 %v6792_v30, 16 }
 0x5a8   : > { %v15063_v61 = vpop.trf.xlu0 }
 0x5a9   : > { %v15054_v25 = vpop.trf.xlu1  ;;  %v6834_v2 = vrot.slane %v6832_v1, 7  ;;  %v15064_v23 = vunpack.i.l.bf16 %v15063_v61  ;;  %v15067_v27 = vunpack.i.h.bf16 %v15063_v61 }
 0x5aa   : > { %v15058_v0 = vunpack.i.h.bf16 %v15054_v25  ;;  %v15055_v17 = vunpack.i.l.bf16 %v15054_v25 }
 0x5ab   : > { %v6837_v60 = vor.u32 %v6835_v13, %v6834_v2  ;;  %v16630_v54 = vsel %vm16564_vm11, %v6834_v2, 0 }
 0x5ac   : > { %v6794_v45 = vpack.c.bf16 %v15058_v0, %v15053_v47  ;;  %v15068_v40 = vpop.trf.xlu0  ;;  %v6793_v3 = vpack.c.bf16 %v15055_v17, %v15050_v55  ;;  %18581 = vst [vmem:[#allocation6_spill] sm:$0xff] %v16630_v54  ;;  %v8283_v50 = vshll.u32 %v16630_v54, 16 }
 0x5ad   : > { %v15069_v19 = vunpack.i.l.bf16 %v15068_v40  ;;  %v15077_v5 = vpop.trf.xlu1  ;;  %v15072_v31 = vunpack.i.h.bf16 %v15068_v40  ;;  %v16636_v4 = vsel %vm16564_vm11, 0, %v6837_v60 }
 0x5ae   : > { %v6839_v10 = vshrl.u32 %v6793_v3, 16  ;;  %v6846_v28 = vshrl.u32 %v6794_v45, 16  ;;  %18582 = vst [vmem:[#allocation3_spill] sm:$0xff] %v16636_v4  ;;  %13417 = vmatprep.mubr.msk.bf16.mxu0 %vm7213_vm13, %v16636_v4  ;;  %v8278_v11 = vshll.u32 %v16636_v4, 16  ;;  %v6842_v44 = vshll.u32 %v6793_v3, 16 }
 0x5af   : > { %v6795_v51 = vpack.c.bf16 %v15069_v19, %v15064_v23  ;;  %v6796_v34 = vpack.c.bf16 %v15072_v31, %v15067_v27  ;;  %v6849_v35 = vshll.u32 %v6794_v45, 16  ;;  %v8276_v6 = vshrl.u32 %v16636_v4, 16 }
 0x5b0   : > { %v16632_v26 = vpop.trf.xlu0  ;;  %v6841_v8 = vrot.slane %v6839_v10, 7  ;;  %v6848_v7 = vrot.slane %v6846_v28, 7  ;;  %v8280_v58 = vrot.slane %v8278_v11, 1  ;;  %v15078_v9 = vunpack.i.l.bf16 %v15077_v5 }
 0x5b1   : > { %v15082_v38 = vpop.trf.xlu1  ;;  %v6853_v32 = vshrl.u32 %v6795_v51, 16  ;;  %v6860_v21 = vshrl.u32 %v6796_v34, 16  ;;  %v8285_v29 = vrot.slane %v8283_v50, 1  ;;  %v15081_v36 = vunpack.i.h.bf16 %v15077_v5 }
 0x5b2   : > { %v6844_v63 = vor.u32 %v6842_v44, %v6841_v8  ;;  %v15083_v46 = vunpack.i.l.bf16 %v15082_v38  ;;  %v6851_v52 = vor.u32 %v6849_v35, %v6848_v7  ;;  %v8281_v59 = vor.u32 %v8280_v58, %v8276_v6 }
 0x5b3   : > { %v15086_v48 = vunpack.i.h.bf16 %v15082_v38  ;;  %v6855_v24 = vrot.slane %v6853_v32, 7  ;;  %v6856_v53 = vshll.u32 %v6795_v51, 16  ;;  %v16664_v49 = vrot.slane %v6860_v21, 7 }
 0x5b4   : > { %v16642_v56 = vpop.trf.xlu0  ;;  %v16647_v62 = vsel %vm16564_vm11, 0, %v6844_v63  ;;  %v16655_v22 = vsel %vm16564_vm11, 0, %v6851_v52  ;;  %v6797_v20 = vpack.c.bf16 %v15083_v46, %v15078_v9  ;;  %v16662_v43 = vsel %vm8264_vm12, %v8281_v59, %v8285_v29  ;;  %v16731_v59 = vld [vmem:[%s18456_s5] sm:$0x3f]   ;;  %v15263_v29 = vld [vmem:[%s18456_s5 + $0x28] sm:$0x3f]  }
 0x5b5   : > { %13418 = vmatmul.mubr.msk.bf16.vlgmr.msra.gmra.mrb[44].mxu0 %vm7213_vm13, %v16647_v62  ;;  %v6863_v33 = vshll.u32 %v6796_v34, 16  ;;  %13616 = vmatmul.mubr.msk.bf16.vlgmr.msra.gmra.mrb[44].mxu1 %vm7213_vm13, %v16662_v43  ;;  %v6798_v14 = vpack.c.bf16 %v15086_v48, %v15081_v36  ;;  %v16672_v16 = vsel %vm16564_vm11, %v6841_v8, 0  ;;  %v15095_v39 = vunpack.i.h.bf16 %v16632_v26  ;;  %v16684_v13 = vpop.trf.xlu1 }
 0x5b6   : > { %13421 = vmatprep.mubr.msk.bf16.mxu0 %vm7213_vm13, %v16655_v22  ;;  %13680 = vmatpush3.bf16.msra.mxu1 %v9094_v15  ;;  %18583 = vst [vmem:[#allocation5_spill] sm:$0xff] %v16672_v16  ;;  %v8289_v30 = vshll.u32 %v16647_v62, 16  ;;  %v8294_v1 = vshll.u32 %v16672_v16, 16  ;;  %v6858_v61 = vor.u32 %v6856_v53, %v6855_v24  ;;  %v6867_v25 = vshrl.u32 %v6797_v20, 16 }
 0x5b7   : > { %v15100_v47 = vunpack.i.h.bf16 %v16642_v56  ;;  %v8287_v2 = vshrl.u32 %v16647_v62, 16  ;;  %v6865_v17 = vor.u32 %v6863_v33, %v16664_v49  ;;  %v6874_v40 = vshrl.u32 %v6798_v14, 16  ;;  %14808 = vmatprep.subr.msk.bf16.mxu0 %vm7310_vm8, %v16731_v59  ;;  %14812 = vmatprep.subr.msk.bf16.mxu1 %vm7310_vm8, %v15263_v29 }
 0x5b8   : > { %v16649_v41 = vpop.trf.xlu0  ;;  %v8291_v0 = vrot.slane %v8289_v30, 1  ;;  %v16681_v55 = vsel %vm16564_vm11, 0, %v6858_v61  ;;  %v8296_v3 = vrot.slane %v8294_v1, 1  ;;  %v16692_v60 = vsel %vm16564_vm11, %v6848_v7, 0 }
 0x5b9   : > { %18584 = vst [vmem:[#allocation7_spill] sm:$0xff] %v16692_v60  ;;  %v16696_v19 = vsel %vm16564_vm11, 0, %v6865_v17  ;;  %v8300_v5 = vshll.u32 %v16655_v22, 16  ;;  %v8305_v27 = vshll.u32 %v16692_v60, 16  ;;  %v15092_v10 = vunpack.i.l.bf16 %v16632_v26  ;;  %v15110_v58 = vpop.trf.xlu1 }
 0x5ba   : > { %v8292_v23 = vor.u32 %v8291_v0, %v8287_v2  ;;  %v6870_v28 = vshll.u32 %v6797_v20, 16  ;;  %v15097_v31 = vunpack.i.l.bf16 %v16642_v56  ;;  %v16702_v8 = vpack.c.bf16 %v15100_v47, %v15095_v39 }
 0x5bb   : > { %v6869_v51 = vrot.slane %v6867_v25, 7  ;;  %v8298_v7 = vshrl.u32 %v16655_v22, 16  ;;  %v8302_v11 = vrot.slane %v8300_v5, 1  ;;  %v6877_v34 = vshll.u32 %v6798_v14, 16 }
 0x5bc   : > { %v16668_v42 = vpop.trf.xlu0  ;;  %v16707_v50 = vsel %vm8264_vm12, %v8292_v23, %v8296_v3  ;;  %v16714_v26 = vrot.slane %v6874_v40, 7  ;;  %v8307_v56 = vrot.slane %v8305_v27, 1  ;;  %v16718_v35 = vsel %vm16564_vm11, %v6855_v24, 0 }
 0x5bd   : > { %13422 = vmatmul.mubr.msk.bf16.gmra.mrb[48].mxu0 %vm7213_vm13, %v16681_v55  ;;  %13619 = vmatprep.mubr.msk.bf16.mxu1 %vm7213_vm13, %v16707_v50  ;;  %v8303_v38 = vor.u32 %v8302_v11, %v8298_v7  ;;  %18585 = vst [vmem:[#allocation8_spill] sm:$0xff] %v16718_v35  ;;  %v6799_v32 = vpack.c.bf16 %v15097_v31, %v15092_v10  ;;  %v8311_v6 = vshll.u32 %v16681_v55, 16  ;;  %v8316_v63 = vshll.u32 %v16718_v35, 16 }
 0x5be   : > { %13425 = vmatprep.mubr.msk.bf16.mxu0 %vm7213_vm13, %v16696_v19  ;;  %v6888_v9 = vshrl.u32 %v16702_v8, 16  ;;  %v6872_v52 = vor.u32 %v6870_v28, %v6869_v51  ;;  %v8309_v36 = vshrl.u32 %v16681_v55, 16  ;;  %v6891_v24 = vshll.u32 %v16702_v8, 16 }
 0x5bf   : > { %v16724_v46 = vsel %vm8264_vm12, %v8303_v38, %v8307_v56  ;;  %v8313_v48 = vrot.slane %v8311_v6, 1  ;;  %v6879_v15 = vor.u32 %v6877_v34, %v16714_v26  ;;  %v6881_v20 = vshrl.u32 %v6799_v32, 16 }
 0x5c0   : > { %v16686_v45 = vpop.trf.xlu0  ;;  %13620 = vmatmul.mubr.msk.bf16.gmra.mrb[48].mxu1 %vm7213_vm13, %v16724_v46  ;;  %v16742_v53 = vsel %vm16564_vm11, 0, %v6872_v52  ;;  %v8318_v14 = vrot.slane %v8316_v63, 1  ;;  %v16753_v39 = vsel %vm16564_vm11, %v16664_v49, 0  ;;  %v6884_v30 = vshll.u32 %v6799_v32, 16 }
 0x5c1   : > { %v8314_v33 = vor.u32 %v8313_v48, %v8309_v36  ;;  %18586 = vst [vmem:[#allocation9_spill] sm:$0xff] %v16753_v39  ;;  %v16755_v1 = vrot.slane %v6888_v9, 7  ;;  %v15123_v61 = vunpack.i.h.bf16 %v16649_v41  ;;  %v16760_v25 = vsel %vm16564_vm11, 0, %v6879_v15 }
 0x5c2   : > { %v15120_v47 = vunpack.i.l.bf16 %v16649_v41  ;;  %v15125_v2 = vunpack.i.l.bf16 %v16668_v42  ;;  %v15106_v0 = vunpack.i.l.bf16 %v16684_v13  ;;  %v15111_v40 = vunpack.i.l.bf16 %v15110_v58 }
 0x5c3   : > { %v16766_v17 = vsel %vm8264_vm12, %v8314_v33, %v8318_v14  ;;  %v8322_v3 = vshll.u32 %v16696_v19, 16  ;;  %v8327_v41 = vshll.u32 %v16753_v39, 16  ;;  %v16778_v23 = vsel %vm16564_vm11, %v6869_v51, 0 }
 0x5c4   : > { %v16710_v44 = vpop.trf.xlu0  ;;  %13623 = vmatprep.mubr.msk.bf16.mxu1 %vm7213_vm13, %v16766_v17  ;;  %18587 = vst [vmem:[#allocation10_spill] sm:$0xff] %v16778_v23  ;;  %v6883_v5 = vrot.slane %v6881_v20, 7  ;;  %v15128_v27 = vunpack.i.h.bf16 %v16668_v42  ;;  %v8331_v10 = vshrl.u32 %v16742_v53, 16  ;;  %v8333_v28 = vshll.u32 %v16742_v53, 16 }
 0x5c5   : > { %13426 = vmatmul.mubr.msk.bf16.gmra.mrb[52].mxu0 %vm7213_vm13, %v16742_v53  ;;  %v15109_v31 = vunpack.i.h.bf16 %v16684_v13  ;;  %v15114_v8 = vunpack.i.h.bf16 %v15110_v58  ;;  %v8320_v7 = vshrl.u32 %v16696_v19, 16  ;;  %v8324_v11 = vrot.slane %v8322_v3, 1 }
 0x5c6   : > { %13429 = vmatprep.mubr.msk.bf16.mxu0 %vm7213_vm13, %v16760_v25  ;;  %v16785_v34 = vpack.c.bf16 %v15125_v2, %v15120_v47  ;;  %v8335_v38 = vrot.slane %v8333_v28, 1  ;;  %v8338_v56 = vshll.u32 %v16778_v23, 16  ;;  %v6801_v51 = vpack.c.bf16 %v15111_v40, %v15106_v0 }
 0x5c7   : > { %v8325_v32 = vor.u32 %v8324_v11, %v8320_v7  ;;  %v8329_v6 = vrot.slane %v8327_v41, 1  ;;  %v16788_v63 = vpack.c.bf16 %v15128_v27, %v15123_v61  ;;  %v6886_v52 = vor.u32 %v6884_v30, %v6883_v5  ;;  %v16818_v30 = vpop.trf.xlu1 }
 0x5c8   : > { %v16726_v21 = vpop.trf.xlu0  ;;  %v8336_v42 = vor.u32 %v8335_v38, %v8331_v10  ;;  %v8340_v9 = vrot.slane %v8338_v56, 1  ;;  %v6802_v13 = vpack.c.bf16 %v15114_v8, %v15109_v31  ;;  %v6808_v36 = vpack.c.bf16 %v16710_v44, %v16686_v45 }
 0x5c9   : > { %v16793_v58 = vsel %vm8264_vm12, %v8325_v32, %v8329_v6  ;;  %v16804_v15 = vsel %vm16564_vm11, 0, %v6886_v52  ;;  %v6893_v20 = vor.u32 %v6891_v24, %v16755_v1  ;;  %v6895_v33 = vshrl.u32 %v6801_v51, 16 }
 0x5ca   : > { %13624 = vmatmul.mubr.msk.bf16.gmra.mrb[52].mxu1 %vm7213_vm13, %v16793_v58  ;;  %v16800_v48 = vsel %vm8264_vm12, %v8336_v42, %v8340_v9  ;;  %v16814_v45 = vsel %vm16564_vm11, %v16714_v26, 0  ;;  %v8342_v44 = vshrl.u32 %v16760_v25, 16  ;;  %v8344_v14 = vshll.u32 %v16760_v25, 16 }
 0x5cb   : > { %13627 = vmatprep.mubr.msk.bf16.mxu1 %vm7213_vm13, %v16800_v48  ;;  %18588 = vst [vmem:[#allocation11_spill] sm:$0xff] %v16814_v45  ;;  %v16822_v24 = vsel %vm16564_vm11, 0, %v6893_v20  ;;  %v8349_v61 = vshll.u32 %v16814_v45, 16  ;;  %v6909_v47 = vshrl.u32 %v16785_v34, 16  ;;  %v6916_v2 = vshrl.u32 %v16788_v63, 16  ;;  %v15138_v6 = vpop.trf.xlu1 }
 0x5cc   : > { %v16770_v49 = vpop.trf.xlu0  ;;  %v6902_v0 = vshrl.u32 %v6802_v13, 16  ;;  %v8346_v26 = vrot.slane %v8344_v14, 1  ;;  %v6944_v40 = vshrl.u32 %v6808_v36, 16  ;;  %v6897_v27 = vrot.slane %v6895_v33, 7 }
 0x5cd   : > { %13430 = vmatmul.mubr.msk.bf16.gmra.mrb[56].mxu0 %vm7213_vm13, %v16804_v15  ;;  %v8351_v3 = vrot.slane %v8349_v61, 1  ;;  %v6898_v10 = vshll.u32 %v6801_v51, 16  ;;  %v16833_v31 = vsel %vm16564_vm11, %v6883_v5, 0  ;;  %v6905_v8 = vshll.u32 %v6802_v13, 16 }
 0x5ce   : > { %13433 = vmatprep.mubr.msk.bf16.mxu0 %vm7213_vm13, %v16822_v24  ;;  %v8347_v28 = vor.u32 %v8346_v26, %v8342_v44  ;;  %18589 = vst [vmem:[#allocation12_spill] sm:$0xff] %v16833_v31  ;;  %v8353_v7 = vshrl.u32 %v16804_v15, 16  ;;  %v8355_v11 = vshll.u32 %v16804_v15, 16  ;;  %v8360_v38 = vshll.u32 %v16833_v31, 16 }
 0x5cf   : > { %v6904_v56 = vrot.slane %v6902_v0, 7  ;;  %v6946_v42 = vrot.slane %v6944_v40, 7  ;;  %v6947_v5 = vshll.u32 %v6808_v36, 16  ;;  %v6900_v52 = vor.u32 %v6898_v10, %v6897_v27  ;;  %v15147_v23 = vpop.trf.xlu1 }
 0x5d0   : > { %v16790_v29 = vpop.trf.xlu0  ;;  %v16839_v32 = vsel %vm8264_vm12, %v8347_v28, %v8351_v3  ;;  %v8357_v51 = vrot.slane %v8355_v11, 1  ;;  %v8362_v9 = vrot.slane %v8360_v38, 1  ;;  %v6912_v44 = vshll.u32 %v16785_v34, 16 }
 0x5d1   : > { %v16845_v13 = vsel %vm16564_vm11, %v6946_v42, 0  ;;  %v6919_v14 = vshll.u32 %v16788_v63, 16  ;;  %v16853_v61 = vsel %vm16564_vm11, 0, %v6900_v52  ;;  %v16855_v0 = vrot.slane %v6909_v47, 7 }
 0x5d2   : > { %13628 = vmatmul.mubr.msk.bf16.gmra.mrb[56].mxu1 %vm7213_vm13, %v16839_v32  ;;  %18590 = vst [vmem:[#allocation13_spill] sm:$0xff] %v16845_v13  ;;  %v8358_v20 = vor.u32 %v8357_v51, %v8353_v7  ;;  %v16857_v26 = vrot.slane %v6916_v2, 7  ;;  %v6907_v40 = vor.u32 %v6905_v8, %v6904_v56  ;;  %v16864_v3 = vor.u32 %v6947_v5, %v6946_v42 }
 0x5d3   : > { %v8448_v34 = vshll.u32 %v16845_v13, 16  ;;  %v15134_v63 = vunpack.i.l.bf16 %v16818_v30  ;;  %v15139_v47 = vunpack.i.l.bf16 %v15138_v6  ;;  %v15165_v2 = vunpack.i.h.bf16 %v16726_v21 }
 0x5d4   : > { %v16829_v41 = vpop.trf.xlu0  ;;  %v16860_v36 = vsel %vm8264_vm12, %v8358_v20, %v8362_v9  ;;  %v15170_v10 = vunpack.i.h.bf16 %v16770_v49  ;;  %v16874_v28 = vsel %vm16564_vm11, 0, %v6907_v40  ;;  %v16879_v8 = vsel %vm16564_vm11, %v16755_v1, 0 }
 0x5d5   : > { %13434 = vmatmul.mubr.msk.bf16.gmra.mrb[60].mxu0 %vm7213_vm13, %v16853_v61  ;;  %13631 = vmatprep.mubr.msk.bf16.mxu1 %vm7213_vm13, %v16860_v36  ;;  %18591 = vst [vmem:[#allocation14_spill] sm:$0xff] %v16879_v8  ;;  %v15162_v7 = vunpack.i.l.bf16 %v16726_v21  ;;  %v15167_v11 = vunpack.i.l.bf16 %v16770_v49  ;;  %v15137_v38 = vunpack.i.h.bf16 %v16818_v30  ;;  %v15142_v42 = vunpack.i.h.bf16 %v15138_v6 }
 0x5d6   : > { %13437 = vmatprep.mubr.msk.bf16.mxu0 %vm7213_vm13, %v16874_v28  ;;  %v8364_v51 = vshrl.u32 %v16822_v24, 16  ;;  %v8366_v9 = vshll.u32 %v16822_v24, 16  ;;  %v8371_v5 = vshll.u32 %v16879_v8, 16  ;;  %v16891_v1 = vsel %vm16564_vm11, %v6897_v27, 0 }
 0x5d7   : > { %18592 = vst [vmem:[#allocation15_spill] sm:$0xff] %v16891_v1  ;;  %v6805_v21 = vpack.c.bf16 %v15139_v47, %v15134_v63  ;;  %v8375_v49 = vshrl.u32 %v16853_v61, 16  ;;  %v8377_v30 = vshll.u32 %v16853_v61, 16  ;;  %v8382_v6 = vshll.u32 %v16891_v1, 16 }
 0x5d8   : > { %v16847_v33 = vpop.trf.xlu0  ;;  %v16898_v20 = vpack.c.bf16 %v15170_v10, %v15165_v2  ;;  %v8368_v40 = vrot.slane %v8366_v9, 1  ;;  %v8373_v13 = vrot.slane %v8371_v5, 1  ;;  %v6806_v31 = vpack.c.bf16 %v15142_v42, %v15137_v38  ;;  %v15152_v9 = vpop.trf.xlu1 }
 0x5d9   : > { %v8379_v45 = vrot.slane %v8377_v30, 1  ;;  %v8384_v8 = vrot.slane %v8382_v6, 1  ;;  %v16900_v39 = vpack.c.bf16 %v15167_v11, %v15162_v7  ;;  %v6914_v60 = vor.u32 %v6912_v44, %v16855_v0 }
 0x5da   : > { %v8369_v27 = vor.u32 %v8368_v40, %v8364_v51  ;;  %v6923_v63 = vshrl.u32 %v6805_v21, 16  ;;  %v6921_v35 = vor.u32 %v6919_v14, %v16857_v26  ;;  %v16904_v16 = vrot.slane %v8448_v34, 1 }
 0x5db   : > { %v8380_v47 = vor.u32 %v8379_v45, %v8375_v49  ;;  %v16911_v10 = vsel %vm16564_vm11, 0, %v6914_v60  ;;  %v16915_v7 = vsel %vm16564_vm11, %v6904_v56, 0  ;;  %v6930_v38 = vshrl.u32 %v6806_v31, 16 }
 0x5dc   : > { %v16893_v52 = vpop.trf.xlu0  ;;  %v16907_v2 = vsel %vm8264_vm12, %v8369_v27, %v8373_v13  ;;  %18593 = vst [vmem:[#allocation16_spill] sm:$0xff] %v16911_v10  ;;  %18594 = vst [vmem:[#allocation17_spill] sm:$0xff] %v16915_v7  ;;  %v16927_v60 = vsel %vm16564_vm11, 0, %v6921_v35  ;;  %v8386_v13 = vshrl.u32 %v16874_v28, 16  ;;  %v8388_v14 = vshll.u32 %v16874_v28, 16 }
 0x5dd   : > { %13632 = vmatmul.mubr.msk.bf16.gmra.mrb[60].mxu1 %vm7213_vm13, %v16907_v2  ;;  %v16921_v45 = vsel %vm8264_vm12, %v8380_v47, %v8384_v8  ;;  %13438 = vmatmul.mubr.msk.bf16.gmra.mrb[64].mxu0 %vm7213_vm13, %v16911_v10  ;;  %18595 = vst [vmem:[#allocation18_spill] sm:$0xff] %v16927_v60  ;;  %v8393_v34 = vshll.u32 %v16915_v7, 16  ;;  %v6925_v8 = vrot.slane %v6923_v63, 7  ;;  %v6926_v42 = vshll.u32 %v6805_v21, 16 }
 0x5de   : > { %13635 = vmatprep.mubr.msk.bf16.mxu1 %vm7213_vm13, %v16921_v45  ;;  %13441 = vmatprep.mubr.msk.bf16.mxu0 %vm7213_vm13, %v16927_v60  ;;  %v6933_v51 = vshll.u32 %v6806_v31, 16  ;;  %v8390_v35 = vrot.slane %v8388_v14, 1  ;;  %v15151_v49 = vunpack.i.h.bf16 %v15147_v23  ;;  %v6932_v30 = vrot.slane %v6930_v38, 7 }
 0x5df   : > { %v8395_v5 = vrot.slane %v8393_v34, 1  ;;  %v15148_v6 = vunpack.i.l.bf16 %v15147_v23  ;;  %v16940_v40 = vsel %vm16564_vm11, %v16855_v0, 0  ;;  %v8397_v27 = vshrl.u32 %v16911_v10, 16 }
 0x5e0   : > { %v6264_v11 = vpop.trf.xlu0  ;;  %18596 = vst [vmem:[#allocation19_spill] sm:$0xff] %v16940_v40  ;;  %v8391_v47 = vor.u32 %v8390_v35, %v8386_v13  ;;  %v8399_v44 = vshll.u32 %v16911_v10, 16  ;;  %v8404_v63 = vshll.u32 %v16940_v40, 16  ;;  %v15156_v21 = vunpack.i.h.bf16 %v15152_v9 }
 0x5e1   : > { %v15153_v56 = vunpack.i.l.bf16 %v15152_v9  ;;  %v6928_v14 = vor.u32 %v6926_v42, %v6925_v8  ;;  %v6935_v40 = vor.u32 %v6933_v51, %v6932_v30  ;;  %v15193_v42 = vunpack.i.h.bf16 %v16790_v29 }
 0x5e2   : > { %v16946_v34 = vsel %vm8264_vm12, %v8391_v47, %v8395_v5  ;;  %v8401_v23 = vrot.slane %v8399_v44, 1  ;;  %v8406_v38 = vrot.slane %v8404_v63, 1  ;;  %v16948_v7 = vpack.c.bf16 %v15156_v21, %v15151_v49  ;;  %v15175_v63 = vpop.trf.xlu1 }
 0x5e3   : > { %v16952_v0 = vpack.c.bf16 %v15153_v56, %v15148_v6  ;;  %v16956_v13 = vsel %vm16564_vm11, 0, %v6928_v14  ;;  %v15190_v9 = vunpack.i.l.bf16 %v16790_v29  ;;  %v16965_v44 = vsel %vm16564_vm11, %v16857_v26, 0 }
 0x5e4   : > { %v6265_v31 = vpop.trf.xlu0  ;;  %18597 = vst [vmem:[#allocation20_spill] sm:$0xff] %v16956_v13  ;;  %v8402_v5 = vor.u32 %v8401_v23, %v8397_v27  ;;  %18598 = vst [vmem:[#allocation21_spill] sm:$0xff] %v16965_v44  ;;  %v15198_v56 = vunpack.i.h.bf16 %v16829_v41  ;;  %v15195_v49 = vunpack.i.l.bf16 %v16829_v41  ;;  %v16976_v47 = vsel %vm16564_vm11, 0, %v6935_v40 }
 0x5e5   : > { %13636 = vmatmul.mubr.msk.bf16.gmra.mrb[64].mxu1 %vm7213_vm13, %v16946_v34  ;;  %v6807_v35 = vpack.c.bf16 %v6265_v31, %v6264_v11  ;;  %13442 = vmatmul.mubr.msk.bf16.gmra.mrb[68].mxu0 %vm7213_vm13, %v16956_v13  ;;  %v6958_v11 = vshrl.u32 %v16948_v7, 16  ;;  %v6951_v29 = vshrl.u32 %v16952_v0, 16  ;;  %18600 = vst [vmem:[#allocation23_spill] sm:$0xff] %v16976_v47  ;;  %v8408_v41 = vshrl.u32 %v16927_v60, 16 }
 0x5e6   : > { %v16971_v6 = vsel %vm8264_vm12, %v8402_v5, %v8406_v38  ;;  %13445 = vmatprep.mubr.msk.bf16.mxu0 %vm7213_vm13, %v16976_v47  ;;  %v8410_v21 = vshll.u32 %v16927_v60, 16  ;;  %v8415_v31 = vshll.u32 %v16965_v44, 16  ;;  %v16989_v14 = vsel %vm16564_vm11, %v6925_v8, 0 }
 0x5e7   : > { %v6937_v51 = vshrl.u32 %v6807_v35, 16  ;;  %18599 = vst [vmem:[#allocation22_spill] sm:$0xff] %v16971_v6  ;;  %v6940_v27 = vshll.u32 %v6807_v35, 16  ;;  %13639 = vmatprep.mubr.msk.bf16.mxu1 %vm7213_vm13, %v16971_v6  ;;  %18602 = vst [vmem:[#allocation25_spill] sm:$0xff] %v16989_v14  ;;  %v8419_v40 = vshrl.u32 %v16956_v13, 16  ;;  %v8421_v23 = vshll.u32 %v16956_v13, 16 }
 0x5e8   : > { %v16995_v38 = vsel %vm16564_vm11, %v6932_v30, 0  ;;  %v16997_v35 = vpack.c.bf16 %v15198_v56, %v15193_v42  ;;  %v6961_v5 = vshll.u32 %v16948_v7, 16  ;;  %v8417_v1 = vrot.slane %v8415_v31, 1 }
 0x5e9   : > { %v16980_v26 = vrot.slane %v6937_v51, 7  ;;  %18603 = vst [vmem:[#allocation26_spill] sm:$0xff] %v16995_v38  ;;  %v8412_v51 = vrot.slane %v8410_v21, 1  ;;  %v6954_v44 = vshll.u32 %v16952_v0, 16  ;;  %v8423_v8 = vrot.slane %v8421_v23, 1  ;;  %v15180_v21 = vpop.trf.xlu1 }
 0x5ea   : > { %v8426_v18 = vshll.u32 %v16989_v14, 16  ;;  %v6960_v60 = vrot.slane %v6958_v11, 7  ;;  %v8432_v13 = vshll.u32 %v16976_v47, 16  ;;  %v8437_v30 = vshll.u32 %v16995_v38, 16 }
 0x5eb   : > { %18601 = vst [vmem:[#allocation24_spill] sm:$0xff] %v16980_v26  ;;  %v6942_v54 = vor.u32 %v6940_v27, %v16980_v26  ;;  %v8413_v6 = vor.u32 %v8412_v51, %v8408_v41  ;;  %v6953_v10 = vrot.slane %v6951_v29, 7  ;;  %v8424_v42 = vor.u32 %v8423_v8, %v8419_v40 }
 0x5ec   : > { %v8428_v56 = vrot.slane %v8426_v18, 1  ;;  %v8430_v7 = vshrl.u32 %v16976_v47, 16  ;;  %v8434_v0 = vrot.slane %v8432_v13, 1  ;;  %v15179_v27 = vunpack.i.h.bf16 %v15175_v63 }
 0x5ed   : > { %v17007_v31 = vsel %vm8264_vm12, %v8413_v6, %v8417_v1  ;;  %v15176_v41 = vunpack.i.l.bf16 %v15175_v63  ;;  %v17016_v29 = vsel %vm16564_vm11, 0, %v6942_v54  ;;  %v8439_v18 = vrot.slane %v8437_v30, 1 }
 0x5ee   : > { %13640 = vmatmul.mubr.msk.bf16.gmra.mrb[68].mxu1 %vm7213_vm13, %v17007_v31  ;;  %v17012_v11 = vsel %vm8264_vm12, %v8424_v42, %v8428_v56  ;;  %13446 = vmatmul.mubr.msk.bf16.gmra.mrb[72].mxu0 %vm7213_vm13, %v17016_v29  ;;  %v17025_v1 = vsel %vm16564_vm11, 0, %v16864_v3  ;;  %v15184_v13 = vunpack.i.h.bf16 %v15180_v21  ;;  %v8435_v6 = vor.u32 %v8434_v0, %v8430_v7 }
 0x5ef   : > { %18604 = vst [vmem:[#allocation27_spill] sm:$0xff] %v17012_v11  ;;  %13643 = vmatprep.mubr.msk.bf16.mxu1 %vm7213_vm13, %v17012_v11  ;;  %18605 = vst [vmem:[#allocation28_spill] sm:$0xff] %v17025_v1  ;;  %13449 = vmatprep.mubr.msk.bf16.mxu0 %vm7213_vm13, %v17025_v1  ;;  %v15181_v63 = vunpack.i.l.bf16 %v15180_v21  ;;  %v8443_v54 = vshll.u32 %v17025_v1, 16  ;;  %v6968_v40 = vshll.u32 %v16900_v39, 16  ;;  %v6975_v23 = vshll.u32 %v16898_v20, 16 }
 0x5f0   : > { %v17032_v51 = vpack.c.bf16 %v15195_v49, %v15190_v9  ;;  %v6956_v8 = vor.u32 %v6954_v44, %v6953_v10  ;;  %v7000_v30 = vshrl.u32 %v16997_v35, 16  ;;  %v17037_v3 = vsel %vm16564_vm11, %v6953_v10, 0 }
 0x5f1   : > { %v6813_v42 = vpack.c.bf16 %v15181_v63, %v15176_v41  ;;  %18606 = vst [vmem:[#allocation29_spill] sm:$0xff] %v17037_v3  ;;  %v6963_v56 = vor.u32 %v6961_v5, %v6960_v60  ;;  %v18607_v7 = vshrl.u32 %v16900_v39, 16  ;;  %v18608_v0 = vshrl.u32 %v16898_v20, 16 }
 0x5f2   : > { %v17043_v14 = vpack.c.bf16 %v15184_v13, %v15179_v27  ;;  %v17047_v9 = vsel %vm16564_vm11, 0, %v6956_v8  ;;  %v17051_v49 = vsel %vm8264_vm12, %v8435_v6, %v8439_v18  ;;  %v8441_v10 = vshrl.u32 %v17025_v1, 16  ;;  %v15203_v13 = vpop.trf.xlu1 }
 0x5f3   : > { %v6967_v21 = vrot.slane %v18607_v7, 7  ;;  %v6974_v38 = vrot.slane %v18608_v0, 7  ;;  %18609 = vst [vmem:[#allocation30_spill] sm:$0xff] %v17047_v9  ;;  %18610 = vst [vmem:[#allocation31_spill] sm:$0xff] %v17051_v49  ;;  %v8445_v5 = vrot.slane %v8443_v54, 1  ;;  %v8452_v39 = vshrl.u32 %v17047_v9, 16 }
 0x5f4   : > { %v8454_v41 = vshll.u32 %v17047_v9, 16  ;;  %v8459_v20 = vshll.u32 %v17037_v3, 16  ;;  %v17059_v27 = vsel %vm16564_vm11, 0, %v6963_v56  ;;  %v6993_v63 = vshrl.u32 %v17032_v51, 16 }
 0x5f5   : > { %18611 = vst [vmem:[#allocation32_spill] sm:$0xff] %v17059_v27  ;;  %v17063_v18 = vrot.slane %v7000_v30, 7  ;;  %v6979_v6 = vshrl.u32 %v6813_v42, 16  ;;  %v6986_v54 = vshrl.u32 %v17043_v14, 16  ;;  %v8465_v7 = vshll.u32 %v17059_v27, 16 }
 0x5f6   : > { %13644 = vmatmul.mubr.msk.bf16.gmra.mrb[72].mxu1 %vm7213_vm13, %v17051_v49  ;;  %13450 = vmatmul.mubr.msk.bf16.gmra.mrb[76].mxu0 %vm7213_vm13, %v17047_v9  ;;  %v8456_v56 = vrot.slane %v8454_v41, 1  ;;  %v8446_v0 = vor.u32 %v8445_v5, %v8441_v10  ;;  %v17077_v30 = vsel %vm16564_vm11, %v6960_v60, 0  ;;  %v6970_v44 = vor.u32 %v6968_v40, %v6967_v21 }
 0x5f7   : > { %13647 = vmatprep.mubr.msk.bf16.mxu1 %vm7213_vm13, %v16619_v12  ;;  %13453 = vmatprep.mubr.msk.bf16.mxu0 %vm7213_vm13, %v17059_v27  ;;  %18612 = vst [vmem:[#allocation33_spill] sm:$0xff] %v17077_v30  ;;  %v6989_v8 = vshll.u32 %v17043_v14, 16  ;;  %v8461_v1 = vrot.slane %v8459_v20, 1  ;;  %v6977_v12 = vor.u32 %v6975_v23, %v6974_v38  ;;  %v6981_v47 = vrot.slane %v6979_v6, 7 }
 0x5f8   : > { %v8457_v3 = vor.u32 %v8456_v56, %v8452_v39  ;;  %v6982_v49 = vshll.u32 %v6813_v42, 16  ;;  %v17082_v41 = vsel %vm16564_vm11, 0, %v6970_v44  ;;  %v17086_v10 = vsel %vm16564_vm11, %v6967_v21, 0  ;;  %v15208_v39 = vpop.trf.xlu1 }
 0x5f9   : > { %18613 = vst [vmem:[#allocation34_spill] sm:$0xff] %v17082_v41  ;;  %18614 = vst [vmem:[#allocation35_spill] sm:$0xff] %v17086_v10  ;;  %v8463_v5 = vshrl.u32 %v17059_v27, 16  ;;  %v8467_v60 = vrot.slane %v8465_v7, 1  ;;  %v8470_v40 = vshll.u32 %v17077_v30, 16  ;;  %v8476_v14 = vshll.u32 %v17082_v41, 16 }
 0x5fa   : > { %v6988_v20 = vrot.slane %v6986_v54, 7  ;;  %v17093_v23 = vsel %vm8264_vm12, %v8446_v0, %v16904_v16  ;;  %v17096_v42 = vsel %vm8264_vm12, %v8457_v3, %v8461_v1  ;;  %v15204_v44 = vunpack.i.l.bf16 %v15203_v13 }
 0x5fb   : > { %18615 = vst [vmem:[#allocation36_spill] sm:$0xff] %v17093_v23  ;;  %18616 = vst [vmem:[#allocation37_spill] sm:$0xff] %v17096_v42  ;;  %v8481_v21 = vshll.u32 %v17086_v10, 16  ;;  %v17101_v6 = vsel %vm16564_vm11, 0, %v6977_v12  ;;  %v8474_v56 = vshrl.u32 %v17082_v41, 16  ;;  %v8478_v54 = vrot.slane %v8476_v14, 1 }
 0x5fc   : > { %v15209_v7 = vunpack.i.l.bf16 %v15208_v39  ;;  %v6984_v30 = vor.u32 %v6982_v49, %v6981_v47  ;;  %v8468_v16 = vor.u32 %v8467_v60, %v8463_v5  ;;  %v8472_v1 = vrot.slane %v8470_v40, 1  ;;  %v17128_v40 = vpop.trf.xlu1 }
 0x5fd   : > { %v15207_v3 = vunpack.i.h.bf16 %v15203_v13  ;;  %v15212_v0 = vunpack.i.h.bf16 %v15208_v39  ;;  %v6995_v12 = vrot.slane %v6993_v63, 7  ;;  %v17114_v10 = vsel %vm16564_vm11, %v6974_v38, 0 }
 0x5fe   : > { %13648 = vmatmul.mubr.msk.bf16.gmra.mrb[76].mxu1 %vm7213_vm13, %v17093_v23  ;;  %13454 = vmatmul.mubr.msk.bf16.gmra.mrb[80].mxu0 %vm7213_vm13, %v17082_v41  ;;  %18617 = vst [vmem:[#allocation38_spill] sm:$0xff] %v17114_v10  ;;  %v8487_v49 = vshll.u32 %v17101_v6, 16  ;;  %v17119_v14 = vsel %vm16564_vm11, 0, %v6984_v30  ;;  %v15221_v13 = vunpack.i.h.bf16 %v16847_v33  ;;  %v15218_v5 = vunpack.i.l.bf16 %v16847_v33 }
 0x5ff   : > { %13651 = vmatprep.mubr.msk.bf16.mxu1 %vm7213_vm13, %v17096_v42  ;;  %13457 = vmatprep.mubr.msk.bf16.mxu0 %vm7213_vm13, %v17101_v6  ;;  %v15223_v60 = vunpack.i.l.bf16 %v16893_v52  ;;  %v17126_v63 = vsel %vm16564_vm11, %v6981_v47, 0  ;;  %v8479_v38 = vor.u32 %v8478_v54, %v8474_v56  ;;  %v8483_v39 = vrot.slane %v8481_v21, 1 }
 0x600   : > { %18618 = vst [vmem:[#allocation39_spill] sm:$0xff] %v17126_v63  ;;  %v6817_v41 = vpack.c.bf16 %v15209_v7, %v15204_v44  ;;  %v8498_v27 = vshll.u32 %v17119_v14, 16  ;;  %v17132_v30 = vsel %vm8264_vm12, %v8468_v16, %v8472_v1  ;;  %v17134_v42 = vpack.c.bf16 %v15212_v0, %v15207_v3  ;;  %v15236_v3 = vpop.trf.xlu1 }
 0x601   : > { %v8492_v33 = vshll.u32 %v17114_v10, 16  ;;  %v6991_v9 = vor.u32 %v6989_v8, %v6988_v20  ;;  %v8485_v23 = vshrl.u32 %v17101_v6, 16  ;;  %v8489_v11 = vrot.slane %v8487_v49, 1 }
 0x602   : > { %v8496_v47 = vshrl.u32 %v17119_v14, 16  ;;  %v8503_v26 = vshll.u32 %v17126_v63, 16  ;;  %v8500_v56 = vrot.slane %v8498_v27, 1  ;;  %v15226_v21 = vunpack.i.h.bf16 %v16893_v52 }
 0x603   : > { %v17142_v44 = vsel %vm16564_vm11, 0, %v6991_v9  ;;  %v6819_v54 = vpack.c.bf16 %v15223_v60, %v15218_v5  ;;  %v17148_v8 = vsel %vm8264_vm12, %v8479_v38, %v8483_v39  ;;  %v7007_v7 = vshrl.u32 %v6817_v41, 16 }
 0x604   : > { %18619 = vst [vmem:[#allocation40_spill] sm:$0xff] %v17142_v44  ;;  %v7010_v16 = vshll.u32 %v6817_v41, 16  ;;  %v7014_v27 = vshrl.u32 %v17134_v42, 16  ;;  %v8494_v1 = vrot.slane %v8492_v33, 1  ;;  %v18620_v52 = vshll.u32 %v17032_v51, 16 }
 0x605   : > { %v8490_v0 = vor.u32 %v8489_v11, %v8485_v23  ;;  %v17161_v49 = vsel %vm16564_vm11, %v6988_v20, 0  ;;  %v8509_v41 = vshll.u32 %v17142_v44, 16  ;;  %v8501_v5 = vor.u32 %v8500_v56, %v8496_v47 }
 0x606   : > { %13652 = vmatmul.mubr.msk.bf16.gmra.mrb[80].mxu1 %vm7213_vm13, %v17132_v30  ;;  %13458 = vmatmul.mubr.msk.bf16.gmra.mrb[84].mxu0 %vm7213_vm13, %v17119_v14  ;;  %v6998_v9 = vor.u32 %v18620_v52, %v6995_v12  ;;  %18621 = vst [vmem:[#allocation41_spill] sm:$0xff] %v17161_v49  ;;  %v8505_v60 = vrot.slane %v8503_v26, 1  ;;  %v7009_v39 = vrot.slane %v7007_v7, 7  ;;  %v17170_v51 = vsel %vm16564_vm11, %v6995_v12, 0 }
 0x607   : > { %13655 = vmatprep.mubr.msk.bf16.mxu1 %vm7213_vm13, %v17148_v8  ;;  %13461 = vmatprep.mubr.msk.bf16.mxu0 %vm7213_vm13, %v17142_v44  ;;  %18623 = vst [vmem:[#allocation43_spill] sm:$0xff] %v17170_v51  ;;  %v18624_v23 = vshll.u32 %v16997_v35, 16  ;;  %v17176_v33 = vpack.c.bf16 %v15226_v21, %v15221_v13  ;;  %v7021_v52 = vshrl.u32 %v6819_v54, 16  ;;  %v15232_v26 = vunpack.i.l.bf16 %v17128_v40 }
 0x608   : > { %v17166_v38 = vsel %vm16564_vm11, 0, %v6998_v9  ;;  %v15237_v47 = vunpack.i.l.bf16 %v15236_v3  ;;  %v7017_v56 = vshll.u32 %v17134_v42, 16  ;;  %v8507_v7 = vshrl.u32 %v17142_v44, 16 }
 0x609   : > { %18622 = vst [vmem:[#allocation42_spill] sm:$0xff] %v17166_v38  ;;  %v8520_v11 = vshll.u32 %v17166_v38, 16  ;;  %v7005_v20 = vor.u32 %v18624_v23, %v17063_v18  ;;  %v8511_v9 = vrot.slane %v8509_v41, 1  ;;  %v8514_v12 = vshll.u32 %v17161_v49, 16 }
 0x60a   : > { %v7016_v63 = vrot.slane %v7014_v27, 7  ;;  %v17183_v10 = vsel %vm8264_vm12, %v8490_v0, %v8494_v1  ;;  %v17186_v35 = vsel %vm8264_vm12, %v8501_v5, %v8505_v60  ;;  %v8525_v13 = vshll.u32 %v17170_v51, 16 }
 0x60b   : > { %v8518_v21 = vshrl.u32 %v17166_v38, 16  ;;  %v8522_v42 = vrot.slane %v8520_v11, 1  ;;  %v17194_v41 = vsel %vm16564_vm11, 0, %v7005_v20  ;;  %v7012_v23 = vor.u32 %v7010_v16, %v7009_v39 }
 0x60c   : > { %18625 = vst [vmem:[#allocation44_spill] sm:$0xff] %v17194_v41  ;;  %v7023_v27 = vrot.slane %v7021_v52, 7  ;;  %v7024_v49 = vshll.u32 %v6819_v54, 16  ;;  %v15235_v1 = vunpack.i.h.bf16 %v17128_v40  ;;  %v6821_v0 = vpack.c.bf16 %v15237_v47, %v15232_v26 }
 0x60d   : > { %v8512_v5 = vor.u32 %v8511_v9, %v8507_v7  ;;  %v8516_v60 = vrot.slane %v8514_v12, 1  ;;  %v15240_v11 = vunpack.i.h.bf16 %v15236_v3  ;;  %v17205_v16 = vsel %vm16564_vm11, 0, %v7012_v23  ;;  %v6776_v12 = vpop.trf.xlu1 }
 0x60e   : > { %13656 = vmatmul.mubr.msk.bf16.gmra.mrb[84].mxu1 %vm7213_vm13, %v17183_v10  ;;  %13462 = vmatmul.mubr.msk.bf16.gmra.mrb[88].mxu0 %vm7213_vm13, %v17166_v38  ;;  %18626 = vst [vmem:[#allocation45_spill] sm:$0xff] %v17205_v16  ;;  %v7028_v54 = vshrl.u32 %v17176_v33, 16  ;;  %v8527_v20 = vrot.slane %v8525_v13, 1  ;;  %v8531_v52 = vshll.u32 %v17194_v41, 16  ;;  %v7019_v40 = vor.u32 %v7017_v56, %v7016_v63 }
 0x60f   : > { %13659 = vmatprep.mubr.msk.bf16.mxu1 %vm7213_vm13, %v17186_v35  ;;  %13465 = vmatprep.mubr.msk.bf16.mxu0 %vm7213_vm13, %v17194_v41  ;;  %v8523_v51 = vor.u32 %v8522_v42, %v8518_v21  ;;  %v17212_v26 = vsel %vm16564_vm11, %v17063_v18, 0  ;;  %v17216_v47 = vsel %vm16564_vm11, %v7009_v39, 0  ;;  %v8542_v3 = vshll.u32 %v17205_v16, 16 }
 0x610   : > { %18627 = vst [vmem:[#allocation46_spill] sm:$0xff] %v17212_v26  ;;  %18628 = vst [vmem:[#allocation47_spill] sm:$0xff] %v17216_v47  ;;  %v7035_v7 = vshrl.u32 %v6821_v0, 16  ;;  %v7026_v9 = vor.u32 %v7024_v49, %v7023_v27  ;;  %v7031_v13 = vshll.u32 %v17176_v33, 16  ;;  %v17221_v23 = vsel %vm8264_vm12, %v8512_v5, %v8516_v60 }
 0x611   : > { %v6822_v56 = vpack.c.bf16 %v15240_v11, %v15235_v1  ;;  %v8529_v21 = vshrl.u32 %v17194_v41, 16  ;;  %v8533_v42 = vrot.slane %v8531_v52, 1  ;;  %v8536_v18 = vshll.u32 %v17212_v26, 16 }
 0x612   : > { %v8547_v38 = vshll.u32 %v17216_v47, 16  ;;  %v17228_v39 = vsel %vm16564_vm11, 0, %v7019_v40  ;;  %v7030_v44 = vrot.slane %v7028_v54, 7  ;;  %v17233_v49 = vsel %vm8264_vm12, %v8523_v51, %v8527_v20 }
 0x613   : > { %18629 = vst [vmem:[#allocation48_spill] sm:$0xff] %v17228_v39  ;;  %18630 = vst [vmem:[#allocation49_spill] sm:$0xff] %v17233_v49  ;;  %v8540_v33 = vshrl.u32 %v17205_v16, 16  ;;  %v8544_v1 = vrot.slane %v8542_v3, 1  ;;  %v7037_v5 = vrot.slane %v7035_v7, 7  ;;  %v7038_v60 = vshll.u32 %v6821_v0, 16  ;;  %v6777_v0 = vpop.trf.xlu1 }
 0x614   : > { %v17242_v11 = vsel %vm16564_vm11, 0, %v7026_v9  ;;  %v7042_v54 = vshrl.u32 %v6822_v56, 16  ;;  %v8553_v51 = vshll.u32 %v17228_v39, 16  ;;  %v8534_v20 = vor.u32 %v8533_v42, %v8529_v21 }
 0x615   : > { %18631 = vst [vmem:[#allocation50_spill] sm:$0xff] %v17242_v11  ;;  %v8538_v52 = vrot.slane %v8536_v18, 1  ;;  %v8549_v40 = vrot.slane %v8547_v38, 1  ;;  %v17249_v3 = vsel %vm16564_vm11, %v7016_v63, 0  ;;  %v8545_v7 = vor.u32 %v8544_v1, %v8540_v33 }
 0x616   : > { %13660 = vmatmul.mubr.msk.bf16.gmra.mrb[88].mxu1 %vm7213_vm13, %v17221_v23  ;;  %13466 = vmatmul.mubr.msk.bf16.gmra.mrb[92].mxu0 %vm7213_vm13, %v17205_v16  ;;  %18632 = vst [vmem:[#allocation51_spill] sm:$0xff] %v17249_v3  ;;  %v17253_v47 = vsel %vm16564_vm11, %v7023_v27, 0  ;;  %v8564_v9 = vshll.u32 %v17242_v11, 16  ;;  %v7033_v26 = vor.u32 %v7031_v13, %v7030_v44  ;;  %v7040_v16 = vor.u32 %v7038_v60, %v7037_v5 }
 0x617   : > { %13663 = vmatprep.mubr.msk.bf16.mxu1 %vm7213_vm13, %v17233_v49  ;;  %13469 = vmatprep.mubr.msk.bf16.mxu0 %vm7213_vm13, %v17228_v39  ;;  %18633 = vst [vmem:[#allocation52_spill] sm:$0xff] %v17253_v47  ;;  %v8551_v41 = vshrl.u32 %v17228_v39, 16  ;;  %v8555_v49 = vrot.slane %v8553_v51, 1  ;;  %v8558_v21 = vshll.u32 %v17249_v3, 16  ;;  %v6823_v38 = vpack.c.bf16 %v6777_v0, %v6776_v12  ;;  %v18659_v3 = vld [vmem:[#allocation44_spill] sm:$0xff] }
 0x618   : > { %v7044_v42 = vrot.slane %v7042_v54, 7  ;;  %v7045_v18 = vshll.u32 %v6822_v56, 16  ;;  %v17259_v63 = vsel %vm8264_vm12, %v8534_v20, %v8538_v52  ;;  %v8569_v33 = vshll.u32 %v17253_v47, 16  ;;  %v18652_v47 = vld [vmem:[#allocation30_spill] sm:$0xff] }
 0x619   : > { %v17265_v27 = vsel %vm8264_vm12, %v8545_v7, %v8549_v40  ;;  %v8562_v13 = vshrl.u32 %v17242_v11, 16  ;;  %v8566_v1 = vrot.slane %v8564_v9, 1  ;;  %v17270_v60 = vsel %vm16564_vm11, 0, %v7033_v26 }
 0x61a   : > { %v17278_v12 = vsel %vm16564_vm11, 0, %v7040_v16  ;;  %v8556_v56 = vor.u32 %v8555_v49, %v8551_v41  ;;  %v8560_v54 = vrot.slane %v8558_v21, 1  ;;  %v7049_v51 = vshrl.u32 %v6823_v38, 16 }
 0x61b   : > { %18634 = vst [vmem:[#allocation53_spill] sm:$0xff] %v17278_v12  ;;  %v7612_v26 = vsel %vm7310_vm8, %v16731_v59, 0  ;;  %v8571_v20 = vrot.slane %v8569_v33, 1  ;;  %v17286_v52 = vsel %vm16564_vm11, %v7030_v44, 0  ;;  %v8575_v40 = vshll.u32 %v17270_v60, 16 }
 0x61c   : > { %18635 = vst [vmem:[#allocation54_spill] sm:$0xff] %v17286_v52  ;;  %13482 = vmatpush3.bf16.msra.mxu0 %v7612_v26  ;;  %v8567_v0 = vor.u32 %v8566_v1, %v8562_v13  ;;  %v17291_v41 = vsel %vm16564_vm11, %v7037_v5, 0  ;;  %v8586_v16 = vshll.u32 %v17278_v12, 16  ;;  %v7047_v49 = vor.u32 %v7045_v18, %v7044_v42 }
 0x61d   : > { %18636 = vst [vmem:[#allocation55_spill] sm:$0xff] %v17291_v41  ;;  %v17295_v7 = vsel %vm8264_vm12, %v8556_v56, %v8560_v54  ;;  %v17297_v59 = vrot.slane %v7049_v51, 7  ;;  %v7052_v9 = vshll.u32 %v6823_v38, 16  ;;  %v8573_v44 = vshrl.u32 %v17270_v60, 16 }
 0x61e   : > { %13664 = vmatmul.mubr.msk.bf16.gmra.mrb[92].mxu1 %vm7213_vm13, %v17259_v63  ;;  %13470 = vmatmul.mubr.msk.bf16.gmra.mrb[96].mxu0 %vm7213_vm13, %v17242_v11  ;;  %18637 = vst [vmem:[#allocation56_spill] sm:$0xff] %v17295_v7  ;;  %v8577_v21 = vrot.slane %v8575_v40, 1  ;;  %v8580_v33 = vshll.u32 %v17286_v52, 16  ;;  %v8591_v13 = vshll.u32 %v17291_v41, 16  ;;  %v17305_v5 = vsel %vm8264_vm12, %v8567_v0, %v8571_v20 }
 0x61f   : > { %13667 = vmatprep.mubr.msk.bf16.mxu1 %vm7213_vm13, %v17265_v27  ;;  %13473 = vmatprep.mubr.msk.bf16.mxu0 %vm7213_vm13, %v17270_v60  ;;  %18638 = vst [vmem:[#allocation57_spill] sm:$0xff] %v17305_v5  ;;  %v8584_v18 = vshrl.u32 %v17278_v12, 16  ;;  %v8588_v1 = vrot.slane %v8586_v16, 1  ;;  %v17310_v56 = vsel %vm16564_vm11, 0, %v7047_v49  ;;  %v7054_v38 = vor.u32 %v7052_v9, %v17297_v59 }
 0x620   : > { %v8578_v54 = vor.u32 %v8577_v21, %v8573_v44  ;;  %v8582_v51 = vrot.slane %v8580_v33, 1  ;;  %v8597_v26 = vshll.u32 %v17310_v56, 16  ;;  %v8593_v40 = vrot.slane %v8591_v13, 1 }
 0x621   : > { %v8589_v20 = vor.u32 %v8588_v1, %v8584_v18  ;;  %v17322_v0 = vsel %vm16564_vm11, %v7044_v42, 0  ;;  %v17326_v16 = vsel %vm16564_vm11, 0, %v7054_v38  ;;  %v8595_v9 = vshrl.u32 %v17310_v56, 16  ;;  %v15264_v18 = vld [vmem:[%s18456_s5 + $0x10] sm:$0x3f]  }
 0x622   : > { %18639 = vst [vmem:[#allocation58_spill] sm:$0xff] %v17322_v0  ;;  %v17329_v49 = vsel %vm8264_vm12, %v8578_v54, %v8582_v51  ;;  %v8599_v41 = vrot.slane %v8597_v26, 1  ;;  %v8602_v44 = vshll.u32 %v17322_v0, 16  ;;  %14809 = vmatprep.subr.msk.bf16.mxu0 %vm7310_vm8, %v15264_v18  ;;  %v15268_v1 = vld [vmem:[%s18456_s5 + $0x28] sm:$0x3f]   ;;  %v18641_v54 = vld [vmem:[#allocation16_spill] sm:$0xff] }
 0x623   : > { %18640 = vst [vmem:[#allocation59_spill] sm:$0xff] %v17329_v49  ;;  %v17336_v21 = vsel %vm8264_vm12, %v8589_v20, %v8593_v40  ;;  %v17367_v38 = vld [vmem:[%s18456_s5 + $0x30] sm:$0x3f]   ;;  %v18642_v51 = vld [vmem:[#allocation22_spill] sm:$0xff]  ;;  %v9062_v40 = vshll.u32 %v17016_v29, 16 }
 0x624   : > { %v8600_v42 = vor.u32 %v8599_v41, %v8595_v9  ;;  %v8604_v33 = vrot.slane %v8602_v44, 1  ;;  %v7909_v41 = vsel %vm7310_vm8, %v15264_v18, 0  ;;  %v18643_v26 = vld [vmem:[#allocation18_spill] sm:$0xff]  ;;  %v18644_v20 = vld [vmem:[#allocation20_spill] sm:$0xff] }
 0x625   : > { %v18645_v9 = vld [vmem:[#allocation24_spill] sm:$0xff]  ;;  %v9064_v18 = vrot.slane %v9062_v40, 1 }
 0x626   : > { %13668 = vmatmul.mubr.msk.bf16.gmra.mrb[96].mxu1 %vm7213_vm13, %v17295_v7  ;;  %13474 = vmatmul.mubr.msk.bf16.gmra.mrb[100].mxu0 %vm7213_vm13, %v17278_v12  ;;  %v17345_v13 = vsel %vm8264_vm12, %v8600_v42, %v8604_v33  ;;  %v17423_v44 = vsel %vm16564_vm11, %v18645_v9, 0  ;;  %v9060_v33 = vshrl.u32 %v17016_v29, 16  ;;  %v18650_v40 = vld [vmem:[#allocation36_spill] sm:$0xff] }
 0x627   : > { %13671 = vmatprep.mubr.msk.bf16.mxu1 %vm7213_vm13, %v17305_v5  ;;  %13477 = vmatprep.mubr.msk.bf16.mxu0 %vm7213_vm13, %v17310_v56  ;;  %18646 = vst [vmem:[#allocation16_spill] sm:$0xff] %v17423_v44  ;;  %v9067_v42 = vshll.u32 %v17423_v44, 16  ;;  %v18651_v44 = vld [vmem:[#allocation28_spill] sm:$0xff] }
 0x628   : > { %v9065_v52 = vor.u32 %v9064_v18, %v9060_v33  ;;  %v18656_v33 = vld [vmem:[#allocation40_spill] sm:$0xff]  ;;  %v18657_v18 = vld [vmem:[#allocation42_spill] sm:$0xff] }
 0x629   : > { %v9069_v0 = vrot.slane %v9067_v42, 1  ;;  %v18653_v42 = vld [vmem:[#allocation37_spill] sm:$0xff] }
 0x62b   : > { %v17436_v9 = vsel %vm8264_vm12, %v9065_v52, %v9069_v0  ;;  %v18654_v52 = vld [vmem:[#allocation32_spill] sm:$0xff]  ;;  %v18655_v0 = vld [vmem:[#allocation34_spill] sm:$0xff] }
 0x62e   : > { %13672 = vmatmul.mubr.msk.bf16.gmra.mrb[100].mxu1 %vm7213_vm13, %v17329_v49  ;;  %13478 = vmatmul.mubr.msk.bf16.gmra.mrb[104].mxu0 %vm7213_vm13, %v17326_v16 }
 0x62f   : > { %13675 = vmatprep.mubr.msk.bf16.mxu1 %vm7213_vm13, %v17336_v21  ;;  %13483 = vmatprep.mubr.msk.bf16.mxu0 %vm7213_vm13, %v16591_v37 }
 0x636   : > { %13676 = vmatmul.mubr.msk.bf16.gmra.mrb[104].mxu1 %vm7213_vm13, %v17345_v13  ;;  %13484 = vmatmul.mubr.msk.bf16.vlgmr.msra.gmra.mrb[44].mxu0 %vm7213_vm13, %v16636_v4  ;;  %v9073_v4 = vshll.u32 %v17326_v16, 16 }
 0x637   : > { %13681 = vmatprep.mubr.msk.bf16.mxu1 %vm7213_vm13, %v16662_v43  ;;  %13487 = vmatprep.mubr.msk.bf16.mxu0 %vm7213_vm13, %v16647_v62  ;;  %v9455_v43 = vsel %vm7310_vm8, %v15268_v1, 0  ;;  %v18648_v1 = vld [vmem:[#allocation31_spill] sm:$0xff] }
 0x638   : > { %13548 = vmatpush3.bf16.msra.mxu0 %v7909_v41  ;;  %v18647_v41 = vld [vmem:[#allocation27_spill] sm:$0xff] }
 0x63e   : > { %13682 = vmatmul.mubr.msk.bf16.vlgmr.msra.gmra.mrb[44].mxu1 %vm7213_vm13, %v16707_v50  ;;  %13488 = vmatmul.mubr.msk.bf16.gmra.mrb[48].mxu0 %vm7213_vm13, %v16655_v22 }
 0x63f   : > { %13746 = vmatpush3.bf16.msra.mxu1 %v9455_v43  ;;  %13685 = vmatprep.mubr.msk.bf16.mxu1 %vm7213_vm13, %v16724_v46  ;;  %v18649_v43 = vld [vmem:[#allocation23_spill] sm:$0xff] }
 0x640   : > { %14813 = vmatprep.subr.msk.bf16.mxu1 %vm7310_vm8, %v17367_v38  ;;  %13491 = vmatprep.mubr.msk.bf16.mxu0 %vm7213_vm13, %v16681_v55 }
 0x646   : > { %13686 = vmatmul.mubr.msk.bf16.gmra.mrb[48].mxu1 %vm7213_vm13, %v16766_v17  ;;  %13492 = vmatmul.mubr.msk.bf16.gmra.mrb[52].mxu0 %vm7213_vm13, %v16696_v19 }
 0x647   : > { %13689 = vmatprep.mubr.msk.bf16.mxu1 %vm7213_vm13, %v16793_v58  ;;  %13495 = vmatprep.mubr.msk.bf16.mxu0 %vm7213_vm13, %v16742_v53 }
 0x64e   : > { %13690 = vmatmul.mubr.msk.bf16.gmra.mrb[52].mxu1 %vm7213_vm13, %v16800_v48  ;;  %13496 = vmatmul.mubr.msk.bf16.gmra.mrb[56].mxu0 %vm7213_vm13, %v16760_v25 }
 0x64f   : > { %13693 = vmatprep.mubr.msk.bf16.mxu1 %vm7213_vm13, %v16839_v32  ;;  %13499 = vmatprep.mubr.msk.bf16.mxu0 %vm7213_vm13, %v16804_v15 }
 0x656   : > { %13694 = vmatmul.mubr.msk.bf16.gmra.mrb[56].mxu1 %vm7213_vm13, %v16860_v36  ;;  %13500 = vmatmul.mubr.msk.bf16.gmra.mrb[60].mxu0 %vm7213_vm13, %v16822_v24 }
 0x657   : > { %13697 = vmatprep.mubr.msk.bf16.mxu1 %vm7213_vm13, %v16907_v2  ;;  %13503 = vmatprep.mubr.msk.bf16.mxu0 %vm7213_vm13, %v16853_v61 }
 0x65e   : > { %13698 = vmatmul.mubr.msk.bf16.gmra.mrb[60].mxu1 %vm7213_vm13, %v16921_v45  ;;  %13504 = vmatmul.mubr.msk.bf16.gmra.mrb[64].mxu0 %vm7213_vm13, %v16874_v28 }
 0x65f   : > { %13701 = vmatprep.mubr.msk.bf16.mxu1 %vm7213_vm13, %v16946_v34  ;;  %13507 = vmatprep.mubr.msk.bf16.mxu0 %vm7213_vm13, %v18641_v54 }
 0x666   : > { %13702 = vmatmul.mubr.msk.bf16.gmra.mrb[64].mxu1 %vm7213_vm13, %v18642_v51  ;;  %13508 = vmatmul.mubr.msk.bf16.gmra.mrb[68].mxu0 %vm7213_vm13, %v18643_v26 }
 0x667   : > { %13705 = vmatprep.mubr.msk.bf16.mxu1 %vm7213_vm13, %v17007_v31  ;;  %13511 = vmatprep.mubr.msk.bf16.mxu0 %vm7213_vm13, %v18644_v20 }
 0x66e   : > { %13706 = vmatmul.mubr.msk.bf16.gmra.mrb[68].mxu1 %vm7213_vm13, %v18647_v41  ;;  %13512 = vmatmul.mubr.msk.bf16.gmra.mrb[72].mxu0 %vm7213_vm13, %v18649_v43 }
 0x66f   : > { %13709 = vmatprep.mubr.msk.bf16.mxu1 %vm7213_vm13, %v18648_v1  ;;  %13515 = vmatprep.mubr.msk.bf16.mxu0 %vm7213_vm13, %v16591_v37 }
 0x676   : > { %13710 = vmatmul.mubr.msk.bf16.gmra.mrb[72].mxu1 %vm7213_vm13, %v17436_v9  ;;  %13516 = vmatmul.mubr.msk.bf16.gmra.mrb[76].mxu0 %vm7213_vm13, %v18651_v44  ;;  %v18660_v44 = vld [vmem:[#allocation45_spill] sm:$0xff] }
 0x677   : > { %13713 = vmatprep.mubr.msk.bf16.mxu1 %vm7213_vm13, %v18650_v40  ;;  %13519 = vmatprep.mubr.msk.bf16.mxu0 %vm7213_vm13, %v18652_v47  ;;  %v18658_v40 = vld [vmem:[#allocation49_spill] sm:$0xff] }
 0x67e   : > { %13714 = vmatmul.mubr.msk.bf16.gmra.mrb[76].mxu1 %vm7213_vm13, %v18653_v42  ;;  %13520 = vmatmul.mubr.msk.bf16.gmra.mrb[80].mxu0 %vm7213_vm13, %v18654_v52 }
 0x67f   : > { %13717 = vmatprep.mubr.msk.bf16.mxu1 %vm7213_vm13, %v17132_v30  ;;  %13523 = vmatprep.mubr.msk.bf16.mxu0 %vm7213_vm13, %v18655_v0 }
 0x686   : > { %13718 = vmatmul.mubr.msk.bf16.gmra.mrb[80].mxu1 %vm7213_vm13, %v17148_v8  ;;  %13524 = vmatmul.mubr.msk.bf16.gmra.mrb[84].mxu0 %vm7213_vm13, %v17101_v6 }
 0x687   : > { %13721 = vmatprep.mubr.msk.bf16.mxu1 %vm7213_vm13, %v17183_v10  ;;  %13527 = vmatprep.mubr.msk.bf16.mxu0 %vm7213_vm13, %v17119_v14 }
 0x68e   : > { %13722 = vmatmul.mubr.msk.bf16.gmra.mrb[84].mxu1 %vm7213_vm13, %v17186_v35  ;;  %13528 = vmatmul.mubr.msk.bf16.gmra.mrb[88].mxu0 %vm7213_vm13, %v18656_v33 }
 0x68f   : > { %13725 = vmatprep.mubr.msk.bf16.mxu1 %vm7213_vm13, %v17221_v23  ;;  %13531 = vmatprep.mubr.msk.bf16.mxu0 %vm7213_vm13, %v18657_v18 }
 0x696   : > { %13726 = vmatmul.mubr.msk.bf16.gmra.mrb[88].mxu1 %vm7213_vm13, %v18658_v40  ;;  %13532 = vmatmul.mubr.msk.bf16.gmra.mrb[92].mxu0 %vm7213_vm13, %v18659_v3 }
 0x697   : > { %13729 = vmatprep.mubr.msk.bf16.mxu1 %vm7213_vm13, %v17259_v63  ;;  %13535 = vmatprep.mubr.msk.bf16.mxu0 %vm7213_vm13, %v18660_v44 }
 0x69e   : > { %13730 = vmatmul.mubr.msk.bf16.gmra.mrb[92].mxu1 %vm7213_vm13, %v17265_v27  ;;  %13536 = vmatmul.mubr.msk.bf16.gmra.mrb[96].mxu0 %vm7213_vm13, %v17228_v39  ;;  %v9075_v39 = vrot.slane %v9073_v4, 1  ;;  %v10065_v4 = vsel %vm7310_vm8, %v17367_v38, 0 }
 0x69f   : > { %13733 = vmatprep.mubr.msk.bf16.mxu1 %vm7213_vm13, %v17295_v7  ;;  %13539 = vmatprep.mubr.msk.bf16.mxu0 %vm7213_vm13, %v17242_v11  ;;  %v17498_v7 = vsel %vm16564_vm11, %v17297_v59, 0  ;;  %v9882_v59 = vrot.slane %v16655_v22, 1 }
 0x6a0   : > { %v9078_v11 = vshll.u32 %v17498_v7, 16 }
 0x6a6   : > { %13734 = vmatmul.mubr.msk.bf16.gmra.mrb[96].mxu1 %vm7213_vm13, %v17305_v5  ;;  %13540 = vmatmul.mubr.msk.bf16.gmra.mrb[100].mxu0 %vm7213_vm13, %v17270_v60  ;;  %v9071_v5 = vshrl.u32 %v17326_v16, 16 }
 0x6a7   : > { %13737 = vmatprep.mubr.msk.bf16.mxu1 %vm7213_vm13, %v17329_v49  ;;  %13543 = vmatprep.mubr.msk.bf16.mxu0 %vm7213_vm13, %v17278_v12  ;;  %v9080_v49 = vrot.slane %v9078_v11, 1  ;;  %v18671_v11 = vld [vmem:[#allocation5_spill] sm:$0xff] }
 0x6a8   : > { %v9076_v12 = vor.u32 %v9075_v39, %v9071_v5  ;;  %v17526_v39 = vld [vmem:[%s18456_s5 + $0x38] sm:$0x3f]   ;;  %v9885_v5 = vrot.slane %v16681_v55, 1 }
 0x6aa   : > { %v17511_v57 = vsel %vm8264_vm12, %v9076_v12, %v9080_v49  ;;  %v18672_v49 = vld [vmem:[#allocation8_spill] sm:$0xff] }
 0x6ae   : > { %13738 = vmatmul.mubr.msk.bf16.gmra.mrb[100].mxu1 %vm7213_vm13, %v17336_v21  ;;  %13544 = vmatmul.mubr.msk.bf16.gmra.mrb[104].mxu0 %vm7213_vm13, %v17310_v56 }
 0x6af   : > { %13741 = vmatprep.mubr.msk.bf16.mxu1 %vm7213_vm13, %v17345_v13  ;;  %13549 = vmatprep.mubr.msk.bf16.mxu0 %vm7213_vm13, %v16647_v62 }
 0x6b6   : > { %13742 = vmatmul.mubr.msk.bf16.gmra.mrb[104].mxu1 %vm7213_vm13, %v17511_v57  ;;  %13550 = vmatmul.mubr.msk.bf16.vlgmr.msra.gmra.mrb[44].mxu0 %vm7213_vm13, %v16655_v22  ;;  %v9888_v22 = vrot.slane %v16696_v19, 1 }
 0x6b7   : > { %13747 = vmatprep.mubr.msk.bf16.mxu1 %vm7213_vm13, %v16707_v50  ;;  %13553 = vmatprep.mubr.msk.bf16.mxu0 %vm7213_vm13, %v16681_v55  ;;  %v18661_v50 = vld [vmem:[#allocation4_spill] sm:$0xff] }
 0x6be   : > { %13748 = vmatmul.mubr.msk.bf16.vlgmr.msra.gmra.mrb[44].mxu1 %vm7213_vm13, %v16724_v46  ;;  %13554 = vmatmul.mubr.msk.bf16.gmra.mrb[48].mxu0 %vm7213_vm13, %v16696_v19  ;;  %v18662_v46 = vld [vmem:[#allocation48_spill] sm:$0xff]  ;;  %v9894_v19 = vrot.slane %v16760_v25, 1 }
 0x6bf   : > { %13812 = vmatpush3.bf16.msra.mxu1 %v10065_v4  ;;  %13751 = vmatprep.mubr.msk.bf16.mxu1 %vm7213_vm13, %v16766_v17  ;;  %v18663_v17 = vld [vmem:[#allocation50_spill] sm:$0xff] }
 0x6c0   : > { %14814 = vmatprep.subr.msk.bf16.mxu1 %vm7310_vm8, %v17526_v39  ;;  %13557 = vmatprep.mubr.msk.bf16.mxu0 %vm7213_vm13, %v16742_v53 }
 0x6c6   : > { %13752 = vmatmul.mubr.msk.bf16.gmra.mrb[48].mxu1 %vm7213_vm13, %v16793_v58  ;;  %13558 = vmatmul.mubr.msk.bf16.gmra.mrb[52].mxu0 %vm7213_vm13, %v16760_v25  ;;  %v18664_v58 = vld [vmem:[#allocation56_spill] sm:$0xff]  ;;  %v9900_v25 = vrot.slane %v16822_v24, 1 }
 0x6c7   : > { %13755 = vmatprep.mubr.msk.bf16.mxu1 %vm7213_vm13, %v16800_v48  ;;  %13561 = vmatprep.mubr.msk.bf16.mxu0 %vm7213_vm13, %v16804_v15  ;;  %v18665_v48 = vld [vmem:[#allocation57_spill] sm:$0xff] }
 0x6ce   : > { %13756 = vmatmul.mubr.msk.bf16.gmra.mrb[52].mxu1 %vm7213_vm13, %v16839_v32  ;;  %13562 = vmatmul.mubr.msk.bf16.gmra.mrb[56].mxu0 %vm7213_vm13, %v16822_v24  ;;  %v18666_v32 = vld [vmem:[#allocation53_spill] sm:$0xff]  ;;  %v9906_v24 = vrot.slane %v16874_v28, 1 }
 0x6cf   : > { %13759 = vmatprep.mubr.msk.bf16.mxu1 %vm7213_vm13, %v16860_v36  ;;  %13565 = vmatprep.mubr.msk.bf16.mxu0 %vm7213_vm13, %v16853_v61  ;;  %v18667_v36 = vld [vmem:[#allocation59_spill] sm:$0xff] }
 0x6d6   : > { %13760 = vmatmul.mubr.msk.bf16.gmra.mrb[56].mxu1 %vm7213_vm13, %v16907_v2  ;;  %13566 = vmatmul.mubr.msk.bf16.gmra.mrb[60].mxu0 %vm7213_vm13, %v16874_v28  ;;  %v9873_v2 = vrot.slane %v16591_v37, 1  ;;  %v9912_v28 = vrot.slane %v18643_v26, 1 }
 0x6d7   : > { %13763 = vmatprep.mubr.msk.bf16.mxu1 %vm7213_vm13, %v16921_v45  ;;  %13569 = vmatprep.mubr.msk.bf16.mxu0 %vm7213_vm13, %v18641_v54  ;;  %v18668_v45 = vld [vmem:[#allocation2_spill] sm:$0xff] }
 0x6de   : > { %13764 = vmatmul.mubr.msk.bf16.gmra.mrb[60].mxu1 %vm7213_vm13, %v16946_v34  ;;  %13570 = vmatmul.mubr.msk.bf16.gmra.mrb[64].mxu0 %vm7213_vm13, %v18643_v26  ;;  %v9874_v34 = vrot.slane %v18668_v45, 1  ;;  %v18678_v45 = vld [vmem:[#allocation14_spill] sm:$0xff]  ;;  %v9918_v26 = vrot.slane %v18649_v43, 1 }
 0x6df   : > { %13767 = vmatprep.mubr.msk.bf16.mxu1 %vm7213_vm13, %v18642_v51  ;;  %13573 = vmatprep.mubr.msk.bf16.mxu0 %vm7213_vm13, %v18644_v20 }
 0x6e6   : > { %13768 = vmatmul.mubr.msk.bf16.gmra.mrb[64].mxu1 %vm7213_vm13, %v17007_v31  ;;  %13574 = vmatmul.mubr.msk.bf16.gmra.mrb[68].mxu0 %vm7213_vm13, %v18649_v43  ;;  %v17651_v31 = vsel %vm9872_vm14, %v9873_v2, %v9874_v34  ;;  %v9901_v34 = vrot.slane %v18678_v45, 1  ;;  %v18688_v45 = vld [vmem:[#allocation33_spill] sm:$0xff] }
 0x6e7   : > { %13771 = vmatprep.mubr.msk.bf16.mxu1 %vm7213_vm13, %v18647_v41  ;;  %13577 = vmatprep.mubr.msk.bf16.mxu0 %vm7213_vm13, %v17016_v29 }
 0x6ee   : > { %13772 = vmatmul.mubr.msk.bf16.gmra.mrb[68].mxu1 %vm7213_vm13, %v18648_v1  ;;  %13578 = vmatmul.mubr.msk.bf16.gmra.mrb[72].mxu0 %vm7213_vm13, %v16591_v37  ;;  %v18674_v1 = vld [vmem:[#allocation9_spill] sm:$0xff] }
 0x6ef   : > { %13775 = vmatprep.mubr.msk.bf16.mxu1 %vm7213_vm13, %v17436_v9  ;;  %13581 = vmatprep.mubr.msk.bf16.mxu0 %vm7213_vm13, %v18652_v47  ;;  %v9889_v55 = vrot.slane %v18674_v1, 1  ;;  %v9891_v9 = vrot.slane %v16742_v53, 1  ;;  %v9897_v53 = vrot.slane %v16804_v15, 1  ;;  %v9903_v15 = vrot.slane %v16853_v61, 1 }
 0x6f0   : > { %v9909_v61 = vrot.slane %v18641_v54, 1  ;;  %v9915_v54 = vrot.slane %v18644_v20, 1 }
 0x6f6   : > { %13776 = vmatmul.mubr.msk.bf16.gmra.mrb[72].mxu1 %vm7213_vm13, %v18661_v50  ;;  %13582 = vmatmul.mubr.msk.bf16.gmra.mrb[76].mxu0 %vm7213_vm13, %v18654_v52 }
 0x6f7   : > { %13779 = vmatprep.mubr.msk.bf16.mxu1 %vm7213_vm13, %v18653_v42  ;;  %13585 = vmatprep.mubr.msk.bf16.mxu0 %vm7213_vm13, %v18655_v0  ;;  %v18675_v42 = vld [vmem:[#allocation10_spill] sm:$0xff] }
 0x6fe   : > { %13780 = vmatmul.mubr.msk.bf16.gmra.mrb[76].mxu1 %vm7213_vm13, %v17132_v30  ;;  %13586 = vmatmul.mubr.msk.bf16.gmra.mrb[80].mxu0 %vm7213_vm13, %v17101_v6 }
 0x6ff   : > { %13783 = vmatprep.mubr.msk.bf16.mxu1 %vm7213_vm13, %v17148_v8  ;;  %13589 = vmatprep.mubr.msk.bf16.mxu0 %vm7213_vm13, %v17119_v14  ;;  %v9879_v8 = vrot.slane %v16647_v62, 1 }
 0x706   : > { %13784 = vmatmul.mubr.msk.bf16.gmra.mrb[80].mxu1 %vm7213_vm13, %v17183_v10  ;;  %13590 = vmatmul.mubr.msk.bf16.gmra.mrb[84].mxu0 %vm7213_vm13, %v18656_v33  ;;  %v18669_v10 = vld [vmem:[#allocation3_spill] sm:$0xff] }
 0x707   : > { %13787 = vmatprep.mubr.msk.bf16.mxu1 %vm7213_vm13, %v17186_v35  ;;  %13593 = vmatprep.mubr.msk.bf16.mxu0 %vm7213_vm13, %v18657_v18  ;;  %v9876_v30 = vrot.slane %v18669_v10, 1  ;;  %v18670_v35 = vld [vmem:[#allocation6_spill] sm:$0xff]  ;;  %v18679_v10 = vld [vmem:[#allocation15_spill] sm:$0xff] }
 0x70e   : > { %13788 = vmatmul.mubr.msk.bf16.gmra.mrb[84].mxu1 %vm7213_vm13, %v17221_v23  ;;  %13594 = vmatmul.mubr.msk.bf16.gmra.mrb[88].mxu0 %vm7213_vm13, %v18659_v3  ;;  %v9877_v23 = vrot.slane %v18670_v35, 1 }
 0x70f   : > { %13791 = vmatprep.mubr.msk.bf16.mxu1 %vm7213_vm13, %v18658_v40  ;;  %13597 = vmatprep.mubr.msk.bf16.mxu0 %vm7213_vm13, %v18660_v44  ;;  %v9892_v40 = vrot.slane %v18675_v42, 1  ;;  %v18685_v42 = vld [vmem:[#allocation13_spill] sm:$0xff] }
 0x710   : > { %v17669_v12 = vsel %vm9872_vm14, %v9876_v30, %v9877_v23  ;;  %v9904_v30 = vrot.slane %v18679_v10, 1  ;;  %v18680_v23 = vld [vmem:[#allocation17_spill] sm:$0xff] }
 0x711   : > { %v17704_v4 = vsel %vm9872_vm14, %v9891_v9, %v9892_v40  ;;  %v9922_v40 = vrot.slane %v18685_v42, 1 }
 0x712   : > { %v17732_v35 = vsel %vm9872_vm14, %v9903_v15, %v9904_v30  ;;  %v18689_v15 = vld [vmem:[#allocation35_spill] sm:$0xff] }
 0x713   : > { %v9931_v10 = vrot.slane %v18689_v15, 1 }
 0x716   : > { %13792 = vmatmul.mubr.msk.bf16.gmra.mrb[88].mxu1 %vm7213_vm13, %v17259_v63  ;;  %13598 = vmatmul.mubr.msk.bf16.gmra.mrb[92].mxu0 %vm7213_vm13, %v18662_v46  ;;  %v9880_v63 = vrot.slane %v18671_v11, 1  ;;  %v18681_v11 = vld [vmem:[#allocation19_spill] sm:$0xff] }
 0x717   : > { %13795 = vmatprep.mubr.msk.bf16.mxu1 %vm7213_vm13, %v17265_v27  ;;  %13601 = vmatprep.mubr.msk.bf16.mxu0 %vm7213_vm13, %v18663_v17  ;;  %v17666_v27 = vld [vmem:[%s18456_s5 + $0x40] sm:$0x3f]  }
 0x718   : > { %v17674_v62 = vsel %vm9872_vm14, %v9879_v8, %v9880_v63  ;;  %v17727_v8 = vsel %vm9872_vm14, %v9900_v25, %v9901_v34  ;;  %v9910_v63 = vrot.slane %v18681_v11, 1  ;;  %v9927_v25 = vrot.slane %v18654_v52, 1 }
 0x719   : > { %v9928_v34 = vrot.slane %v18688_v45, 1  ;;  %v9933_v52 = vrot.slane %v17101_v6, 1  ;;  %v18695_v45 = vld [vmem:[#allocation47_spill] sm:$0xff] }
 0x71b   : > { %v17792_v30 = vsel %vm9872_vm14, %v9927_v25, %v9928_v34  ;;  %v9948_v25 = vrot.slane %v18660_v44, 1  ;;  %v9949_v34 = vrot.slane %v18695_v45, 1  ;;  %v9951_v44 = vrot.slane %v18662_v46, 1 }
 0x71e   : > { %13796 = vmatmul.mubr.msk.bf16.gmra.mrb[92].mxu1 %vm7213_vm13, %v18664_v58  ;;  %13602 = vmatmul.mubr.msk.bf16.gmra.mrb[96].mxu0 %vm7213_vm13, %v17270_v60  ;;  %v18677_v58 = vld [vmem:[#allocation12_spill] sm:$0xff] }
 0x71f   : > { %13799 = vmatprep.mubr.msk.bf16.mxu1 %vm7213_vm13, %v18665_v48  ;;  %13605 = vmatprep.mubr.msk.bf16.mxu0 %vm7213_vm13, %v18666_v32  ;;  %v9898_v48 = vrot.slane %v18677_v58, 1 }
 0x721   : > { %v17718_v2 = vsel %vm9872_vm14, %v9897_v53, %v9898_v48  ;;  %v18687_v53 = vld [vmem:[#allocation29_spill] sm:$0xff] }
 0x722   : > { %v9925_v58 = vrot.slane %v18687_v53, 1  ;;  %v18694_v53 = vld [vmem:[#allocation46_spill] sm:$0xff] }
 0x726   : > { %13800 = vmatmul.mubr.msk.bf16.gmra.mrb[96].mxu1 %vm7213_vm13, %v18667_v36  ;;  %13606 = vmatmul.mubr.msk.bf16.gmra.mrb[100].mxu0 %vm7213_vm13, %v17310_v56 }
 0x727   : > { %13803 = vmatprep.mubr.msk.bf16.mxu1 %vm7213_vm13, %v17336_v21  ;;  %13609 = vmatprep.mubr.msk.bf16.mxu0 %vm7213_vm13, %v17326_v16  ;;  %v9886_v21 = vrot.slane %v18672_v49, 1  ;;  %v18682_v49 = vld [vmem:[#allocation21_spill] sm:$0xff] }
 0x729   : > { %v17690_v41 = vsel %vm9872_vm14, %v9885_v5, %v9886_v21  ;;  %v17746_v5 = vsel %vm9872_vm14, %v9909_v61, %v9910_v63  ;;  %v9913_v21 = vrot.slane %v18682_v49, 1  ;;  %v18691_v61 = vld [vmem:[#allocation39_spill] sm:$0xff] }
 0x72a   : > { %v9937_v11 = vrot.slane %v18691_v61, 1  ;;  %v9954_v61 = vrot.slane %v18663_v17, 1  ;;  %v9957_v17 = vrot.slane %v17270_v60, 1 }
 0x72e   : > { %13804 = vmatmul.mubr.msk.bf16.gmra.mrb[100].mxu1 %vm7213_vm13, %v17345_v13  ;;  %13610 = vmatmul.mubr.msk.bf16.gmra.mrb[104].mxu0 %vm7213_vm13, %v16591_v37  ;;  %v10442_v37 = vsel %vm7310_vm8, %v17526_v39, 0  ;;  %v18673_v13 = vld [vmem:[#allocation7_spill] sm:$0xff] }
 0x72f   : > { %13807 = vmatprep.mubr.msk.bf16.mxu1 %vm7213_vm13, %v17511_v57  ;;  %v9883_v38 = vrot.slane %v18673_v13, 1  ;;  %v17699_v57 = vsel %vm9872_vm14, %v9888_v22, %v9889_v55  ;;  %v18676_v39 = vld [vmem:[#allocation11_spill] sm:$0xff]  ;;  %v18683_v13 = vld [vmem:[#allocation25_spill] sm:$0xff]  ;;  %v17755_v22 = vsel %vm9872_vm14, %v9912_v28, %v9913_v21  ;;  %v18684_v55 = vld [vmem:[#allocation26_spill] sm:$0xff] }
 0x730   : > { %v9919_v9 = vrot.slane %v18684_v55, 1  ;;  %v18693_v55 = vld [vmem:[#allocation43_spill] sm:$0xff] }
 0x731   : > { %v17685_v51 = vsel %vm9872_vm14, %v9882_v59, %v9883_v38  ;;  %v9916_v38 = vrot.slane %v18683_v13, 1  ;;  %v18692_v13 = vld [vmem:[#allocation41_spill] sm:$0xff] }
 0x732   : > { %v17767_v20 = vsel %vm9872_vm14, %v9918_v26, %v9919_v9  ;;  %v9942_v26 = vrot.slane %v18657_v18, 1  ;;  %v9943_v9 = vrot.slane %v18693_v55, 1  ;;  %v9945_v18 = vrot.slane %v18659_v3, 1 }
 0x733   : > { %v17760_v1 = vsel %vm9872_vm14, %v9915_v54, %v9916_v38  ;;  %v9940_v38 = vrot.slane %v18692_v13, 1  ;;  %v17861_v3 = vsel %vm9872_vm14, %v9948_v25, %v9949_v34  ;;  %v18699_v25 = vld [vmem:[#allocation55_spill] sm:$0xff] }
 0x734   : > { %v9961_v45 = vrot.slane %v18699_v25, 1 }
 0x736   : > { %13808 = vmatmul.mubr.msk.bf16.gmra.mrb[104].mxu1 %vm7213_vm13, %v18661_v50  ;;  %v9895_v50 = vrot.slane %v18676_v39, 1 }
 0x737   : > { %13813 = vmatprep.mubr.msk.bf16.mxu1 %vm7213_vm13, %v17651_v31 }
 0x738   : > { %v17713_v36 = vsel %vm9872_vm14, %v9894_v19, %v9895_v50  ;;  %v18686_v19 = vld [vmem:[#allocation28_spill] sm:$0xff]  ;;  %v9924_v50 = vrot.slane %v18652_v47, 1  ;;  %v9930_v47 = vrot.slane %v18655_v0, 1  ;;  %v9936_v0 = vrot.slane %v17119_v14, 1 }
 0x739   : > { %v9921_v39 = vrot.slane %v18686_v19, 1  ;;  %v9939_v14 = vrot.slane %v18656_v33, 1  ;;  %v17839_v33 = vsel %vm9872_vm14, %v9942_v26, %v9943_v9 }
 0x73a   : > { %v17783_v48 = vsel %vm9872_vm14, %v9924_v50, %v9925_v58  ;;  %v17817_v6 = vsel %vm9872_vm14, %v9936_v0, %v9937_v11  ;;  %v9946_v58 = vrot.slane %v18694_v53, 1  ;;  %v18697_v11 = vld [vmem:[#allocation52_spill] sm:$0xff] }
 0x73b   : > { %v17778_v43 = vsel %vm9872_vm14, %v9921_v39, %v9922_v40  ;;  %v17832_v19 = vsel %vm9872_vm14, %v9939_v14, %v9940_v38  ;;  %v9955_v14 = vrot.slane %v18697_v11, 1  ;;  %v18700_v11 = vld [vmem:[#allocation58_spill] sm:$0xff] }
 0x73d   : > { %v17883_v46 = vsel %vm9872_vm14, %v9954_v61, %v9955_v14  ;;  %v9964_v14 = vrot.slane %v18700_v11, 1 }
 0x73e   : > { %13814 = vmatmul.mubr.msk.bf16.vlgmr.msra.gmra.mrb[44].mxu1 %vm7213_vm13, %v17669_v12 }
 0x73f   : > { %13878 = vmatpush3.bf16.msra.mxu1 %v10442_v37  ;;  %13817 = vmatprep.mubr.msk.bf16.mxu1 %vm7213_vm13, %v17674_v62  ;;  %v9907_v37 = vrot.slane %v18680_v23, 1  ;;  %v18690_v23 = vld [vmem:[#allocation38_spill] sm:$0xff] }
 0x740   : > { %14815 = vmatprep.subr.msk.bf16.mxu1 %vm7310_vm8, %v17666_v27 }
 0x741   : > { %v17741_v59 = vsel %vm9872_vm14, %v9906_v24, %v9907_v37  ;;  %v17797_v24 = vsel %vm9872_vm14, %v9930_v47, %v9931_v10  ;;  %v9934_v37 = vrot.slane %v18690_v23, 1  ;;  %v17854_v10 = vsel %vm9872_vm14, %v9945_v18, %v9946_v58  ;;  %v18698_v18 = vld [vmem:[#allocation54_spill] sm:$0xff] }
 0x742   : > { %v9958_v53 = vrot.slane %v18698_v18, 1  ;;  %v9960_v58 = vrot.slane %v18666_v32, 1  ;;  %v9963_v32 = vrot.slane %v17310_v56, 1 }
 0x743   : > { %v17810_v49 = vsel %vm9872_vm14, %v9933_v52, %v9934_v37  ;;  %v18696_v37 = vld [vmem:[#allocation51_spill] sm:$0xff] }
 0x744   : > { %v9952_v0 = vrot.slane %v18696_v37, 1  ;;  %v17898_v37 = vsel %vm9872_vm14, %v9957_v17, %v9958_v53  ;;  %v17905_v60 = vsel %vm9872_vm14, %v9960_v58, %v9961_v45  ;;  %v17918_v53 = vsel %vm9872_vm14, %v9963_v32, %v9964_v14 }
 0x745   : > { %v10803_v45 = vsel %vm7310_vm8, %v17666_v27, 0 }
 0x746   : > { %13818 = vmatmul.mubr.msk.bf16.gmra.mrb[48].mxu1 %vm7213_vm13, %v17685_v51  ;;  %v17876_v26 = vsel %vm9872_vm14, %v9951_v44, %v9952_v0 }
 0x747   : > { %13821 = vmatprep.mubr.msk.bf16.mxu1 %vm7213_vm13, %v17690_v41 }
 0x74e   : > { %13822 = vmatmul.mubr.msk.bf16.gmra.mrb[52].mxu1 %vm7213_vm13, %v17699_v57 }
 0x74f   : > { %13825 = vmatprep.mubr.msk.bf16.mxu1 %vm7213_vm13, %v17704_v4 }
 0x756   : > { %13826 = vmatmul.mubr.msk.bf16.gmra.mrb[56].mxu1 %vm7213_vm13, %v17713_v36 }
 0x757   : > { %13829 = vmatprep.mubr.msk.bf16.mxu1 %vm7213_vm13, %v17718_v2 }
 0x75e   : > { %13830 = vmatmul.mubr.msk.bf16.gmra.mrb[60].mxu1 %vm7213_vm13, %v17727_v8 }
 0x75f   : > { %13833 = vmatprep.mubr.msk.bf16.mxu1 %vm7213_vm13, %v17732_v35 }
 0x766   : > { %13834 = vmatmul.mubr.msk.bf16.gmra.mrb[64].mxu1 %vm7213_vm13, %v17741_v59 }
 0x767   : > { %13837 = vmatprep.mubr.msk.bf16.mxu1 %vm7213_vm13, %v17746_v5 }
 0x76e   : > { %13838 = vmatmul.mubr.msk.bf16.gmra.mrb[68].mxu1 %vm7213_vm13, %v17755_v22 }
 0x76f   : > { %13841 = vmatprep.mubr.msk.bf16.mxu1 %vm7213_vm13, %v17760_v1 }
 0x776   : > { %13842 = vmatmul.mubr.msk.bf16.gmra.mrb[72].mxu1 %vm7213_vm13, %v17767_v20 }
 0x777   : > { %13845 = vmatprep.mubr.msk.bf16.mxu1 %vm7213_vm13, %v17651_v31 }
 0x77e   : > { %13846 = vmatmul.mubr.msk.bf16.gmra.mrb[76].mxu1 %vm7213_vm13, %v17778_v43 }
 0x77f   : > { %13849 = vmatprep.mubr.msk.bf16.mxu1 %vm7213_vm13, %v17783_v48 }
 0x786   : > { %13850 = vmatmul.mubr.msk.bf16.gmra.mrb[80].mxu1 %vm7213_vm13, %v17792_v30 }
 0x787   : > { %13853 = vmatprep.mubr.msk.bf16.mxu1 %vm7213_vm13, %v17797_v24 }
 0x789   : > { %v17805_v63 = vpop.f32.mrb[44].mxu0 }
 0x78a   : > { %v17807_v28 = vpop.f32.mrb[45].mxu0 }
 0x78b   : > { %v17812_v21 = vpop.f32.mrb[46].mxu0 }
 0x78c   : > { %v17819_v54 = vpop.f32.mrb[47].mxu0 }
 0x78e   : > { %13854 = vmatmul.mubr.msk.bf16.gmra.mrb[84].mxu1 %vm7213_vm13, %v17810_v49 }
 0x78f   : > { %13857 = vmatprep.mubr.msk.bf16.mxu1 %vm7213_vm13, %v17817_v6 }
 0x791   : > { %v17827_v42 = vpop.f32.mrb[48].mxu0 }
 0x792   : > { %v17829_v40 = vpop.f32.mrb[49].mxu0 }
 0x793   : > { %v17834_v39 = vpop.f32.mrb[50].mxu0 }
 0x794   : > { %v17841_v50 = vpop.f32.mrb[51].mxu0 }
 0x796   : > { %13858 = vmatmul.mubr.msk.bf16.gmra.mrb[88].mxu1 %vm7213_vm13, %v17832_v19 }
 0x797   : > { %13861 = vmatprep.mubr.msk.bf16.mxu1 %vm7213_vm13, %v17839_v33 }
 0x799   : > { %v17849_v47 = vpop.f32.mrb[52].mxu0 }
 0x79a   : > { %v17851_v15 = vpop.f32.mrb[53].mxu0 }
 0x79b   : > { %v17856_v52 = vpop.f32.mrb[54].mxu0 }
 0x79c   : > { %v17863_v23 = vpop.f32.mrb[55].mxu0 }
 0x79e   : > { %13862 = vmatmul.mubr.msk.bf16.gmra.mrb[92].mxu1 %vm7213_vm13, %v17854_v10 }
 0x79f   : > { %13865 = vmatprep.mubr.msk.bf16.mxu1 %vm7213_vm13, %v17861_v3 }
 0x7a1   : > { %v17871_v13 = vpop.f32.mrb[56].mxu0 }
 0x7a2   : > { %v17873_v38 = vpop.f32.mrb[57].mxu0 }
 0x7a3   : > { %v17878_v55 = vpop.f32.mrb[58].mxu0 }
 0x7a4   : > { %v17885_v9 = vpop.f32.mrb[59].mxu0 }
 0x7a6   : > { %13866 = vmatmul.mubr.msk.bf16.gmra.mrb[96].mxu1 %vm7213_vm13, %v17876_v26 }
 0x7a7   : > { %13869 = vmatprep.mubr.msk.bf16.mxu1 %vm7213_vm13, %v17883_v46 }
 0x7a9   : > { %v17893_v34 = vpop.f32.mrb[60].mxu0 }
 0x7aa   : > { %v17895_v44 = vpop.f32.mrb[61].mxu0 }
 0x7ab   : > { %v17900_v0 = vpop.f32.mrb[62].mxu0 }
 0x7ac   : > { %v17907_v61 = vpop.f32.mrb[63].mxu0 }
 0x7ae   : > { %13870 = vmatmul.mubr.msk.bf16.gmra.mrb[100].mxu1 %vm7213_vm13, %v17898_v37 }
 0x7af   : > { %13873 = vmatprep.mubr.msk.bf16.mxu1 %vm7213_vm13, %v17905_v60 }
 0x7b1   : > { %v17913_v18 = vpop.f32.mrb[64].mxu0 }
 0x7b2   : > { %v17915_v17 = vpop.f32.mrb[65].mxu0 }
 0x7b3   : > { %18701 = vst [vmem:[#allocation22_spill] sm:$0xff] %v17915_v17  ;;  %v17920_v25 = vpop.f32.mrb[66].mxu0 }
 0x7b4   : > { %v17924_v58 = vpop.f32.mrb[67].mxu0 }
 0x7b5   : > { %18702 = vst [vmem:[#allocation18_spill] sm:$0xff] %v17924_v58 }
 0x7b6   : > { %13874 = vmatmul.mubr.msk.bf16.gmra.mrb[104].mxu1 %vm7213_vm13, %v17918_v53 }
 0x7b7   : > { %13879 = vmatprep.mubr.msk.bf16.mxu1 %vm7213_vm13, %v17669_v12 }
 0x7b9   : > { %v17928_v56 = vpop.f32.mrb[68].mxu0 }
 0x7ba   : > { %18703 = vst [vmem:[#allocation20_spill] sm:$0xff] %v17928_v56  ;;  %v17932_v11 = vpop.f32.mrb[69].mxu0 }
 0x7bb   : > { %18704 = vst [vmem:[#allocation24_spill] sm:$0xff] %v17932_v11  ;;  %v17934_v17 = vpop.f32.mrb[70].mxu0 }
 0x7bc   : > { %18705 = vst [vmem:[#allocation27_spill] sm:$0xff] %v17934_v17  ;;  %v17938_v32 = vpop.f32.mrb[71].mxu0 }
 0x7bd   : > { %18706 = vst [vmem:[#allocation31_spill] sm:$0xff] %v17938_v32 }
 0x7be   : > { %13880 = vmatmul.mubr.msk.bf16.vlgmr.msra.gmra.mrb[44].mxu1 %vm7213_vm13, %v17674_v62 }
 0x7bf   : > { %13944 = vmatpush3.bf16.msra.mxu1 %v10803_v45  ;;  %13883 = vmatprep.mubr.msk.bf16.mxu1 %vm7213_vm13, %v17685_v51 }
 0x7c1   : > { %v17942_v14 = vpop.f32.mrb[72].mxu0 }
 0x7c2   : > { %18707 = vst [vmem:[#allocation23_spill] sm:$0xff] %v17942_v14  ;;  %v17944_v12 = vpop.f32.mrb[73].mxu0 }
 0x7c3   : > { %18708 = vst [vmem:[#allocation36_spill] sm:$0xff] %v17944_v12  ;;  %v17946_v56 = vpop.f32.mrb[74].mxu0 }
 0x7c4   : > { %18709 = vst [vmem:[#allocation30_spill] sm:$0xff] %v17946_v56  ;;  %v17950_v27 = vpop.f32.mrb[75].mxu0 }
 0x7c5   : > { %18710 = vst [vmem:[#allocation37_spill] sm:$0xff] %v17950_v27 }
 0x7c6   : > { %13884 = vmatmul.mubr.msk.bf16.gmra.mrb[48].mxu1 %vm7213_vm13, %v17690_v41 }
 0x7c7   : > { %13887 = vmatprep.mubr.msk.bf16.mxu1 %vm7213_vm13, %v17699_v57 }
 0x7c9   : > { %v17954_v17 = vpop.f32.mrb[76].mxu0 }
 0x7ca   : > { %18711 = vst [vmem:[#allocation32_spill] sm:$0xff] %v17954_v17  ;;  %v17956_v45 = vpop.f32.mrb[77].mxu0 }
 0x7cb   : > { %18712 = vst [vmem:[#allocation34_spill] sm:$0xff] %v17956_v45  ;;  %v17958_v32 = vpop.f32.mrb[78].mxu0 }
 0x7cc   : > { %18713 = vst [vmem:[#allocation40_spill] sm:$0xff] %v17958_v32  ;;  %v17962_v12 = vpop.f32.mrb[79].mxu0 }
 0x7cd   : > { %18714 = vst [vmem:[#allocation42_spill] sm:$0xff] %v17962_v12 }
 0x7ce   : > { %13888 = vmatmul.mubr.msk.bf16.gmra.mrb[52].mxu1 %vm7213_vm13, %v17704_v4 }
 0x7cf   : > { %13891 = vmatprep.mubr.msk.bf16.mxu1 %vm7213_vm13, %v17713_v36 }
 0x7d1   : > { %v17966_v56 = vpop.f32.mrb[80].mxu0 }
 0x7d2   : > { %18715 = vst [vmem:[#allocation49_spill] sm:$0xff] %v17966_v56  ;;  %v17968_v27 = vpop.f32.mrb[81].mxu0 }
 0x7d3   : > { %18716 = vst [vmem:[#allocation44_spill] sm:$0xff] %v17968_v27  ;;  %v17970_v14 = vpop.f32.mrb[82].mxu0 }
 0x7d4   : > { %18717 = vst [vmem:[#allocation45_spill] sm:$0xff] %v17970_v14  ;;  %v17974_v45 = vpop.f32.mrb[83].mxu0 }
 0x7d5   : > { %18718 = vst [vmem:[#allocation4_spill] sm:$0xff] %v17974_v45 }
 0x7d6   : > { %13892 = vmatmul.mubr.msk.bf16.gmra.mrb[56].mxu1 %vm7213_vm13, %v17718_v2 }
 0x7d7   : > { %13895 = vmatprep.mubr.msk.bf16.mxu1 %vm7213_vm13, %v17727_v8 }
 0x7d9   : > { %v17978_v32 = vpop.f32.mrb[84].mxu0 }
 0x7da   : > { %18719 = vst [vmem:[#allocation48_spill] sm:$0xff] %v17978_v32  ;;  %v17980_v12 = vpop.f32.mrb[85].mxu0 }
 0x7db   : > { %18720 = vst [vmem:[#allocation50_spill] sm:$0xff] %v17980_v12  ;;  %v17982_v17 = vpop.f32.mrb[86].mxu0 }
 0x7dc   : > { %18721 = vst [vmem:[#allocation56_spill] sm:$0xff] %v17982_v17  ;;  %v17986_v27 = vpop.f32.mrb[87].mxu0 }
 0x7dd   : > { %18722 = vst [vmem:[#allocation57_spill] sm:$0xff] %v17986_v27 }
 0x7de   : > { %13896 = vmatmul.mubr.msk.bf16.gmra.mrb[60].mxu1 %vm7213_vm13, %v17732_v35 }
 0x7df   : > { %13899 = vmatprep.mubr.msk.bf16.mxu1 %vm7213_vm13, %v17741_v59 }
 0x7e1   : > { %v17990_v14 = vpop.f32.mrb[88].mxu0 }
 0x7e2   : > { %18723 = vst [vmem:[#allocation53_spill] sm:$0xff] %v17990_v14  ;;  %v17992_v45 = vpop.f32.mrb[89].mxu0 }
 0x7e3   : > { %18724 = vst [vmem:[#allocation59_spill] sm:$0xff] %v17992_v45  ;;  %v17994_v56 = vpop.f32.mrb[90].mxu0 }
 0x7e4   : > { %18725 = vst [vmem:[#allocation2_spill] sm:$0xff] %v17994_v56  ;;  %v17998_v12 = vpop.f32.mrb[91].mxu0  ;;  %v18730_v56 = vld [vmem:[#allocation16_spill] sm:$0xff] }
 0x7e5   : > { %18726 = vst [vmem:[#allocation3_spill] sm:$0xff] %v17998_v12  ;;  %v10425_v14 = vrot.slane %v18730_v56, 1  ;;  %v10424_v12 = vrot.slane %v17016_v29, 1 }
 0x7e6   : > { %13900 = vmatmul.mubr.msk.bf16.gmra.mrb[64].mxu1 %vm7213_vm13, %v17746_v5 }
 0x7e7   : > { %13903 = vmatprep.mubr.msk.bf16.mxu1 %vm7213_vm13, %v17755_v22 }
 0x7e9   : > { %v18002_v17 = vpop.f32.mrb[92].mxu0 }
 0x7ea   : > { %v18004_v27 = vpop.f32.mrb[93].mxu0 }
 0x7eb   : > { %18727 = vst [vmem:[#allocation6_spill] sm:$0xff] %v18004_v27  ;;  %v18006_v32 = vpop.f32.mrb[94].mxu0  ;;  %v18021_v27 = vsel %vm9872_vm14, %v10424_v12, %v10425_v14 }
 0x7ec   : > { %18728 = vst [vmem:[#allocation5_spill] sm:$0xff] %v18006_v32  ;;  %v18010_v45 = vpop.f32.mrb[95].mxu0 }
 0x7ed   : > { %18729 = vst [vmem:[#allocation8_spill] sm:$0xff] %v18010_v45 }
 0x7ee   : > { %13904 = vmatmul.mubr.msk.bf16.gmra.mrb[68].mxu1 %vm7213_vm13, %v17760_v1 }
 0x7ef   : > { %13907 = vmatprep.mubr.msk.bf16.mxu1 %vm7213_vm13, %v17767_v20 }
 0x7f1   : > { %v18016_v11 = vpop.f32.mrb[96].mxu0 }
 0x7f2   : > { %18731 = vst [vmem:[#allocation7_spill] sm:$0xff] %v18016_v11  ;;  %v18018_v58 = vpop.f32.mrb[97].mxu0 }
 0x7f3   : > { %v18023_v32 = vpop.f32.mrb[98].mxu0 }
 0x7f4   : > { %18732 = vst [vmem:[#allocation9_spill] sm:$0xff] %v18023_v32  ;;  %v18027_v45 = vpop.f32.mrb[99].mxu0 }
 0x7f5   : > { %18733 = vst [vmem:[#allocation10_spill] sm:$0xff] %v18027_v45 }
 0x7f6   : > { %13908 = vmatmul.mubr.msk.bf16.gmra.mrb[72].mxu1 %vm7213_vm13, %v18021_v27 }
 0x7f7   : > { %13911 = vmatprep.mubr.msk.bf16.mxu1 %vm7213_vm13, %v17778_v43 }
 0x7f9   : > { %v18031_v56 = vpop.f32.mrb[100].mxu0 }
 0x7fa   : > { %18734 = vst [vmem:[#allocation11_spill] sm:$0xff] %v18031_v56  ;;  %v18033_v29 = vpop.f32.mrb[101].mxu0  ;;  %v11298_v56 = vld [vmem:[%s18458_s7 + $0x28] sm:$0xff] }
 0x7fb   : > { %18735 = vst [vmem:[#allocation12_spill] sm:$0xff] %v18033_v29  ;;  %v18035_v11 = vpop.f32.mrb[102].mxu0  ;;  %v11297_v29 = vld [vmem:[%s18458_s7 + $0x20] sm:$0xff] }
 0x7fc   : > { %18736 = vst [vmem:[#allocation14_spill] sm:$0xff] %v18035_v11  ;;  %v18039_v14 = vpop.f32.mrb[103].mxu0 }
 0x7fd   : > { %18737 = vst [vmem:[#allocation15_spill] sm:$0xff] %v18039_v14  ;;  %v10427_v14 = vrot.slane %v17326_v16, 1  ;;  %v14137_v16 = vpack.c.bf16 %v11298_v56, %v11297_v29  ;;  %v11304_v56 = vld [vmem:[%s18458_s7 + $0x58] sm:$0xff] }
 0x7fe   : > { %13912 = vmatmul.mubr.msk.bf16.gmra.mrb[76].mxu1 %vm7213_vm13, %v17783_v48 }
 0x7ff   : > { %13915 = vmatprep.mubr.msk.bf16.mxu1 %vm7213_vm13, %v17792_v30 }
 0x801   : > { %v18043_v12 = vpop.f32.mrb[104].mxu0 }
 0x802   : > { %18738 = vst [vmem:[#allocation17_spill] sm:$0xff] %v18043_v12  ;;  %v18045_v45 = vpop.f32.mrb[105].mxu0  ;;  %v10428_v12 = vrot.slane %v17498_v7, 1  ;;  %v11299_v7 = vld [vmem:[%s18458_s7 + $0x30] sm:$0xff] }
 0x803   : > { %18739 = vst [vmem:[#allocation19_spill] sm:$0xff] %v18045_v45  ;;  %v18047_v32 = vpop.f32.mrb[106].mxu0 }
 0x804   : > { %18740 = vst [vmem:[#allocation21_spill] sm:$0xff] %v18047_v32  ;;  %v18051_v43 = vpop.f32.mrb[107].mxu0  ;;  %v11293_v32 = vld [vmem:[%s18458_s7] sm:$0xff]  ;;  %v10429_v11 = vsel %vm9872_vm14, %v10427_v14, %v10428_v12  ;;  %v11300_v14 = vld [vmem:[%s18458_s7 + $0x38] sm:$0xff] }
 0x805   : > { %18741 = vst [vmem:[#allocation25_spill] sm:$0xff] %v18051_v43  ;;  %v11294_v43 = vld [vmem:[%s18458_s7 + $0x8] sm:$0xff]  ;;  %v14141_v12 = vpack.c.bf16 %v11300_v14, %v11299_v7 }
 0x806   : > { %13916 = vmatmul.mubr.msk.bf16.gmra.mrb[80].mxu1 %vm7213_vm13, %v17797_v24  ;;  %v14129_v45 = vpack.c.bf16 %v11294_v43, %v11293_v32  ;;  %v11295_v32 = vld [vmem:[%s18458_s7 + $0x10] sm:$0xff] }
 0x807   : > { %13919 = vmatprep.mubr.msk.bf16.mxu1 %vm7213_vm13, %v17810_v49 }
 0x808   : > { %14130 = vmatprep.subr.bf16.mxu0 %v14129_v45 }
 0x809   : > { %14132 = vmatpush3.bf16.msra.mxu0 %v14129_v45  ;;  %v11296_v45 = vld [vmem:[%s18458_s7 + $0x18] sm:$0xff] }
 0x80a   : > { %v14133_v43 = vpack.c.bf16 %v11296_v45, %v11295_v32  ;;  %v11301_v32 = vld [vmem:[%s18458_s7 + $0x40] sm:$0xff]  ;;  %v11302_v45 = vld [vmem:[%s18458_s7 + $0x48] sm:$0xff] }
 0x80c   : > { %14134 = vmatprep.subr.bf16.mxu0 %v14133_v43 }
 0x80d   : > { %14136 = vmatpush3.bf16.msra.mxu0 %v14133_v43  ;;  %v14145_v43 = vpack.c.bf16 %v11302_v45, %v11301_v32 }
 0x80e   : > { %13920 = vmatmul.mubr.msk.bf16.gmra.mrb[84].mxu1 %vm7213_vm13, %v17817_v6  ;;  %14138 = vmatprep.subr.bf16.mxu0 %v14137_v16 }
 0x80f   : > { %13923 = vmatprep.mubr.msk.bf16.mxu1 %vm7213_vm13, %v17832_v19 }
 0x811   : > { %14140 = vmatpush3.bf16.msra.mxu0 %v14137_v16 }
 0x812   : > { %14142 = vmatprep.subr.bf16.mxu0 %v14141_v12 }
 0x815   : > { %14144 = vmatpush3.bf16.msra.mxu0 %v14141_v12 }
 0x816   : > { %13924 = vmatmul.mubr.msk.bf16.gmra.mrb[88].mxu1 %vm7213_vm13, %v17839_v33  ;;  %14146 = vmatprep.subr.bf16.mxu0 %v14145_v43 }
 0x817   : > { %13927 = vmatprep.mubr.msk.bf16.mxu1 %vm7213_vm13, %v17854_v10 }
 0x819   : > { %14148 = vmatpush3.bf16.msra.mxu0 %v14145_v43 }
 0x81e   : > { %13928 = vmatmul.mubr.msk.bf16.gmra.mrb[92].mxu1 %vm7213_vm13, %v17861_v3 }
 0x81f   : > { %13931 = vmatprep.mubr.msk.bf16.mxu1 %vm7213_vm13, %v17876_v26 }
 0x826   : > { %13932 = vmatmul.mubr.msk.bf16.gmra.mrb[96].mxu1 %vm7213_vm13, %v17883_v46 }
 0x827   : > { %13935 = vmatprep.mubr.msk.bf16.mxu1 %vm7213_vm13, %v17898_v37 }
 0x82e   : > { %13936 = vmatmul.mubr.msk.bf16.gmra.mrb[100].mxu1 %vm7213_vm13, %v17905_v60 }
 0x82f   : > { %13939 = vmatprep.mubr.msk.bf16.mxu1 %vm7213_vm13, %v17918_v53 }
 0x836   : > { %13940 = vmatmul.mubr.msk.bf16.gmra.mrb[104].mxu1 %vm7213_vm13, %v10429_v11 }
 0x837   : > { %13945 = vmatprep.mubr.msk.bf16.mxu1 %vm7213_vm13, %v17674_v62  ;;  %v11303_v62 = vld [vmem:[%s18458_s7 + $0x50] sm:$0xff] }
 0x838   : > { %v14149_v29 = vpack.c.bf16 %v11304_v56, %v11303_v62 }
 0x83a   : > { %14150 = vmatprep.subr.bf16.mxu0 %v14149_v29 }
 0x83b   : > { %14152 = vmatpush3.bf16.msra.mxu0 %v14149_v29 }
 0x83e   : > { %13946 = vmatmul.mubr.msk.bf16.vlgmr.msra.gmra.mrb[44].mxu1 %vm7213_vm13, %v17685_v51 }
 0x83f   : > { %13949 = vmatprep.mubr.msk.bf16.mxu1 %vm7213_vm13, %v17690_v41 }
 0x846   : > { %13950 = vmatmul.mubr.msk.bf16.gmra.mrb[48].mxu1 %vm7213_vm13, %v17699_v57  ;;  %v18182_v57 = vld [vmem:[%s18457_s6] ss:$0 sm:$0xff] }
 0x847   : > { %13953 = vmatprep.mubr.msk.bf16.mxu1 %vm7213_vm13, %v17704_v4 }
 0x84e   : > { %13954 = vmatmul.mubr.msk.bf16.gmra.mrb[52].mxu1 %vm7213_vm13, %v17713_v36 }
 0x84f   : > { %13957 = vmatprep.mubr.msk.bf16.mxu1 %vm7213_vm13, %v17718_v2 }
 0x856   : > { %13958 = vmatmul.mubr.msk.bf16.gmra.mrb[56].mxu1 %vm7213_vm13, %v17727_v8 }
 0x857   : > { %13961 = vmatprep.mubr.msk.bf16.mxu1 %vm7213_vm13, %v17732_v35 }
 0x85e   : > { %13962 = vmatmul.mubr.msk.bf16.gmra.mrb[60].mxu1 %vm7213_vm13, %v17741_v59 }
 0x85f   : > { %13965 = vmatprep.mubr.msk.bf16.mxu1 %vm7213_vm13, %v17746_v5 }
 0x866   : > { %13966 = vmatmul.mubr.msk.bf16.gmra.mrb[64].mxu1 %vm7213_vm13, %v17755_v22 }
 0x867   : > { %13969 = vmatprep.mubr.msk.bf16.mxu1 %vm7213_vm13, %v17760_v1 }
 0x86e   : > { %13970 = vmatmul.mubr.msk.bf16.gmra.mrb[68].mxu1 %vm7213_vm13, %v17767_v20 }
 0x86f   : > { %13973 = vmatprep.mubr.msk.bf16.mxu1 %vm7213_vm13, %v18021_v27 }
 0x876   : > { %13974 = vmatmul.mubr.msk.bf16.gmra.mrb[72].mxu1 %vm7213_vm13, %v17651_v31 }
 0x877   : > { %13977 = vmatprep.mubr.msk.bf16.mxu1 %vm7213_vm13, %v17783_v48 }
 0x87e   : > { %13978 = vmatmul.mubr.msk.bf16.gmra.mrb[76].mxu1 %vm7213_vm13, %v17792_v30 }
 0x87f   : > { %13981 = vmatprep.mubr.msk.bf16.mxu1 %vm7213_vm13, %v17797_v24 }
 0x886   : > { %13982 = vmatmul.mubr.msk.bf16.gmra.mrb[80].mxu1 %vm7213_vm13, %v17810_v49 }
 0x887   : > { %13985 = vmatprep.mubr.msk.bf16.mxu1 %vm7213_vm13, %v17817_v6 }
 0x88e   : > { %13986 = vmatmul.mubr.msk.bf16.gmra.mrb[84].mxu1 %vm7213_vm13, %v17832_v19 }
 0x88f   : > { %13989 = vmatprep.mubr.msk.bf16.mxu1 %vm7213_vm13, %v17839_v33 }
 0x896   : > { %13990 = vmatmul.mubr.msk.bf16.gmra.mrb[88].mxu1 %vm7213_vm13, %v17854_v10 }
 0x897   : > { %13993 = vmatprep.mubr.msk.bf16.mxu1 %vm7213_vm13, %v17861_v3 }
 0x89e   : > { %13994 = vmatmul.mubr.msk.bf16.gmra.mrb[92].mxu1 %vm7213_vm13, %v17876_v26 }
 0x89f   : > { %13997 = vmatprep.mubr.msk.bf16.mxu1 %vm7213_vm13, %v17883_v46 }
 0x8a6   : > { %13998 = vmatmul.mubr.msk.bf16.gmra.mrb[96].mxu1 %vm7213_vm13, %v17898_v37 }
 0x8a7   : > { %14001 = vmatprep.mubr.msk.bf16.mxu1 %vm7213_vm13, %v17905_v60 }
 0x8ae   : > { %14002 = vmatmul.mubr.msk.bf16.gmra.mrb[100].mxu1 %vm7213_vm13, %v17918_v53 }
 0x8af   : > { %14005 = vmatprep.mubr.msk.bf16.mxu1 %vm7213_vm13, %v10429_v11 }
 0x8b6   : > { %14006 = vmatmul.mubr.msk.bf16.gmra.mrb[104].mxu1 %vm7213_vm13, %v17651_v31 }
 0x911   : > { %v13947_v51 = vpop.f32.mrb[44].mxu1 }
 0x912   : > { %v14155_v41 = vadd.f32 %v13947_v51, %v17805_v63  ;;  %v10839_v4 = vpop.f32.mrb[45].mxu1 }
 0x913   : > { %v14156_v36 = vadd.f32 %v10839_v4, %v17807_v28  ;;  %v13948_v2 = vpop.f32.mrb[46].mxu1 }
 0x914   : > { %v14157_v8 = vadd.f32 %v13948_v2, %v17812_v21  ;;  %v10842_v35 = vpop.f32.mrb[47].mxu1  ;;  %v11167_v31 = vadd.f32 %v14155_v41, %v18182_v57 }
 0x915   : > { %v11165_v59 = vadd.f32 %v14156_v36, %v18182_v57  ;;  %v14158_v5 = vadd.f32 %v10842_v35, %v17819_v54 }
 0x916   : > { %v11168_v20 = vadd.f32 %v14157_v8, %v18182_v57  ;;  %v11231_v24 = vmax.f32 %v11167_v31, 0.0 }
 0x917   : > { %v11229_v22 = vmax.f32 %v11165_v59, 0.0  ;;  %v11166_v1 = vadd.f32 %v14158_v5, %v18182_v57 }
 0x918   : > { %v11232_v19 = vmax.f32 %v11168_v20, 0.0 }
 0x919   : > { %v11230_v48 = vmax.f32 %v11166_v1, 0.0  ;;  %v13951_v30 = vpop.f32.mrb[48].mxu1  ;;  %14033 = vmatprep.mubr.msk.f32.mxu0 %vm11312_vm15, %v11229_v22 }
 0x91a   : > { %v14159_v63 = vadd.f32 %v13951_v30, %v17827_v42  ;;  %v10855_v28 = vpop.f32.mrb[49].mxu1 }
 0x91b   : > { %v14160_v49 = vadd.f32 %v10855_v28, %v17829_v40  ;;  %v13952_v21 = vpop.f32.mrb[50].mxu1  ;;  %14034 = vmatmul.mubr.msk.f32.vlgmr.msra.gmra.mrb[108].mxu0 %vm11312_vm15, %v11230_v48 }
 0x91c   : > { %v14161_v6 = vadd.f32 %v13952_v21, %v17834_v39  ;;  %v10858_v54 = vpop.f32.mrb[51].mxu1  ;;  %14036 = vmatprep.mubr.msk.f32.mxu0 %vm11312_vm15, %v11231_v24  ;;  %v11171_v3 = vadd.f32 %v14159_v63, %v18182_v57 }
 0x91d   : > { %v11169_v33 = vadd.f32 %v14160_v49, %v18182_v57  ;;  %v14162_v10 = vadd.f32 %v10858_v54, %v17841_v50 }
 0x91e   : > { %v11172_v40 = vadd.f32 %v14161_v6, %v18182_v57  ;;  %v11235_v39 = vmax.f32 %v11171_v3, 0.0 }
 0x91f   : > { %v11233_v26 = vmax.f32 %v11169_v33, 0.0  ;;  %v11170_v42 = vadd.f32 %v14162_v10, %v18182_v57  ;;  %14037 = vmatmul.mubr.msk.f32.gmra.mrb[110].mxu0 %vm11312_vm15, %v11232_v19  ;;  %v18742_v10 = vld [vmem:[#allocation22_spill] sm:$0xff] }
 0x920   : > { %v11236_v16 = vmax.f32 %v11172_v40, 0.0 }
 0x921   : > { %v11234_v46 = vmax.f32 %v11170_v42, 0.0  ;;  %v13955_v37 = vpop.f32.mrb[52].mxu1  ;;  %14039 = vmatprep.mubr.msk.f32.mxu0 %vm11312_vm15, %v11233_v26 }
 0x922   : > { %v14163_v60 = vadd.f32 %v13955_v37, %v17849_v47  ;;  %v10871_v53 = vpop.f32.mrb[53].mxu1  ;;  %v18743_v37 = vld [vmem:[#allocation18_spill] sm:$0xff] }
 0x923   : > { %v14164_v11 = vadd.f32 %v10871_v53, %v17851_v15  ;;  %v13956_v50 = vpop.f32.mrb[54].mxu1  ;;  %14040 = vmatmul.mubr.msk.f32.gmra.mrb[112].mxu0 %vm11312_vm15, %v11234_v46 }
 0x924   : > { %v14165_v27 = vadd.f32 %v13956_v50, %v17856_v52  ;;  %v10874_v7 = vpop.f32.mrb[55].mxu1  ;;  %14042 = vmatprep.mubr.msk.f32.mxu0 %vm11312_vm15, %v11235_v39  ;;  %v11175_v32 = vadd.f32 %v14163_v60, %v18182_v57 }
 0x925   : > { %v11173_v14 = vadd.f32 %v14164_v11, %v18182_v57  ;;  %v14166_v12 = vadd.f32 %v10874_v7, %v17863_v23  ;;  %v18744_v7 = vld [vmem:[#allocation20_spill] sm:$0xff] }
 0x926   : > { %v11176_v15 = vadd.f32 %v14165_v27, %v18182_v57  ;;  %v11239_v52 = vmax.f32 %v11175_v32, 0.0 }
 0x927   : > { %v11237_v45 = vmax.f32 %v11173_v14, 0.0  ;;  %v11174_v47 = vadd.f32 %v14166_v12, %v18182_v57  ;;  %14043 = vmatmul.mubr.msk.f32.gmra.mrb[114].mxu0 %vm11312_vm15, %v11236_v16  ;;  %v18745_v12 = vld [vmem:[#allocation24_spill] sm:$0xff] }
 0x928   : > { %v11240_v36 = vmax.f32 %v11176_v15, 0.0 }
 0x929   : > { %v11238_v43 = vmax.f32 %v11174_v47, 0.0  ;;  %v13959_v62 = vpop.f32.mrb[56].mxu1  ;;  %14045 = vmatprep.mubr.msk.f32.mxu0 %vm11312_vm15, %v11237_v45  ;;  %v18746_v47 = vld [vmem:[#allocation27_spill] sm:$0xff] }
 0x92a   : > { %v14167_v56 = vadd.f32 %v13959_v62, %v17871_v13  ;;  %v10887_v29 = vpop.f32.mrb[57].mxu1 }
 0x92b   : > { %v14168_v51 = vadd.f32 %v10887_v29, %v17873_v38  ;;  %v13960_v23 = vpop.f32.mrb[58].mxu1  ;;  %14046 = vmatmul.mubr.msk.f32.gmra.mrb[116].mxu0 %vm11312_vm15, %v11238_v43 }
 0x92c   : > { %v14169_v41 = vadd.f32 %v13960_v23, %v17878_v55  ;;  %v10890_v4 = vpop.f32.mrb[59].mxu1  ;;  %14048 = vmatprep.mubr.msk.f32.mxu0 %vm11312_vm15, %v11239_v52  ;;  %v11179_v35 = vadd.f32 %v14167_v56, %v18182_v57  ;;  %v18747_v56 = vld [vmem:[#allocation31_spill] sm:$0xff] }
 0x92d   : > { %v11177_v2 = vadd.f32 %v14168_v51, %v18182_v57  ;;  %v14170_v8 = vadd.f32 %v10890_v4, %v17885_v9 }
 0x92e   : > { %v11180_v38 = vadd.f32 %v14169_v41, %v18182_v57  ;;  %v11243_v55 = vmax.f32 %v11179_v35, 0.0  ;;  %v18748_v35 = vld [vmem:[#allocation23_spill] sm:$0xff] }
 0x92f   : > { %v11241_v59 = vmax.f32 %v11177_v2, 0.0  ;;  %v11178_v13 = vadd.f32 %v14170_v8, %v18182_v57  ;;  %14049 = vmatmul.mubr.msk.f32.gmra.mrb[118].mxu0 %vm11312_vm15, %v11240_v36 }
 0x930   : > { %v11244_v24 = vmax.f32 %v11180_v38, 0.0  ;;  %v18749_v38 = vld [vmem:[#allocation36_spill] sm:$0xff] }
 0x931   : > { %v11242_v5 = vmax.f32 %v11178_v13, 0.0  ;;  %v13963_v31 = vpop.f32.mrb[60].mxu1  ;;  %14051 = vmatprep.mubr.msk.f32.mxu0 %vm11312_vm15, %v11241_v59 }
 0x932   : > { %v14171_v22 = vadd.f32 %v13963_v31, %v17893_v34  ;;  %v10903_v1 = vpop.f32.mrb[61].mxu1 }
 0x933   : > { %v14172_v20 = vadd.f32 %v10903_v1, %v17895_v44  ;;  %v13964_v9 = vpop.f32.mrb[62].mxu1  ;;  %14052 = vmatmul.mubr.msk.f32.gmra.mrb[120].mxu0 %vm11312_vm15, %v11242_v5 }
 0x934   : > { %v14173_v48 = vadd.f32 %v13964_v9, %v17900_v0  ;;  %v10906_v30 = vpop.f32.mrb[63].mxu1  ;;  %14054 = vmatprep.mubr.msk.f32.mxu0 %vm11312_vm15, %v11243_v55  ;;  %v11183_v49 = vadd.f32 %v14171_v22, %v18182_v57  ;;  %v18750_v55 = vld [vmem:[#allocation30_spill] sm:$0xff] }
 0x935   : > { %v11181_v63 = vadd.f32 %v14172_v20, %v18182_v57  ;;  %v14174_v28 = vadd.f32 %v10906_v30, %v17907_v61 }
 0x936   : > { %v11184_v44 = vadd.f32 %v14173_v48, %v18182_v57  ;;  %v11247_v0 = vmax.f32 %v11183_v49, 0.0  ;;  %v18751_v48 = vld [vmem:[#allocation37_spill] sm:$0xff] }
 0x937   : > { %v11245_v21 = vmax.f32 %v11181_v63, 0.0  ;;  %v11182_v34 = vadd.f32 %v14174_v28, %v18182_v57  ;;  %14055 = vmatmul.mubr.msk.f32.gmra.mrb[122].mxu0 %vm11312_vm15, %v11244_v24 }
 0x938   : > { %v11248_v40 = vmax.f32 %v11184_v44, 0.0 }
 0x939   : > { %v11246_v6 = vmax.f32 %v11182_v34, 0.0  ;;  %v13967_v54 = vpop.f32.mrb[64].mxu1  ;;  %14057 = vmatprep.mubr.msk.f32.mxu0 %vm11312_vm15, %v11245_v21 }
 0x93a   : > { %v14175_v19 = vadd.f32 %v13967_v54, %v17913_v18  ;;  %v10919_v33 = vpop.f32.mrb[65].mxu1 }
 0x93b   : > { %v14176_v3 = vadd.f32 %v10919_v33, %v18742_v10  ;;  %v13968_v61 = vpop.f32.mrb[66].mxu1  ;;  %14058 = vmatmul.mubr.msk.f32.gmra.mrb[124].mxu0 %vm11312_vm15, %v11246_v6  ;;  %v18752_v6 = vld [vmem:[#allocation32_spill] sm:$0xff] }
 0x93c   : > { %v14177_v26 = vadd.f32 %v13968_v61, %v17920_v25  ;;  %v10922_v42 = vpop.f32.mrb[67].mxu1  ;;  %14060 = vmatprep.mubr.msk.f32.mxu0 %vm11312_vm15, %v11247_v0  ;;  %v11187_v60 = vadd.f32 %v14175_v19, %v18182_v57  ;;  %v18753_v19 = vld [vmem:[#allocation34_spill] sm:$0xff] }
 0x93d   : > { %v11185_v46 = vadd.f32 %v14176_v3, %v18182_v57  ;;  %v14178_v39 = vadd.f32 %v10922_v42, %v18743_v37  ;;  %v18754_v3 = vld [vmem:[#allocation40_spill] sm:$0xff] }
 0x93e   : > { %v11188_v11 = vadd.f32 %v14177_v26, %v18182_v57  ;;  %v11251_v25 = vmax.f32 %v11187_v60, 0.0 }
 0x93f   : > { %v11249_v53 = vmax.f32 %v11185_v46, 0.0  ;;  %v11186_v18 = vadd.f32 %v14178_v39, %v18182_v57  ;;  %14061 = vmatmul.mubr.msk.f32.gmra.mrb[126].mxu0 %vm11312_vm15, %v11248_v40  ;;  %v18755_v46 = vld [vmem:[#allocation42_spill] sm:$0xff] }
 0x940   : > { %v11252_v62 = vmax.f32 %v11188_v11, 0.0 }
 0x941   : > { %v11250_v50 = vmax.f32 %v11186_v18, 0.0  ;;  %v13971_v27 = vpop.f32.mrb[68].mxu1  ;;  %14063 = vmatprep.mubr.msk.f32.mxu0 %vm11312_vm15, %v11249_v53 }
 0x942   : > { %v14179_v16 = vadd.f32 %v13971_v27, %v18744_v7  ;;  %v10935_v14 = vpop.f32.mrb[69].mxu1 }
 0x943   : > { %v14180_v32 = vadd.f32 %v10935_v14, %v18745_v12  ;;  %v13972_v45 = vpop.f32.mrb[70].mxu1  ;;  %14064 = vmatmul.mubr.msk.f32.gmra.mrb[128].mxu0 %vm11312_vm15, %v11250_v50  ;;  %v18757_v14 = vld [vmem:[#allocation44_spill] sm:$0xff] }
 0x944   : > { %v14181_v15 = vadd.f32 %v13972_v45, %v18746_v47  ;;  %v10938_v43 = vpop.f32.mrb[71].mxu1  ;;  %14066 = vmatprep.mubr.msk.f32.mxu0 %vm11312_vm15, %v11251_v25  ;;  %v11191_v51 = vadd.f32 %v14179_v16, %v18182_v57  ;;  %v18756_v25 = vld [vmem:[#allocation49_spill] sm:$0xff] }
 0x945   : > { %v11189_v52 = vadd.f32 %v14180_v32, %v18182_v57  ;;  %v14182_v29 = vadd.f32 %v10938_v43, %v18747_v56  ;;  %v18758_v45 = vld [vmem:[#allocation45_spill] sm:$0xff] }
 0x946   : > { %v11192_v4 = vadd.f32 %v14181_v15, %v18182_v57  ;;  %v11255_v8 = vmax.f32 %v11191_v51, 0.0 }
 0x947   : > { %v11253_v23 = vmax.f32 %v11189_v52, 0.0  ;;  %v11190_v41 = vadd.f32 %v14182_v29, %v18182_v57  ;;  %14067 = vmatmul.mubr.msk.f32.gmra.mrb[130].mxu0 %vm11312_vm15, %v11252_v62  ;;  %v18759_v52 = vld [vmem:[#allocation4_spill] sm:$0xff] }
 0x948   : > { %v11256_v20 = vmax.f32 %v11192_v4, 0.0 }
 0x949   : > { %v11254_v36 = vmax.f32 %v11190_v41, 0.0  ;;  %v13975_v2 = vpop.f32.mrb[72].mxu1  ;;  %14069 = vmatprep.mubr.msk.f32.mxu0 %vm11312_vm15, %v11253_v23 }
 0x94a   : > { %v14183_v59 = vadd.f32 %v13975_v2, %v18748_v35  ;;  %v10951_v13 = vpop.f32.mrb[73].mxu1 }
 0x94b   : > { %v14184_v5 = vadd.f32 %v10951_v13, %v18749_v38  ;;  %v13976_v31 = vpop.f32.mrb[74].mxu1  ;;  %14070 = vmatmul.mubr.msk.f32.gmra.mrb[132].mxu0 %vm11312_vm15, %v11254_v36  ;;  %v18761_v13 = vld [vmem:[#allocation50_spill] sm:$0xff] }
 0x94c   : > { %v14185_v22 = vadd.f32 %v13976_v31, %v18750_v55  ;;  %v10954_v1 = vpop.f32.mrb[75].mxu1  ;;  %14072 = vmatprep.mubr.msk.f32.mxu0 %vm11312_vm15, %v11255_v8  ;;  %v11195_v24 = vadd.f32 %v14183_v59, %v18182_v57  ;;  %v18760_v8 = vld [vmem:[#allocation48_spill] sm:$0xff] }
 0x94d   : > { %v11193_v9 = vadd.f32 %v14184_v5, %v18182_v57  ;;  %v14186_v30 = vadd.f32 %v10954_v1, %v18751_v48  ;;  %v18762_v31 = vld [vmem:[#allocation56_spill] sm:$0xff] }
 0x94e   : > { %v11196_v49 = vadd.f32 %v14185_v22, %v18182_v57  ;;  %v11259_v44 = vmax.f32 %v11195_v24, 0.0 }
 0x94f   : > { %v11257_v63 = vmax.f32 %v11193_v9, 0.0  ;;  %v11194_v28 = vadd.f32 %v14186_v30, %v18182_v57  ;;  %14073 = vmatmul.mubr.msk.f32.gmra.mrb[134].mxu0 %vm11312_vm15, %v11256_v20  ;;  %v18763_v9 = vld [vmem:[#allocation57_spill] sm:$0xff] }
 0x950   : > { %v11260_v42 = vmax.f32 %v11196_v49, 0.0 }
 0x951   : > { %v11258_v21 = vmax.f32 %v11194_v28, 0.0  ;;  %v13979_v34 = vpop.f32.mrb[76].mxu1  ;;  %14075 = vmatprep.mubr.msk.f32.mxu0 %vm11312_vm15, %v11257_v63 }
 0x952   : > { %v14187_v54 = vadd.f32 %v13979_v34, %v18752_v6  ;;  %v10967_v0 = vpop.f32.mrb[77].mxu1 }
 0x953   : > { %v14188_v33 = vadd.f32 %v10967_v0, %v18753_v19  ;;  %v13980_v10 = vpop.f32.mrb[78].mxu1  ;;  %14076 = vmatmul.mubr.msk.f32.gmra.mrb[136].mxu0 %vm11312_vm15, %v11258_v21  ;;  %v18765_v0 = vld [vmem:[#allocation59_spill] sm:$0xff] }
 0x954   : > { %v14189_v61 = vadd.f32 %v13980_v10, %v18754_v3  ;;  %v10970_v26 = vpop.f32.mrb[79].mxu1  ;;  %14078 = vmatprep.mubr.msk.f32.mxu0 %vm11312_vm15, %v11259_v44  ;;  %v11199_v39 = vadd.f32 %v14187_v54, %v18182_v57  ;;  %v18764_v44 = vld [vmem:[#allocation53_spill] sm:$0xff]  ;;  %v18766_v10 = vld [vmem:[#allocation2_spill] sm:$0xff] }
 0x955   : > { %v11197_v40 = vadd.f32 %v14188_v33, %v18182_v57  ;;  %v14190_v37 = vadd.f32 %v10970_v26, %v18755_v46 }
 0x956   : > { %v11200_v18 = vadd.f32 %v14189_v61, %v18182_v57  ;;  %v11263_v27 = vmax.f32 %v11199_v39, 0.0 }
 0x957   : > { %v11261_v60 = vmax.f32 %v11197_v40, 0.0  ;;  %v11198_v53 = vadd.f32 %v14190_v37, %v18182_v57  ;;  %14079 = vmatmul.mubr.msk.f32.gmra.mrb[138].mxu0 %vm11312_vm15, %v11260_v42  ;;  %v18767_v40 = vld [vmem:[#allocation3_spill] sm:$0xff] }
 0x958   : > { %v11264_v43 = vmax.f32 %v11200_v18, 0.0 }
 0x959   : > { %v11262_v11 = vmax.f32 %v11198_v53, 0.0  ;;  %v13983_v50 = vpop.f32.mrb[80].mxu1  ;;  %14081 = vmatprep.mubr.msk.f32.mxu0 %vm11312_vm15, %v11261_v60 }
 0x95a   : > { %v14191_v7 = vadd.f32 %v13983_v50, %v18756_v25  ;;  %v10983_v16 = vpop.f32.mrb[81].mxu1 }
 0x95b   : > { %v14192_v12 = vadd.f32 %v10983_v16, %v18757_v14  ;;  %v13984_v32 = vpop.f32.mrb[82].mxu1  ;;  %14082 = vmatmul.mubr.msk.f32.gmra.mrb[140].mxu0 %vm11312_vm15, %v11262_v11 }
 0x95c   : > { %v14193_v47 = vadd.f32 %v13984_v32, %v18758_v45  ;;  %v10986_v15 = vpop.f32.mrb[83].mxu1  ;;  %14084 = vmatprep.mubr.msk.f32.mxu0 %vm11312_vm15, %v11263_v27  ;;  %v11203_v29 = vadd.f32 %v14191_v7, %v18182_v57  ;;  %v18768_v7 = vld [vmem:[#allocation6_spill] sm:$0xff] }
 0x95d   : > { %v11201_v62 = vadd.f32 %v14192_v12, %v18182_v57  ;;  %v14194_v56 = vadd.f32 %v10986_v15, %v18759_v52  ;;  %v18769_v12 = vld [vmem:[#allocation5_spill] sm:$0xff] }
 0x95e   : > { %v11204_v41 = vadd.f32 %v14193_v47, %v18182_v57  ;;  %v11267_v2 = vmax.f32 %v11203_v29, 0.0 }
 0x95f   : > { %v11265_v51 = vmax.f32 %v11201_v62, 0.0  ;;  %v11202_v23 = vadd.f32 %v14194_v56, %v18182_v57  ;;  %14085 = vmatmul.mubr.msk.f32.gmra.mrb[142].mxu0 %vm11312_vm15, %v11264_v43  ;;  %v18770_v43 = vld [vmem:[#allocation8_spill] sm:$0xff] }
 0x960   : > { %v11268_v1 = vmax.f32 %v11204_v41, 0.0 }
 0x961   : > { %v11266_v4 = vmax.f32 %v11202_v23, 0.0  ;;  %v13987_v36 = vpop.f32.mrb[84].mxu1  ;;  %14087 = vmatprep.mubr.msk.f32.mxu0 %vm11312_vm15, %v11265_v51 }
 0x962   : > { %v14195_v35 = vadd.f32 %v13987_v36, %v18760_v8  ;;  %v10999_v59 = vpop.f32.mrb[85].mxu1 }
 0x963   : > { %v14196_v38 = vadd.f32 %v10999_v59, %v18761_v13  ;;  %v13988_v5 = vpop.f32.mrb[86].mxu1  ;;  %14088 = vmatmul.mubr.msk.f32.gmra.mrb[144].mxu0 %vm11312_vm15, %v11266_v4  ;;  %v18771_v4 = vld [vmem:[#allocation7_spill] sm:$0xff]  ;;  %v18772_v59 = vld [vmem:[#allocation9_spill] sm:$0xff] }
 0x964   : > { %v14197_v55 = vadd.f32 %v13988_v5, %v18762_v31  ;;  %v11002_v22 = vpop.f32.mrb[87].mxu1  ;;  %14090 = vmatprep.mubr.msk.f32.mxu0 %vm11312_vm15, %v11267_v2  ;;  %v11207_v30 = vadd.f32 %v14195_v35, %v18182_v57 }
 0x965   : > { %v11205_v20 = vadd.f32 %v14196_v38, %v18182_v57  ;;  %v14198_v48 = vadd.f32 %v11002_v22, %v18763_v9 }
 0x966   : > { %v11208_v28 = vadd.f32 %v14197_v55, %v18182_v57  ;;  %v11271_v34 = vmax.f32 %v11207_v30, 0.0  ;;  %v18773_v55 = vld [vmem:[#allocation10_spill] sm:$0xff] }
 0x967   : > { %v11269_v24 = vmax.f32 %v11205_v20, 0.0  ;;  %v11206_v63 = vadd.f32 %v14198_v48, %v18182_v57  ;;  %14091 = vmatmul.mubr.msk.f32.gmra.mrb[146].mxu0 %vm11312_vm15, %v11268_v1 }
 0x968   : > { %v11272_v26 = vmax.f32 %v11208_v28, 0.0 }
 0x969   : > { %v11270_v49 = vmax.f32 %v11206_v63, 0.0  ;;  %v13991_v21 = vpop.f32.mrb[88].mxu1  ;;  %14093 = vmatprep.mubr.msk.f32.mxu0 %vm11312_vm15, %v11269_v24  ;;  %v18774_v63 = vld [vmem:[#allocation11_spill] sm:$0xff] }
 0x96a   : > { %v14199_v6 = vadd.f32 %v13991_v21, %v18764_v44  ;;  %v11015_v54 = vpop.f32.mrb[89].mxu1  ;;  %v18775_v21 = vld [vmem:[#allocation12_spill] sm:$0xff] }
 0x96b   : > { %v14200_v19 = vadd.f32 %v11015_v54, %v18765_v0  ;;  %v13992_v33 = vpop.f32.mrb[90].mxu1  ;;  %14094 = vmatmul.mubr.msk.f32.gmra.mrb[148].mxu0 %vm11312_vm15, %v11270_v49 }
 0x96c   : > { %v14201_v3 = vadd.f32 %v13992_v33, %v18766_v10  ;;  %v11018_v61 = vpop.f32.mrb[91].mxu1  ;;  %14096 = vmatprep.mubr.msk.f32.mxu0 %vm11312_vm15, %v11271_v34  ;;  %v11211_v37 = vadd.f32 %v14199_v6, %v18182_v57  ;;  %v18776_v6 = vld [vmem:[#allocation14_spill] sm:$0xff]  ;;  %v18777_v10 = vld [vmem:[#allocation15_spill] sm:$0xff] }
 0x96d   : > { %v11209_v42 = vadd.f32 %v14200_v19, %v18182_v57  ;;  %v14202_v46 = vadd.f32 %v11018_v61, %v18767_v40 }
 0x96e   : > { %v11212_v53 = vadd.f32 %v14201_v3, %v18182_v57  ;;  %v11275_v50 = vmax.f32 %v11211_v37, 0.0 }
 0x96f   : > { %v11273_v39 = vmax.f32 %v11209_v42, 0.0  ;;  %v11210_v60 = vadd.f32 %v14202_v46, %v18182_v57  ;;  %14097 = vmatmul.mubr.msk.f32.gmra.mrb[150].mxu0 %vm11312_vm15, %v11272_v26 }
 0x970   : > { %v11276_v47 = vmax.f32 %v11212_v53, 0.0 }
 0x971   : > { %v11274_v18 = vmax.f32 %v11210_v60, 0.0  ;;  %v13995_v11 = vpop.f32.mrb[92].mxu1  ;;  %14099 = vmatprep.mubr.msk.f32.mxu0 %vm11312_vm15, %v11273_v39  ;;  %v18778_v60 = vld [vmem:[#allocation17_spill] sm:$0xff] }
 0x972   : > { %v14203_v27 = vadd.f32 %v13995_v11, %v18002_v17  ;;  %v11031_v25 = vpop.f32.mrb[93].mxu1  ;;  %v18779_v11 = vld [vmem:[#allocation19_spill] sm:$0xff] }
 0x973   : > { %v14204_v16 = vadd.f32 %v11031_v25, %v18768_v7  ;;  %v13996_v14 = vpop.f32.mrb[94].mxu1  ;;  %14100 = vmatmul.mubr.msk.f32.gmra.mrb[152].mxu0 %vm11312_vm15, %v11274_v18  ;;  %v18780_v25 = vld [vmem:[#allocation21_spill] sm:$0xff] }
 0x974   : > { %v14205_v32 = vadd.f32 %v13996_v14, %v18769_v12  ;;  %v11034_v45 = vpop.f32.mrb[95].mxu1  ;;  %14102 = vmatprep.mubr.msk.f32.mxu0 %vm11312_vm15, %v11275_v50  ;;  %v11215_v52 = vadd.f32 %v14203_v27, %v18182_v57 }
 0x975   : > { %v11213_v15 = vadd.f32 %v14204_v16, %v18182_v57  ;;  %v14206_v62 = vadd.f32 %v11034_v45, %v18770_v43 }
 0x976   : > { %v11216_v29 = vadd.f32 %v14205_v32, %v18182_v57  ;;  %v11279_v41 = vmax.f32 %v11215_v52, 0.0  ;;  %v18781_v32 = vld [vmem:[#allocation25_spill] sm:$0xff] }
 0x977   : > { %v11277_v56 = vmax.f32 %v11213_v15, 0.0  ;;  %v11214_v17 = vadd.f32 %v14206_v62, %v18182_v57  ;;  %14103 = vmatmul.mubr.msk.f32.gmra.mrb[154].mxu0 %vm11312_vm15, %v11276_v47 }
 0x978   : > { %v11280_v5 = vmax.f32 %v11216_v29, 0.0  ;;  %v18378_v29 = vld [vmem:[%s18459_s8] ss:$0 sm:$0xff] }
 0x979   : > { %v11278_v51 = vmax.f32 %v11214_v17, 0.0  ;;  %v13999_v23 = vpop.f32.mrb[96].mxu1  ;;  %14105 = vmatprep.mubr.msk.f32.mxu0 %vm11312_vm15, %v11277_v56 }
 0x97a   : > { %v14207_v36 = vadd.f32 %v13999_v23, %v18771_v4  ;;  %v11047_v2 = vpop.f32.mrb[97].mxu1 }
 0x97b   : > { %v14208_v8 = vadd.f32 %v11047_v2, %v18018_v58  ;;  %v14000_v35 = vpop.f32.mrb[98].mxu1  ;;  %14106 = vmatmul.mubr.msk.f32.gmra.mrb[156].mxu0 %vm11312_vm15, %v11278_v51 }
 0x97c   : > { %v14209_v13 = vadd.f32 %v14000_v35, %v18772_v59  ;;  %v11050_v38 = vpop.f32.mrb[99].mxu1  ;;  %14108 = vmatprep.mubr.msk.f32.mxu0 %vm11312_vm15, %v11279_v41  ;;  %v11219_v1 = vadd.f32 %v14207_v36, %v18182_v57 }
 0x97d   : > { %v11217_v31 = vadd.f32 %v14208_v8, %v18182_v57  ;;  %v14210_v22 = vadd.f32 %v11050_v38, %v18773_v55 }
 0x97e   : > { %v11220_v58 = vadd.f32 %v14209_v13, %v18182_v57  ;;  %v11283_v24 = vmax.f32 %v11219_v1, 0.0 }
 0x97f   : > { %v11281_v20 = vmax.f32 %v11217_v31, 0.0  ;;  %v11218_v9 = vadd.f32 %v14210_v22, %v18182_v57  ;;  %14109 = vmatmul.mubr.msk.f32.gmra.mrb[158].mxu0 %vm11312_vm15, %v11280_v5 }
 0x980   : > { %v11284_v19 = vmax.f32 %v11220_v58, 0.0 }
 0x981   : > { %v11282_v48 = vmax.f32 %v11218_v9, 0.0  ;;  %v14003_v30 = vpop.f32.mrb[100].mxu1  ;;  %14111 = vmatprep.mubr.msk.f32.mxu0 %vm11312_vm15, %v11281_v20 }
 0x982   : > { %v14211_v28 = vadd.f32 %v14003_v30, %v18774_v63  ;;  %v11063_v49 = vpop.f32.mrb[101].mxu1 }
 0x983   : > { %v14212_v34 = vadd.f32 %v11063_v49, %v18775_v21  ;;  %v14004_v44 = vpop.f32.mrb[102].mxu1  ;;  %14112 = vmatmul.mubr.msk.f32.gmra.mrb[160].mxu0 %vm11312_vm15, %v11282_v48 }
 0x984   : > { %v14213_v54 = vadd.f32 %v14004_v44, %v18776_v6  ;;  %v11066_v0 = vpop.f32.mrb[103].mxu1  ;;  %14114 = vmatprep.mubr.msk.f32.mxu0 %vm11312_vm15, %v11283_v24  ;;  %v11223_v61 = vadd.f32 %v14211_v28, %v18182_v57 }
 0x985   : > { %v11221_v33 = vadd.f32 %v14212_v34, %v18182_v57  ;;  %v14214_v3 = vadd.f32 %v11066_v0, %v18777_v10 }
 0x986   : > { %v11224_v40 = vadd.f32 %v14213_v54, %v18182_v57  ;;  %v11287_v39 = vmax.f32 %v11223_v61, 0.0 }
 0x987   : > { %v11285_v26 = vmax.f32 %v11221_v33, 0.0  ;;  %v11222_v42 = vadd.f32 %v14214_v3, %v18182_v57  ;;  %14115 = vmatmul.mubr.msk.f32.gmra.mrb[162].mxu0 %vm11312_vm15, %v11284_v19 }
 0x988   : > { %v11288_v14 = vmax.f32 %v11224_v40, 0.0 }
 0x989   : > { %v11286_v46 = vmax.f32 %v11222_v42, 0.0  ;;  %v14007_v37 = vpop.f32.mrb[104].mxu1  ;;  %14117 = vmatprep.mubr.msk.f32.mxu0 %vm11312_vm15, %v11285_v26 }
 0x98a   : > { %v14215_v53 = vadd.f32 %v14007_v37, %v18778_v60  ;;  %v11079_v18 = vpop.f32.mrb[105].mxu1 }
 0x98b   : > { %v14216_v50 = vadd.f32 %v11079_v18, %v18779_v11  ;;  %v14008_v27 = vpop.f32.mrb[106].mxu1  ;;  %14118 = vmatmul.mubr.msk.f32.gmra.mrb[164].mxu0 %vm11312_vm15, %v11286_v46 }
 0x98c   : > { %v14217_v7 = vadd.f32 %v14008_v27, %v18780_v25  ;;  %v11082_v16 = vpop.f32.mrb[107].mxu1  ;;  %14120 = vmatprep.mubr.msk.f32.mxu0 %vm11312_vm15, %v11287_v39  ;;  %v11227_v47 = vadd.f32 %v14215_v53, %v18182_v57 }
 0x98d   : > { %v11225_v12 = vadd.f32 %v14216_v50, %v18182_v57  ;;  %v14218_v45 = vadd.f32 %v11082_v16, %v18781_v32 }
 0x98e   : > { %v11228_v62 = vadd.f32 %v14217_v7, %v18182_v57  ;;  %v11291_v56 = vmax.f32 %v11227_v47, 0.0 }
 0x98f   : > { %v11289_v15 = vmax.f32 %v11225_v12, 0.0  ;;  %v11226_v43 = vadd.f32 %v14218_v45, %v18182_v57  ;;  %14121 = vmatmul.mubr.msk.f32.gmra.mrb[166].mxu0 %vm11312_vm15, %v11288_v14 }
 0x990   : > { %v11292_v17 = vmax.f32 %v11228_v62, 0.0 }
 0x991   : > { %v11290_v52 = vmax.f32 %v11226_v43, 0.0  ;;  %14123 = vmatprep.mubr.msk.f32.mxu0 %vm11312_vm15, %v11289_v15 }
 0x993   : > { %14124 = vmatmul.mubr.msk.f32.gmra.mrb[168].mxu0 %vm11312_vm15, %v11290_v52 }
 0x994   : > { %14126 = vmatprep.mubr.msk.f32.mxu0 %vm11312_vm15, %v11291_v56 }
 0x997   : > { %14127 = vmatmul.mubr.msk.f32.gmra.mrb[170].mxu0 %vm11312_vm15, %v11292_v17 }
 0x9ee   : > { %v14035_v51 = vpop.f32.mrb[108].mxu0 }
 0x9ef   : > { %v11571_v23 = vpop.f32.mrb[109].mxu0  ;;  %v11577_v36 = vadd.f32 %v14035_v51, %v18378_v29 }
 0x9f0   : > { %v11572_v57 = vadd.f32 %v18378_v29, %v11571_v23 }
 0x9f2   : > { %v14038_v41 = vpop.f32.mrb[110].mxu0  ;;  %11890 = vxpose.xlu0.b32.start [1/16] (narrow) %v11572_v57, 8 }
 0x9f3   : > { %v11581_v4 = vpop.f32.mrb[111].mxu0  ;;  %v11587_v38 = vadd.f32 %v14038_v41, %v18378_v29 }
 0x9f4   : > { %v11582_v35 = vadd.f32 %v18378_v29, %v11581_v4 }
 0x9f6   : > { %v14041_v2 = vpop.f32.mrb[112].mxu0  ;;  %11891 = vxpose.xlu0.b32.cont [2/16] (narrow) %v11577_v36, 8 }
 0x9f7   : > { %v11591_v8 = vpop.f32.mrb[113].mxu0  ;;  %v11597_v20 = vadd.f32 %v14041_v2, %v18378_v29 }
 0x9f8   : > { %v11592_v55 = vadd.f32 %v18378_v29, %v11591_v8 }
 0x9fa   : > { %v14044_v59 = vpop.f32.mrb[114].mxu0  ;;  %11892 = vxpose.xlu0.b32.cont [3/16] (narrow) %v11582_v35, 8 }
 0x9fb   : > { %v11601_v13 = vpop.f32.mrb[115].mxu0  ;;  %v11607_v63 = vadd.f32 %v14044_v59, %v18378_v29 }
 0x9fc   : > { %v11602_v48 = vadd.f32 %v18378_v29, %v11601_v13 }
 0x9fe   : > { %v14047_v5 = vpop.f32.mrb[116].mxu0  ;;  %11893 = vxpose.xlu0.b32.cont [4/16] (narrow) %v11587_v38, 8 }
 0x9ff   : > { %v11611_v31 = vpop.f32.mrb[117].mxu0  ;;  %v11617_v54 = vadd.f32 %v14047_v5, %v18378_v29 }
 0xa00   : > { %v11612_v21 = vadd.f32 %v18378_v29, %v11611_v31 }
 0xa02   : > { %v14050_v22 = vpop.f32.mrb[118].mxu0  ;;  %11894 = vxpose.xlu0.b32.cont [5/16] (narrow) %v11592_v55, 8 }
 0xa03   : > { %v11621_v1 = vpop.f32.mrb[119].mxu0  ;;  %v11627_v42 = vadd.f32 %v14050_v22, %v18378_v29 }
 0xa04   : > { %v11622_v10 = vadd.f32 %v18378_v29, %v11621_v1 }
 0xa06   : > { %v14053_v9 = vpop.f32.mrb[120].mxu0  ;;  %11895 = vxpose.xlu0.b32.cont [6/16] (narrow) %v11597_v20, 8 }
 0xa07   : > { %v11631_v58 = vpop.f32.mrb[121].mxu0  ;;  %v11637_v11 = vadd.f32 %v14053_v9, %v18378_v29 }
 0xa08   : > { %v11632_v39 = vadd.f32 %v18378_v29, %v11631_v58 }
 0xa0a   : > { %v14056_v30 = vpop.f32.mrb[122].mxu0  ;;  %11896 = vxpose.xlu0.b32.cont [7/16] (narrow) %v11602_v48, 8 }
 0xa0b   : > { %v11641_v24 = vpop.f32.mrb[123].mxu0  ;;  %v11647_v32 = vadd.f32 %v14056_v30, %v18378_v29 }
 0xa0c   : > { %v11642_v7 = vadd.f32 %v18378_v29, %v11641_v24 }
 0xa0e   : > { %v14059_v28 = vpop.f32.mrb[124].mxu0  ;;  %11897 = vxpose.xlu0.b32.cont [8/16] (narrow) %v11607_v63, 8 }
 0xa0f   : > { %v11651_v49 = vpop.f32.mrb[125].mxu0  ;;  %v11657_v0 = vadd.f32 %v14059_v28, %v18378_v29 }
 0xa10   : > { %v11652_v34 = vadd.f32 %v18378_v29, %v11651_v49 }
 0xa12   : > { %v14062_v44 = vpop.f32.mrb[126].mxu0  ;;  %11922 = vxpose.xlu1.b32.start [1/16] (narrow) %v11652_v34, 8  ;;  %11898 = vxpose.xlu0.b32.cont [9/16] (narrow) %v11612_v21, 8 }
 0xa13   : > { %v11661_v6 = vpop.f32.mrb[127].mxu0  ;;  %v11667_v40 = vadd.f32 %v14062_v44, %v18378_v29 }
 0xa14   : > { %v11662_v3 = vadd.f32 %v18378_v29, %v11661_v6 }
 0xa16   : > { %v14065_v19 = vpop.f32.mrb[128].mxu0  ;;  %11923 = vxpose.xlu1.b32.cont [2/16] (narrow) %v11657_v0, 8  ;;  %11899 = vxpose.xlu0.b32.cont [10/16] (narrow) %v11617_v54, 8 }
 0xa17   : > { %v11671_v33 = vpop.f32.mrb[129].mxu0  ;;  %v11677_v50 = vadd.f32 %v14065_v19, %v18378_v29 }
 0xa18   : > { %v11672_v60 = vadd.f32 %v18378_v29, %v11671_v33 }
 0xa1a   : > { %v14068_v61 = vpop.f32.mrb[130].mxu0  ;;  %11924 = vxpose.xlu1.b32.cont [3/16] (narrow) %v11662_v3, 8  ;;  %11900 = vxpose.xlu0.b32.cont [11/16] (narrow) %v11622_v10, 8 }
 0xa1b   : > { %v11681_v26 = vpop.f32.mrb[131].mxu0  ;;  %v11687_v45 = vadd.f32 %v14068_v61, %v18378_v29 }
 0xa1c   : > { %v11682_v16 = vadd.f32 %v18378_v29, %v11681_v26 }
 0xa1e   : > { %v14071_v46 = vpop.f32.mrb[132].mxu0  ;;  %11925 = vxpose.xlu1.b32.cont [4/16] (narrow) %v11667_v40, 8  ;;  %11901 = vxpose.xlu0.b32.cont [12/16] (narrow) %v11627_v42, 8 }
 0xa1f   : > { %v11691_v37 = vpop.f32.mrb[133].mxu0  ;;  %v11697_v17 = vadd.f32 %v14071_v46, %v18378_v29 }
 0xa20   : > { %v11692_v43 = vadd.f32 %v18378_v29, %v11691_v37 }
 0xa22   : > { %v14074_v53 = vpop.f32.mrb[134].mxu0  ;;  %11926 = vxpose.xlu1.b32.cont [5/16] (narrow) %v11672_v60, 8  ;;  %11902 = vxpose.xlu0.b32.cont [13/16] (narrow) %v11632_v39, 8 }
 0xa23   : > { %v11701_v18 = vpop.f32.mrb[135].mxu0  ;;  %v11707_v8 = vadd.f32 %v14074_v53, %v18378_v29 }
 0xa24   : > { %v11702_v41 = vadd.f32 %v18378_v29, %v11701_v18 }
 0xa26   : > { %v14077_v27 = vpop.f32.mrb[136].mxu0  ;;  %11927 = vxpose.xlu1.b32.cont [6/16] (narrow) %v11677_v50, 8  ;;  %11903 = vxpose.xlu0.b32.cont [14/16] (narrow) %v11637_v11, 8 }
 0xa27   : > { %v11711_v25 = vpop.f32.mrb[137].mxu0  ;;  %v11717_v22 = vadd.f32 %v14077_v27, %v18378_v29 }
 0xa28   : > { %v11712_v38 = vadd.f32 %v18378_v29, %v11711_v25 }
 0xa2a   : > { %v14080_v14 = vpop.f32.mrb[138].mxu0  ;;  %11928 = vxpose.xlu1.b32.cont [7/16] (narrow) %v11682_v16, 8  ;;  %11904 = vxpose.xlu0.b32.cont [15/16] (narrow) %v11642_v7, 8 }
 0xa2b   : > { %v11721_v12 = vpop.f32.mrb[139].mxu0  ;;  %v11727_v63 = vadd.f32 %v14080_v14, %v18378_v29 }
 0xa2c   : > { %v11722_v58 = vadd.f32 %v18378_v29, %v11721_v12 }
 0xa2e   : > { %v14083_v47 = vpop.f32.mrb[140].mxu0  ;;  %11929 = vxpose.xlu1.b32.cont [8/16] (narrow) %v11687_v45, 8  ;;  %11905 = vxpose.xlu0.b32.end [16/16] (narrow) %v11647_v32, 8 }
 0xa2f   : > { %v11731_v15 = vpop.f32.mrb[141].mxu0  ;;  %v11737_v51 = vadd.f32 %v14083_v47, %v18378_v29 }
 0xa30   : > { %v11732_v62 = vadd.f32 %v18378_v29, %v11731_v15 }
 0xa32   : > { %v14086_v52 = vpop.f32.mrb[142].mxu0  ;;  %11930 = vxpose.xlu1.b32.cont [9/16] (narrow) %v11692_v43, 8  ;;  %11954 = vxpose.xlu0.b32.start [1/16] (narrow) %v11732_v62, 8 }
 0xa33   : > { %v11741_v56 = vpop.f32.mrb[143].mxu0  ;;  %v11747_v35 = vadd.f32 %v14086_v52, %v18378_v29 }
 0xa34   : > { %v11742_v4 = vadd.f32 %v18378_v29, %v11741_v56 }
 0xa36   : > { %v14089_v23 = vpop.f32.mrb[144].mxu0  ;;  %11931 = vxpose.xlu1.b32.cont [10/16] (narrow) %v11697_v17, 8  ;;  %11955 = vxpose.xlu0.b32.cont [2/16] (narrow) %v11737_v51, 8 }
 0xa37   : > { %v11751_v57 = vpop.f32.mrb[145].mxu0  ;;  %v11757_v1 = vadd.f32 %v14089_v23, %v18378_v29 }
 0xa38   : > { %v11752_v5 = vadd.f32 %v18378_v29, %v11751_v57 }
 0xa3a   : > { %v14092_v36 = vpop.f32.mrb[146].mxu0  ;;  %11932 = vxpose.xlu1.b32.cont [11/16] (narrow) %v11702_v41, 8  ;;  %11956 = vxpose.xlu0.b32.cont [3/16] (narrow) %v11742_v4, 8 }
 0xa3b   : > { %v11761_v2 = vpop.f32.mrb[147].mxu0  ;;  %v11767_v28 = vadd.f32 %v14092_v36, %v18378_v29 }
 0xa3c   : > { %v11762_v48 = vadd.f32 %v18378_v29, %v11761_v2 }
 0xa3e   : > { %v14095_v59 = vpop.f32.mrb[148].mxu0  ;;  %11933 = vxpose.xlu1.b32.cont [12/16] (narrow) %v11707_v8, 8  ;;  %11957 = vxpose.xlu0.b32.cont [4/16] (narrow) %v11747_v35, 8 }
 0xa3f   : > { %v11771_v13 = vpop.f32.mrb[149].mxu0  ;;  %v11777_v0 = vadd.f32 %v14095_v59, %v18378_v29 }
 0xa40   : > { %v11772_v34 = vadd.f32 %v18378_v29, %v11771_v13 }
 0xa42   : > { %v14098_v31 = vpop.f32.mrb[150].mxu0  ;;  %11934 = vxpose.xlu1.b32.cont [13/16] (narrow) %v11712_v38, 8  ;;  %11958 = vxpose.xlu0.b32.cont [5/16] (narrow) %v11752_v5, 8 }
 0xa43   : > { %v11781_v55 = vpop.f32.mrb[151].mxu0  ;;  %v11787_v40 = vadd.f32 %v14098_v31, %v18378_v29 }
 0xa44   : > { %v11782_v3 = vadd.f32 %v18378_v29, %v11781_v55 }
 0xa46   : > { %v14101_v20 = vpop.f32.mrb[152].mxu0  ;;  %11935 = vxpose.xlu1.b32.cont [14/16] (narrow) %v11717_v22, 8  ;;  %11959 = vxpose.xlu0.b32.cont [6/16] (narrow) %v11757_v1, 8 }
 0xa47   : > { %v11791_v9 = vpop.f32.mrb[153].mxu0  ;;  %v11797_v50 = vadd.f32 %v14101_v20, %v18378_v29 }
 0xa48   : > { %v11792_v60 = vadd.f32 %v18378_v29, %v11791_v9 }
 0xa4a   : > { %v14104_v30 = vpop.f32.mrb[154].mxu0  ;;  %11936 = vxpose.xlu1.b32.cont [15/16] (narrow) %v11722_v58, 8  ;;  %11960 = vxpose.xlu0.b32.cont [7/16] (narrow) %v11762_v48, 8 }
 0xa4b   : > { %v11801_v24 = vpop.f32.mrb[155].mxu0  ;;  %v11807_v45 = vadd.f32 %v14104_v30, %v18378_v29 }
 0xa4c   : > { %v11802_v16 = vadd.f32 %v18378_v29, %v11801_v24 }
 0xa4e   : > { %v14107_v49 = vpop.f32.mrb[156].mxu0  ;;  %11937 = vxpose.xlu1.b32.end [16/16] (narrow) %v11727_v63, 8  ;;  %11961 = vxpose.xlu0.b32.cont [8/16] (narrow) %v11767_v28, 8 }
 0xa4f   : > { %v11811_v21 = vpop.f32.mrb[157].mxu0  ;;  %v11817_v19 = vadd.f32 %v14107_v49, %v18378_v29 }
 0xa50   : > { %v11812_v44 = vadd.f32 %v18378_v29, %v11811_v21 }
 0xa52   : > { %v14110_v6 = vpop.f32.mrb[158].mxu0  ;;  %11986 = vxpose.xlu1.b32.start [1/16] (narrow) %v11812_v44, 8  ;;  %11962 = vxpose.xlu0.b32.cont [9/16] (narrow) %v11772_v34, 8 }
 0xa53   : > { %v11821_v54 = vpop.f32.mrb[159].mxu0  ;;  %v11827_v46 = vadd.f32 %v14110_v6, %v18378_v29 }
 0xa54   : > { %v11822_v61 = vadd.f32 %v18378_v29, %v11821_v54 }
 0xa56   : > { %v14113_v33 = vpop.f32.mrb[160].mxu0  ;;  %11987 = vxpose.xlu1.b32.cont [2/16] (narrow) %v11817_v19, 8  ;;  %11963 = vxpose.xlu0.b32.cont [10/16] (narrow) %v11777_v0, 8 }
 0xa57   : > { %v11831_v10 = vpop.f32.mrb[161].mxu0  ;;  %v11837_v27 = vadd.f32 %v14113_v33, %v18378_v29 }
 0xa58   : > { %v11832_v53 = vadd.f32 %v18378_v29, %v11831_v10 }
 0xa5a   : > { %v14116_v26 = vpop.f32.mrb[162].mxu0  ;;  %11988 = vxpose.xlu1.b32.cont [3/16] (narrow) %v11822_v61, 8  ;;  %11964 = vxpose.xlu0.b32.cont [11/16] (narrow) %v11782_v3, 8 }
 0xa5b   : > { %v11841_v42 = vpop.f32.mrb[163].mxu0  ;;  %v11847_v47 = vadd.f32 %v14116_v26, %v18378_v29 }
 0xa5c   : > { %v11842_v14 = vadd.f32 %v18378_v29, %v11841_v42 }
 0xa5e   : > { %v14119_v37 = vpop.f32.mrb[164].mxu0  ;;  %11989 = vxpose.xlu1.b32.cont [4/16] (narrow) %v11827_v46, 8  ;;  %11965 = vxpose.xlu0.b32.cont [12/16] (narrow) %v11787_v40, 8 }
 0xa5f   : > { %v11851_v39 = vpop.f32.mrb[165].mxu0  ;;  %v11857_v43 = vadd.f32 %v14119_v37, %v18378_v29 }
 0xa60   : > { %v11852_v15 = vadd.f32 %v18378_v29, %v11851_v39 }
 0xa62   : > { %v14122_v18 = vpop.f32.mrb[166].mxu0  ;;  %11990 = vxpose.xlu1.b32.cont [5/16] (narrow) %v11832_v53, 8  ;;  %11966 = vxpose.xlu0.b32.cont [13/16] (narrow) %v11792_v60, 8 }
 0xa63   : > { %v11861_v11 = vpop.f32.mrb[167].mxu0  ;;  %v11867_v52 = vadd.f32 %v14122_v18, %v18378_v29 }
 0xa64   : > { %v11862_v62 = vadd.f32 %v18378_v29, %v11861_v11 }
 0xa66   : > { %11991 = vxpose.xlu1.b32.cont [6/16] (narrow) %v11837_v27, 8  ;;  %11967 = vxpose.xlu0.b32.cont [14/16] (narrow) %v11797_v50, 8  ;;  %v14125_v25 = vpop.f32.mrb[168].mxu0 }
 0xa67   : > { %v11871_v7 = vpop.f32.mrb[169].mxu0  ;;  %v11877_v17 = vadd.f32 %v14125_v25, %v18378_v29 }
 0xa68   : > { %v11872_v56 = vadd.f32 %v18378_v29, %v11871_v7 }
 0xa6a   : > { %11992 = vxpose.xlu1.b32.cont [7/16] (narrow) %v11842_v14, 8  ;;  %11968 = vxpose.xlu0.b32.cont [15/16] (narrow) %v11802_v16, 8  ;;  %v14128_v12 = vpop.f32.mrb[170].mxu0 }
 0xa6b   : > { %v11881_v32 = vpop.f32.mrb[171].mxu0  ;;  %v11887_v23 = vadd.f32 %v14128_v12, %v18378_v29 }
 0xa6c   : > { %v11882_v51 = vadd.f32 %v18378_v29, %v11881_v32 }
 0xa6e   : > { %11993 = vxpose.xlu1.b32.cont [8/16] (narrow) %v11847_v47, 8  ;;  %11969 = vxpose.xlu0.b32.end [16/16] (narrow) %v11807_v45, 8 }
 0xa72   : > { %11994 = vxpose.xlu1.b32.cont [9/16] (narrow) %v11852_v15, 8  ;;  %v11906_v57 = vpop.trf.xlu0 }
 0xa76   : > { %11995 = vxpose.xlu1.b32.cont [10/16] (narrow) %v11857_v43, 8 }
 0xa7a   : > { %11996 = vxpose.xlu1.b32.cont [11/16] (narrow) %v11862_v62, 8 }
 0xa7e   : > { %11997 = vxpose.xlu1.b32.cont [12/16] (narrow) %v11867_v52, 8 }
 0xa82   : > { %11998 = vxpose.xlu1.b32.cont [13/16] (narrow) %v11872_v56, 8 }
 0xa86   : > { %11999 = vxpose.xlu1.b32.cont [14/16] (narrow) %v11877_v17, 8 }
 0xa8a   : > { %12000 = vxpose.xlu1.b32.cont [15/16] (narrow) %v11882_v51, 8 }
 0xa8e   : > { %12001 = vxpose.xlu1.b32.end [16/16] (narrow) %v11887_v23, 8 }
 0xa92   : > { %v11938_v41 = vpop.trf.xlu1 }
 0xa93   : > { %v12022_v4 = vcombine.low %v11906_v57, %v11938_v41 }
 0xa95   : > { %12026 = vst [vmem:[%s339_s15] sm:$0x77] %v12022_v4 }
 0xab2   : > { %v11970_v36 = vpop.trf.xlu0 }
 0xad2   : > { %v12002_v2 = vpop.trf.xlu1 }
 0xad3   : > { %v12023_v8 = vcombine.low %v11970_v36, %v12002_v2 }
 0xad5   : > { %12027 = vst [vmem:[%s339_s15 + $0x8] sm:$0x77] %v12023_v8 }
 0xad6 PF: > { %s19_s30 = sadd.s32 1, %s15275_s30  }
 0xad7   : > { %p16_p4 = scmp.ge.s32.totalorder %s19_s30, 4  }
 0xad9   :  { %18 = sbr.rel (!%p16_p4) target bundleno = 1 (0x1), region = 86 }

</bundles_post_ra>
